<compile_context>
chip_gen: v6e
topology: v6e:2x2x1
jax: 0.10.0
libtpu: 0.0.40
codegen_flags: <defaults>
</compile_context>

<pallas_src>
import functools

import numpy as np
import jax
import jax.numpy as jnp
from jax import lax
from jax.experimental import pallas as pl
from jax.experimental.pallas import tpu as pltpu

EPS = 1e-5
PAD = 2          # spatial halo (dilated 3x3 conv, dilation=2)
ROW_EXTRA = 1    # extra zero row so the largest flattened tap shift stays in-bounds
LANE = 128       # channel padding target (lane width)
SUBLANE = 8      # padded-width alignment target (sublane)


def _round_up(v, m):
    return -(-v // m) * m


# ----------------------------- Pallas kernel --------------------------------
def attention_block_kernel(
    g_hbm, x_hbm,                                # (B*rows*Wp, Cp) bf16, memory_space=ANY
    wx_w, wx_b,                                  # W_x 3x3 conv (grouped taps) + bias
    pw_w, pw_b,                                  # MSAG pointwise conv (+BN folded)
    ow_w, ow_b,                                  # MSAG ordinary 3x3 conv (+BN folded)
    dw_w, dw_b,                                  # MSAG dilated 3x3 conv (+BN folded)
    vw_w, vw_b,                                  # MSAG vote 1x1 conv (+BN folded), (3,Cp,Cp)
    ps_w, ps_b,                                  # psi 1x1 conv (+BN folded), (1,Cp)/(1,1)
    out_ref,                                     # (n_out, Cp) bf16 output tile
    g_buf, x_buf, copy_sem,                      # VMEM scratch + DMA semaphores
    *, wp, n_out, rows_buf, batch_stride, groups_d1, groups_d2,
):
    f32 = jnp.float32
    bf16 = jnp.bfloat16

    b = pl.program_id(0)
    t = pl.program_id(1)
    start = pl.multiple_of(b * batch_stride + t * n_out, SUBLANE)

    g_cp = pltpu.make_async_copy(g_hbm.at[pl.ds(start, rows_buf), :], g_buf,
                                 copy_sem.at[0])
    x_cp = pltpu.make_async_copy(x_hbm.at[pl.ds(start, rows_buf), :], x_buf,
                                 copy_sem.at[1])
    g_cp.start()
    x_cp.start()

    def conv3x3(src_ref, w_ref, groups):
        # 3x3 conv as row-shifted contiguous slices of the flattened padded tile;
        # taps are (optionally) lane-concatenated in pairs so the matmul K dim is
        # 2*Cp (= 256 when Cp == 128) on the 256-deep v6e/v7x MXU.  f32 accum.
        acc = None
        for gi, shifts in enumerate(groups):
            if len(shifts) == 1:
                lhs = src_ref[shifts[0]:shifts[0] + n_out, :]
            else:
                lhs = jnp.concatenate(
                    [src_ref[s:s + n_out, :] for s in shifts], axis=-1)
            c = jnp.dot(lhs, w_ref[gi], preferred_element_type=f32)
            acc = c if acc is None else acc + c
        return acc

    # ---- x branch first: W_x(x) overlaps the still-in-flight g copy ----------
    x_cp.wait()
    x1 = conv3x3(x_buf, wx_w, groups_d1) + wx_b[...]

    # ---- MSAG on g: vote accumulated branch-by-branch ------------------------
    g_cp.wait()
    center = PAD * wp + PAD
    g_c = g_buf[center:center + n_out, :]            # (n, Cp) bf16, output-aligned
    g_f32 = g_c.astype(f32)

    p = jnp.dot(g_c, pw_w[...], preferred_element_type=f32) + pw_b[...]
    vote_acc = jnp.dot(jnp.maximum(p, 0.0).astype(bf16), vw_w[0],
                       preferred_element_type=f32)
    p = conv3x3(g_buf, ow_w, groups_d1) + ow_b[...]
    vote_acc = vote_acc + jnp.dot(jnp.maximum(p, 0.0).astype(bf16), vw_w[1],
                                  preferred_element_type=f32)
    p = conv3x3(g_buf, dw_w, groups_d2) + dw_b[...]
    vote_acc = vote_acc + jnp.dot(jnp.maximum(p, 0.0).astype(bf16), vw_w[2],
                                  preferred_element_type=f32)
    # sigmoid: exp + reciprocal both land on the EUP slot (approx recip for vote)
    vote = pl.reciprocal(1.0 + jnp.exp(-(vote_acc + vw_b[...])), approx=True)
    g1 = g_f32 + g_f32 * vote                        # MSAG output

    # psi = sigmoid(BN(1x1 conv(g1 + x1))), Cout = 1  ->  lane (XLU) reduction.
    psi_in = g1 + x1
    psi = pl.reciprocal(
        1.0 + jnp.exp(-(jnp.sum(psi_in * ps_w[...], axis=-1, keepdims=True)
                        + ps_b[...])),
        approx=False)

    out_ref[...] = (x1 * psi + g1).astype(out_ref.dtype)


# ------------------------------ weight helpers --------------------------------
def _conv3x3_taps(w):
    # (Cout, Cin, 3, 3) -> (9, Cin, Cout), tap index = ky*3 + kx
    return jnp.transpose(w, (2, 3, 1, 0)).reshape(9, w.shape[1], w.shape[0])


def _conv1x1_mat(w):
    # (Cout, Cin, 1, 1) -> (Cin, Cout)
    return jnp.transpose(w[:, :, 0, 0], (1, 0))


def _fold_bn(w, b, gamma, beta, mean, var):
    # Fold eval-mode BN into conv weights/bias; scale applies along Cout (last axis).
    s = gamma / jnp.sqrt(var + EPS)
    return w * s, (b - mean) * s + beta


def _pad_last2(w, cp):
    pads = [(0, 0)] * (w.ndim - 2) + [(0, cp - w.shape[-2]), (0, cp - w.shape[-1])]
    return jnp.pad(w, pads)


def _pad_last(v, cp):
    return jnp.pad(v, [(0, 0)] * (v.ndim - 1) + [(0, cp - v.shape[-1])])


def _tap_shifts(dil, wp):
    return [(PAD - dil + ky * dil) * wp + (PAD - dil + kx * dil)
            for ky in range(3) for kx in range(3)]


def _group_shifts(shifts, gk):
    if gk == 1:
        return tuple((s,) for s in shifts)
    gs = [(shifts[i], shifts[i + 1]) for i in range(0, 8, 2)]
    gs.append((shifts[8], shifts[0]))        # dummy partner; its weight half is zero
    return tuple(gs)


def _group_taps(taps, gk):
    # taps: (9, Cp, Cp) -> gk == 2: (5, 2*Cp, Cp) with a zero half for the 9th tap.
    if gk == 1:
        return taps
    groups = [jnp.concatenate([taps[i], taps[i + 1]], axis=0) for i in range(0, 8, 2)]
    groups.append(jnp.concatenate([taps[8], jnp.zeros_like(taps[8])], axis=0))
    return jnp.stack(groups, axis=0)


# ------------------------------ tiling helpers ---------------------------------
def _vmem_limit_bytes():
    cap = 64 << 20                            # conservative fallback (v7x-sized)
    try:
        info = pltpu.get_tpu_info()
        cap = int(getattr(info, "vmem_capacity_bytes", cap) or cap)
    except Exception:
        pass
    # headroom for compiler-internal scratch; never request more than ~100 MiB
    return int(max(32 << 20, min(cap - (16 << 20), 100 << 20)))


def _choose_tile_h(B, H, Wp, Cp, weight_bytes, vmem_limit):
    budget = int(0.8 * vmem_limit) - weight_bytes - (2 << 20)
    budget = max(budget, 1 << 20)

    def tile_bytes(th):
        n = th * Wp
        rows_buf = (th + 2 * PAD + ROW_EXTRA) * Wp
        in_b = 2 * rows_buf * Cp * 2          # g_buf + x_buf bf16 scratch (single-buffered)
        out_b = 2 * n * Cp * 2                # double-buffered bf16 output block
        interm = 8 * n * Cp * 4               # in-kernel f32 intermediates (x1, g1, p, acc, ...)
        return in_b + out_b + interm

    # B == 1: force >= 2 row tiles so both TensorCores get work on megacore parts.
    th = H if B > 1 else max(1, -(-H // 2))
    while th > 1 and (tile_bytes(th) > budget or th * Wp > 16384):
        th -= 1
    return max(1, th)


# ------------------------------ parameters -------------------------------------
def init_params(key, C):
    ks = jax.random.split(key, 16)
    nrm = lambda k, shape, s=0.1: s * jax.random.normal(k, shape, jnp.float32)
    p = {}
    p['wx_w'] = nrm(ks[0], (C, C, 3, 3));      p['wx_b'] = nrm(ks[1], (C,))
    p['pw_w'] = nrm(ks[2], (C, C, 1, 1));      p['pw_b'] = nrm(ks[3], (C,))
    p['ow_w'] = nrm(ks[4], (C, C, 3, 3));      p['ow_b'] = nrm(ks[5], (C,))
    p['dw_w'] = nrm(ks[6], (C, C, 3, 3));      p['dw_b'] = nrm(ks[7], (C,))
    p['vw_w'] = nrm(ks[8], (C, 3 * C, 1, 1));  p['vw_b'] = nrm(ks[9], (C,))
    p['ps_w'] = nrm(ks[10], (1, C, 1, 1));     p['ps_b'] = nrm(ks[11], (1,))

    def bn(k, n):
        k1, k2, k3, k4 = jax.random.split(k, 4)
        return dict(gamma=1.0 + 0.1 * jax.random.normal(k1, (n,), jnp.float32),
                    beta=0.1 * jax.random.normal(k2, (n,), jnp.float32),
                    mean=0.1 * jax.random.normal(k3, (n,), jnp.float32),
                    var=1.0 + 0.1 * jax.random.uniform(k4, (n,), jnp.float32))

    p['bn_pw'] = bn(ks[12], C)
    p['bn_ow'] = bn(ks[13], C)
    p['bn_dw'] = bn(ks[14], C)
    k15a, k15b = jax.random.split(ks[15])
    p['bn_vw'] = bn(k15a, C)
    p['bn_ps'] = bn(k15b, 1)
    return p


# ------------------------------ Pallas wrapper ----------------------------------
def attention_block_pallas(x_nchw, g_nchw, params, *, tile_h=None,
                           out_dtype=jnp.bfloat16, nchw_out=True):
    B, C, H, W = x_nchw.shape
    f32, bf16 = jnp.float32, jnp.bfloat16

    # NHWC puts channels on the lane dim.  (If the caller can hand us NHWC and
    # consume NHWC, both transpose passes disappear.)
    x = jnp.transpose(x_nchw, (0, 2, 3, 1))
    g = jnp.transpose(g_nchw, (0, 2, 3, 1))

    Cp = _round_up(C, LANE)                  # lane-dense channels
    Wp = _round_up(W + 2 * PAD, SUBLANE)     # sublane-aligned padded width
    gk = 2 if Cp <= LANE else 1              # tap-pair grouping -> matmul K = 2*Cp

    # ---- fold BN, channel-pad, group taps, cast matmul weights to bf16 -------
    p = params

    def prep3x3(w, b, bnp=None):
        taps, bias = _conv3x3_taps(w), b
        if bnp is not None:
            taps, bias = _fold_bn(taps, bias, **bnp)
        taps = _group_taps(_pad_last2(taps, Cp), gk)
        return taps.astype(bf16), _pad_last(bias.reshape(1, C), Cp).astype(f32)

    wx_w, wx_b = prep3x3(p['wx_w'], p['wx_b'])
    ow_w, ow_b = prep3x3(p['ow_w'], p['ow_b'], p['bn_ow'])
    dw_w, dw_b = prep3x3(p['dw_w'], p['dw_b'], p['bn_dw'])

    pw_m, pw_bias = _fold_bn(_conv1x1_mat(p['pw_w']), p['pw_b'], **p['bn_pw'])
    pw_w = _pad_last2(pw_m, Cp).astype(bf16)
    pw_b = _pad_last(pw_bias.reshape(1, C), Cp).astype(f32)

    vw_m, vw_bias = _fold_bn(_conv1x1_mat(p['vw_w']), p['vw_b'], **p['bn_vw'])
    vw_w = jnp.stack([_pad_last2(vw_m[i * C:(i + 1) * C], Cp) for i in range(3)],
                     axis=0).astype(bf16)     # (3, Cp, Cp) concat groups
    vw_b = _pad_last(vw_bias.reshape(1, C), Cp).astype(f32)

    ps_m, ps_bias = _fold_bn(_conv1x1_mat(p['ps_w']), p['ps_b'], **p['bn_ps'])
    ps_w = _pad_last(ps_m[:, 0].reshape(1, C), Cp).astype(f32)
    ps_b = ps_bias.reshape(1, 1).astype(f32)

    weights = [wx_w, wx_b, pw_w, pw_b, ow_w, ow_b, dw_w, dw_b, vw_w, vw_b, ps_w, ps_b]
    weight_bytes = sum(int(np.prod(w.shape)) * w.dtype.itemsize for w in weights)

    # ---- generation-aware tiling ----------------------------------------------
    vmem_limit = _vmem_limit_bytes()
    if tile_h is None:
        tile_h = _choose_tile_h(B, H, Wp, Cp, weight_bytes, vmem_limit)
    tile_h = max(1, min(int(tile_h), H))
    nt = -(-H // tile_h)
    H_eff = nt * tile_h
    n_out = tile_h * Wp
    rows_buf = (tile_h + 2 * PAD + ROW_EXTRA) * Wp
    rows_total = H_eff + 2 * PAD + ROW_EXTRA
    batch_stride = rows_total * Wp

    # ---- pad + flatten inputs ONCE (no halo duplication, single HBM pass) -----
    def prep_input(a):
        a = jnp.pad(a, ((0, 0),
                        (PAD, rows_total - H - PAD),
                        (PAD, Wp - W - PAD),
                        (0, Cp - C)))
        return a.astype(bf16).reshape(B * batch_stride, Cp)

    g_flat = prep_input(g)
    x_flat = prep_input(x)

    groups_d1 = _group_shifts(_tap_shifts(1, Wp), gk)
    groups_d2 = _group_shifts(_tap_shifts(2, Wp), gk)

    kernel = functools.partial(
        attention_block_kernel, wp=Wp, n_out=n_out, rows_buf=rows_buf,
        batch_stride=batch_stride, groups_d1=groups_d1, groups_d2=groups_d2)

    any_spec = pl.BlockSpec(memory_space=pl.ANY)                       # manual DMA
    weight_spec = pl.BlockSpec(memory_space=pltpu.MemorySpace.VMEM)    # single-buffered resident

    total_rows = B * nt * n_out
    cost = pl.CostEstimate(
        flops=int(2 * total_rows * (31 * Cp * Cp + Cp)),
        transcendentals=int(2 * total_rows * (Cp + 1)),
        bytes_accessed=int(2 * B * batch_stride * Cp * 2
                           + total_rows * Cp * 2 + weight_bytes))

    out = pl.pallas_call(
        kernel,
        out_shape=jax.ShapeDtypeStruct((B, nt * n_out, Cp), out_dtype),
        grid=(B, nt),
        in_specs=[any_spec, any_spec] + [weight_spec] * len(weights),
        out_specs=pl.BlockSpec((None, n_out, Cp), lambda b, t: (b, t, 0)),
        scratch_shapes=[pltpu.VMEM((rows_buf, Cp), bf16),
                        pltpu.VMEM((rows_buf, Cp), bf16),
                        pltpu.SemaphoreType.DMA((2,))],
        compiler_params=pltpu.CompilerParams(
            dimension_semantics=("parallel", "parallel"),
            vmem_limit_bytes=vmem_limit),
        cost_estimate=cost,
    )(g_flat, x_flat, *weights)

    # drop padded rows / columns / channels (single fused slice pass)
    out = out.reshape(B, H_eff, Wp, Cp)[:, :H, :W, :C]
    if nchw_out:
        out = jnp.transpose(out, (0, 3, 1, 2))
    return out


# ------------------------------ pure-JAX reference -------------------------------
def attention_block_ref(x_nchw, g_nchw, params):
    def conv(x, w, b, dilation=1):
        pad = dilation * (w.shape[-1] // 2)
        out = lax.conv_general_dilated(
            x, w, window_strides=(1, 1), padding=((pad, pad), (pad, pad)),
            rhs_dilation=(dilation, dilation),
            dimension_numbers=('NCHW', 'OIHW', 'NCHW'),
            precision=lax.Precision.HIGHEST)
        return out + b[None, :, None, None]

    def bn(x, bnp):
        s = bnp['gamma'] / jnp.sqrt(bnp['var'] + EPS)
        return ((x - bnp['mean'][None, :, None, None]) * s[None, :, None, None]
                + bnp['beta'][None, :, None, None])

    sig = lambda z: 1.0 / (1.0 + jnp.exp(-z))
    p = params
    g = g_nchw
    m1 = bn(conv(g, p['pw_w'], p['pw_b']), p['bn_pw'])
    m2 = bn(conv(g, p['ow_w'], p['ow_b']), p['bn_ow'])
    m3 = bn(conv(g, p['dw_w'], p['dw_b'], dilation=2), p['bn_dw'])
    cat = jax.nn.relu(jnp.concatenate([m1, m2, m3], axis=1))
    vote = sig(bn(conv(cat, p['vw_w'], p['vw_b']), p['bn_vw']))
    g1 = g + g * vote
    x1 = conv(x_nchw, p['wx_w'], p['wx_b'])
    psi = sig(bn(conv(g1 + x1, p['ps_w'], p['ps_b']), p['bn_ps']))
    return x1 * psi + g1


if __name__ == "__main__":
    key = jax.random.PRNGKey(0)
    kx_, kg_, kp_ = jax.random.split(key, 3)
    B, C, H, W = 2, 4, 16, 16
    x = jax.random.normal(kx_, (B, C, H, W), jnp.float32)
    g = jax.random.normal(kg_, (B, C, H, W), jnp.float32)
    params = init_params(kp_, C)

    ref = np.asarray(attention_block_ref(x, g, params))

    # explicit small tile: exercises the multi-tile halo'd manual-DMA path
    out_tiled = jax.block_until_ready(attention_block_pallas(x, g, params, tile_h=4))
    np.testing.assert_allclose(np.asarray(out_tiled.astype(jnp.float32)), ref,
                               rtol=2e-2, atol=2e-2)

    # auto-chosen tile (generation-aware VMEM budget)
    out_auto = jax.block_until_ready(attention_block_pallas(x, g, params))
    np.testing.assert_allclose(np.asarray(out_auto.astype(jnp.float32)), ref,
                               rtol=2e-2, atol=2e-2)

    print("KERNEL_OK")
</pallas_src>

<mosaic_0001>
module attributes {stable_mosaic.version = 11 : i64} {
  func.func @attention_block_kernel(%arg0: i32, %arg1: i32, %arg2: memref<1008x128xbf16, #tpu.memory_space<any>>, %arg3: memref<1008x128xbf16, #tpu.memory_space<any>>, %arg4: memref<5x256x128xbf16, #tpu.memory_space<vmem>>, %arg5: memref<1x128xf32, #tpu.memory_space<vmem>>, %arg6: memref<128x128xbf16, #tpu.memory_space<vmem>>, %arg7: memref<1x128xf32, #tpu.memory_space<vmem>>, %arg8: memref<5x256x128xbf16, #tpu.memory_space<vmem>>, %arg9: memref<1x128xf32, #tpu.memory_space<vmem>>, %arg10: memref<5x256x128xbf16, #tpu.memory_space<vmem>>, %arg11: memref<1x128xf32, #tpu.memory_space<vmem>>, %arg12: memref<3x128x128xbf16, #tpu.memory_space<vmem>>, %arg13: memref<1x128xf32, #tpu.memory_space<vmem>>, %arg14: memref<1x128xf32, #tpu.memory_space<vmem>>, %arg15: memref<1x1xf32, #tpu.memory_space<vmem>>, %arg16: memref<1x96x128xbf16, #tpu.memory_space<vmem>>, %arg17: memref<216x128xbf16, #tpu.memory_space<vmem>>, %arg18: memref<216x128xbf16, #tpu.memory_space<vmem>>, %arg19: memref<2x!tpu.dma_semaphore, #tpu.memory_space<semaphore_mem>>) attributes {dimension_semantics = [#tpu.dimension_semantics<parallel>, #tpu.dimension_semantics<parallel>], iteration_bounds = array<i64: 2, 4>, scalar_prefetch = 0 : i64, scratch_operands = 3 : i64, tpu.core_type = #tpu.core_type<tc>, window_params = [{}, {}, {pipeline_mode = #tpu.pipeline_mode<synchronous>, transform_indices = @transform_2, window_bounds = array<i64: 5, 256, 128>}, {pipeline_mode = #tpu.pipeline_mode<synchronous>, transform_indices = @transform_3, window_bounds = array<i64: 1, 128>}, {pipeline_mode = #tpu.pipeline_mode<synchronous>, transform_indices = @transform_4, window_bounds = array<i64: 128, 128>}, {pipeline_mode = #tpu.pipeline_mode<synchronous>, transform_indices = @transform_5, window_bounds = array<i64: 1, 128>}, {pipeline_mode = #tpu.pipeline_mode<synchronous>, transform_indices = @transform_6, window_bounds = array<i64: 5, 256, 128>}, {pipeline_mode = #tpu.pipeline_mode<synchronous>, transform_indices = @transform_7, window_bounds = array<i64: 1, 128>}, {pipeline_mode = #tpu.pipeline_mode<synchronous>, transform_indices = @transform_8, window_bounds = array<i64: 5, 256, 128>}, {pipeline_mode = #tpu.pipeline_mode<synchronous>, transform_indices = @transform_9, window_bounds = array<i64: 1, 128>}, {pipeline_mode = #tpu.pipeline_mode<synchronous>, transform_indices = @transform_10, window_bounds = array<i64: 3, 128, 128>}, {pipeline_mode = #tpu.pipeline_mode<synchronous>, transform_indices = @transform_11, window_bounds = array<i64: 1, 128>}, {pipeline_mode = #tpu.pipeline_mode<synchronous>, transform_indices = @transform_12, window_bounds = array<i64: 1, 128>}, {pipeline_mode = #tpu.pipeline_mode<synchronous>, transform_indices = @transform_13, window_bounds = array<i64: 1, 1>}, {transform_indices = @transform_14, window_bounds = array<i64: 1, 96, 128>}]} {
    %c504_i32 = arith.constant 504 : i32
    %0 = arith.muli %arg0, %c504_i32 : i32
    %c96_i32 = arith.constant 96 : i32
    %1 = arith.muli %arg1, %c96_i32 : i32
    %2 = arith.addi %0, %1 : i32
    %3 = tpu.assume_multiple %2, 8 : i32
    %c0_i32 = arith.constant 0 : i32
    %c0_i32_0 = arith.constant 0 : i32
    %4 = tpu.memref_slice %arg2[%3, %c0_i32_0] : memref<1008x128xbf16, #tpu.memory_space<any>> -> memref<216x128xbf16, #tpu.memory_space<any>>
    %5 = tpu.memref_slice %arg19[%c0_i32] : memref<2x!tpu.dma_semaphore, #tpu.memory_space<semaphore_mem>> -> memref<1x!tpu.dma_semaphore, #tpu.memory_space<semaphore_mem>>
    %6 = tpu.memref_squeeze %5 : memref<1x!tpu.dma_semaphore, #tpu.memory_space<semaphore_mem>> -> memref<!tpu.dma_semaphore, #tpu.memory_space<semaphore_mem>>
    tpu.enqueue_dma source(%4 : memref<216x128xbf16, #tpu.memory_space<any>>) target(%arg17 : memref<216x128xbf16, #tpu.memory_space<vmem>>) target_semaphore(%6 : memref<!tpu.dma_semaphore, #tpu.memory_space<semaphore_mem>>)
    %c1_i32 = arith.constant 1 : i32
    %c0_i32_1 = arith.constant 0 : i32
    %7 = tpu.memref_slice %arg3[%3, %c0_i32_1] : memref<1008x128xbf16, #tpu.memory_space<any>> -> memref<216x128xbf16, #tpu.memory_space<any>>
    %8 = tpu.memref_slice %arg19[%c1_i32] : memref<2x!tpu.dma_semaphore, #tpu.memory_space<semaphore_mem>> -> memref<1x!tpu.dma_semaphore, #tpu.memory_space<semaphore_mem>>
    %9 = tpu.memref_squeeze %8 : memref<1x!tpu.dma_semaphore, #tpu.memory_space<semaphore_mem>> -> memref<!tpu.dma_semaphore, #tpu.memory_space<semaphore_mem>>
    tpu.enqueue_dma source(%7 : memref<216x128xbf16, #tpu.memory_space<any>>) target(%arg18 : memref<216x128xbf16, #tpu.memory_space<vmem>>) target_semaphore(%9 : memref<!tpu.dma_semaphore, #tpu.memory_space<semaphore_mem>>)
    %c1_i32_2 = arith.constant 1 : i32
    %c0_i32_3 = arith.constant 0 : i32
    %10 = tpu.memref_slice %arg3[%3, %c0_i32_3] : memref<1008x128xbf16, #tpu.memory_space<any>> -> memref<216x128xbf16, #tpu.memory_space<any>>
    %11 = tpu.memref_slice %arg19[%c1_i32_2] : memref<2x!tpu.dma_semaphore, #tpu.memory_space<semaphore_mem>> -> memref<1x!tpu.dma_semaphore, #tpu.memory_space<semaphore_mem>>
    %12 = tpu.memref_squeeze %11 : memref<1x!tpu.dma_semaphore, #tpu.memory_space<semaphore_mem>> -> memref<!tpu.dma_semaphore, #tpu.memory_space<semaphore_mem>>
    tpu.wait_dma2 semaphore(%12 : memref<!tpu.dma_semaphore, #tpu.memory_space<semaphore_mem>>) src(%10 : memref<216x128xbf16, #tpu.memory_space<any>>) dst(%arg18 : memref<216x128xbf16, #tpu.memory_space<vmem>>)
    %c25 = arith.constant 25 : index
    %c0 = arith.constant 0 : index
    %13 = vector.load %arg18[%c25, %c0] : memref<216x128xbf16, #tpu.memory_space<vmem>>, vector<96x128xbf16>
    %c26 = arith.constant 26 : index
    %c0_4 = arith.constant 0 : index
    %14 = vector.load %arg18[%c26, %c0_4] : memref<216x128xbf16, #tpu.memory_space<vmem>>, vector<96x128xbf16>
    %15 = tpu.concatenate %13, %14 in 1 : vector<96x128xbf16>, vector<96x128xbf16> -> vector<96x256xbf16>
    %c0_5 = arith.constant 0 : index
    %c0_6 = arith.constant 0 : index
    %c0_7 = arith.constant 0 : index
    %16 = vector.load %arg4[%c0_5, %c0_6, %c0_7] : memref<5x256x128xbf16, #tpu.memory_space<vmem>>, vector<1x256x128xbf16>
    %17 = vector.shape_cast %16 : vector<1x256x128xbf16> to vector<256x128xbf16>
    %cst = arith.constant dense<0.000000e+00> : vector<96x128xf32>
    %18 = tpu.matmul %15, %17, %cst {dimension_numbers = #tpu.dot_dimension_numbers<[1], [0], [0], [1], [0, 0, 1, 1], [], []>} : vector<96x256xbf16>, vector<256x128xbf16>, vector<96x128xf32> -> vector<96x128xf32>
    %c27 = arith.constant 27 : index
    %c0_8 = arith.constant 0 : index
    %19 = vector.load %arg18[%c27, %c0_8] : memref<216x128xbf16, #tpu.memory_space<vmem>>, vector<96x128xbf16>
    %c49 = arith.constant 49 : index
    %c0_9 = arith.constant 0 : index
    %20 = vector.load %arg18[%c49, %c0_9] : memref<216x128xbf16, #tpu.memory_space<vmem>>, vector<96x128xbf16>
    %21 = tpu.concatenate %19, %20 in 1 : vector<96x128xbf16>, vector<96x128xbf16> -> vector<96x256xbf16>
    %c1 = arith.constant 1 : index
    %c0_10 = arith.constant 0 : index
    %c0_11 = arith.constant 0 : index
    %22 = vector.load %arg4[%c1, %c0_10, %c0_11] : memref<5x256x128xbf16, #tpu.memory_space<vmem>>, vector<1x256x128xbf16>
    %23 = vector.shape_cast %22 : vector<1x256x128xbf16> to vector<256x128xbf16>
    %cst_12 = arith.constant dense<0.000000e+00> : vector<96x128xf32>
    %24 = tpu.matmul %21, %23, %cst_12 {dimension_numbers = #tpu.dot_dimension_numbers<[1], [0], [0], [1], [0, 0, 1, 1], [], []>} : vector<96x256xbf16>, vector<256x128xbf16>, vector<96x128xf32> -> vector<96x128xf32>
    %25 = arith.addf %18, %24 : vector<96x128xf32>
    %c50 = arith.constant 50 : index
    %c0_13 = arith.constant 0 : index
    %26 = vector.load %arg18[%c50, %c0_13] : memref<216x128xbf16, #tpu.memory_space<vmem>>, vector<96x128xbf16>
    %c51 = arith.constant 51 : index
    %c0_14 = arith.constant 0 : index
    %27 = vector.load %arg18[%c51, %c0_14] : memref<216x128xbf16, #tpu.memory_space<vmem>>, vector<96x128xbf16>
    %28 = tpu.concatenate %26, %27 in 1 : vector<96x128xbf16>, vector<96x128xbf16> -> vector<96x256xbf16>
    %c2 = arith.constant 2 : index
    %c0_15 = arith.constant 0 : index
    %c0_16 = arith.constant 0 : index
    %29 = vector.load %arg4[%c2, %c0_15, %c0_16] : memref<5x256x128xbf16, #tpu.memory_space<vmem>>, vector<1x256x128xbf16>
    %30 = vector.shape_cast %29 : vector<1x256x128xbf16> to vector<256x128xbf16>
    %cst_17 = arith.constant dense<0.000000e+00> : vector<96x128xf32>
    %31 = tpu.matmul %28, %30, %cst_17 {dimension_numbers = #tpu.dot_dimension_numbers<[1], [0], [0], [1], [0, 0, 1, 1], [], []>} : vector<96x256xbf16>, vector<256x128xbf16>, vector<96x128xf32> -> vector<96x128xf32>
    %32 = arith.addf %25, %31 : vector<96x128xf32>
    %c73 = arith.constant 73 : index
    %c0_18 = arith.constant 0 : index
    %33 = vector.load %arg18[%c73, %c0_18] : memref<216x128xbf16, #tpu.memory_space<vmem>>, vector<96x128xbf16>
    %c74 = arith.constant 74 : index
    %c0_19 = arith.constant 0 : index
    %34 = vector.load %arg18[%c74, %c0_19] : memref<216x128xbf16, #tpu.memory_space<vmem>>, vector<96x128xbf16>
    %35 = tpu.concatenate %33, %34 in 1 : vector<96x128xbf16>, vector<96x128xbf16> -> vector<96x256xbf16>
    %c3 = arith.constant 3 : index
    %c0_20 = arith.constant 0 : index
    %c0_21 = arith.constant 0 : index
    %36 = vector.load %arg4[%c3, %c0_20, %c0_21] : memref<5x256x128xbf16, #tpu.memory_space<vmem>>, vector<1x256x128xbf16>
    %37 = vector.shape_cast %36 : vector<1x256x128xbf16> to vector<256x128xbf16>
    %cst_22 = arith.constant dense<0.000000e+00> : vector<96x128xf32>
    %38 = tpu.matmul %35, %37, %cst_22 {dimension_numbers = #tpu.dot_dimension_numbers<[1], [0], [0], [1], [0, 0, 1, 1], [], []>} : vector<96x256xbf16>, vector<256x128xbf16>, vector<96x128xf32> -> vector<96x128xf32>
    %39 = arith.addf %32, %38 : vector<96x128xf32>
    %c75 = arith.constant 75 : index
    %c0_23 = arith.constant 0 : index
    %40 = vector.load %arg18[%c75, %c0_23] : memref<216x128xbf16, #tpu.memory_space<vmem>>, vector<96x128xbf16>
    %c25_24 = arith.constant 25 : index
    %c0_25 = arith.constant 0 : index
    %41 = vector.load %arg18[%c25_24, %c0_25] : memref<216x128xbf16, #tpu.memory_space<vmem>>, vector<96x128xbf16>
    %42 = tpu.concatenate %40, %41 in 1 : vector<96x128xbf16>, vector<96x128xbf16> -> vector<96x256xbf16>
    %c4 = arith.constant 4 : index
    %c0_26 = arith.constant 0 : index
    %c0_27 = arith.constant 0 : index
    %43 = vector.load %arg4[%c4, %c0_26, %c0_27] : memref<5x256x128xbf16, #tpu.memory_space<vmem>>, vector<1x256x128xbf16>
    %44 = vector.shape_cast %43 : vector<1x256x128xbf16> to vector<256x128xbf16>
    %cst_28 = arith.constant dense<0.000000e+00> : vector<96x128xf32>
    %45 = tpu.matmul %42, %44, %cst_28 {dimension_numbers = #tpu.dot_dimension_numbers<[1], [0], [0], [1], [0, 0, 1, 1], [], []>} : vector<96x256xbf16>, vector<256x128xbf16>, vector<96x128xf32> -> vector<96x128xf32>
    %46 = arith.addf %39, %45 : vector<96x128xf32>
    %c0_29 = arith.constant 0 : index
    %c0_30 = arith.constant 0 : index
    %47 = vector.load %arg5[%c0_29, %c0_30] : memref<1x128xf32, #tpu.memory_space<vmem>>, vector<1x128xf32>
    %48 = vector.broadcast %47 : vector<1x128xf32> to vector<96x128xf32>
    %49 = arith.addf %46, %48 : vector<96x128xf32>
    %c0_i32_31 = arith.constant 0 : i32
    %c0_i32_32 = arith.constant 0 : i32
    %50 = tpu.memref_slice %arg2[%3, %c0_i32_32] : memref<1008x128xbf16, #tpu.memory_space<any>> -> memref<216x128xbf16, #tpu.memory_space<any>>
    %51 = tpu.memref_slice %arg19[%c0_i32_31] : memref<2x!tpu.dma_semaphore, #tpu.memory_space<semaphore_mem>> -> memref<1x!tpu.dma_semaphore, #tpu.memory_space<semaphore_mem>>
    %52 = tpu.memref_squeeze %51 : memref<1x!tpu.dma_semaphore, #tpu.memory_space<semaphore_mem>> -> memref<!tpu.dma_semaphore, #tpu.memory_space<semaphore_mem>>
    tpu.wait_dma2 semaphore(%52 : memref<!tpu.dma_semaphore, #tpu.memory_space<semaphore_mem>>) src(%50 : memref<216x128xbf16, #tpu.memory_space<any>>) dst(%arg17 : memref<216x128xbf16, #tpu.memory_space<vmem>>)
    %c50_33 = arith.constant 50 : index
    %c0_34 = arith.constant 0 : index
    %53 = vector.load %arg17[%c50_33, %c0_34] : memref<216x128xbf16, #tpu.memory_space<vmem>>, vector<96x128xbf16>
    %54 = arith.extf %53 : vector<96x128xbf16> to vector<96x128xf32>
    %c0_35 = arith.constant 0 : index
    %c0_36 = arith.constant 0 : index
    %55 = vector.load %arg6[%c0_35, %c0_36] : memref<128x128xbf16, #tpu.memory_space<vmem>>, vector<128x128xbf16>
    %cst_37 = arith.constant dense<0.000000e+00> : vector<96x128xf32>
    %56 = tpu.matmul %53, %55, %cst_37 {dimension_numbers = #tpu.dot_dimension_numbers<[1], [0], [0], [1], [0, 0, 1, 1], [], []>} : vector<96x128xbf16>, vector<128x128xbf16>, vector<96x128xf32> -> vector<96x128xf32>
    %c0_38 = arith.constant 0 : index
    %c0_39 = arith.constant 0 : index
    %57 = vector.load %arg7[%c0_38, %c0_39] : memref<1x128xf32, #tpu.memory_space<vmem>>, vector<1x128xf32>
    %58 = vector.broadcast %57 : vector<1x128xf32> to vector<96x128xf32>
    %59 = arith.addf %56, %58 : vector<96x128xf32>
    %cst_40 = arith.constant 0.000000e+00 : f32
    %60 = vector.broadcast %cst_40 : f32 to vector<96x128xf32>
    %61 = arith.maximumf %59, %60 : vector<96x128xf32>
    %62 = arith.truncf %61 : vector<96x128xf32> to vector<96x128xbf16>
    %c0_41 = arith.constant 0 : index
    %c0_42 = arith.constant 0 : index
    %c0_43 = arith.constant 0 : index
    %63 = vector.load %arg12[%c0_41, %c0_42, %c0_43] : memref<3x128x128xbf16, #tpu.memory_space<vmem>>, vector<1x128x128xbf16>
    %64 = vector.shape_cast %63 : vector<1x128x128xbf16> to vector<128x128xbf16>
    %cst_44 = arith.constant dense<0.000000e+00> : vector<96x128xf32>
    %65 = tpu.matmul %62, %64, %cst_44 {dimension_numbers = #tpu.dot_dimension_numbers<[1], [0], [0], [1], [0, 0, 1, 1], [], []>} : vector<96x128xbf16>, vector<128x128xbf16>, vector<96x128xf32> -> vector<96x128xf32>
    %c25_45 = arith.constant 25 : index
    %c0_46 = arith.constant 0 : index
    %66 = vector.load %arg17[%c25_45, %c0_46] : memref<216x128xbf16, #tpu.memory_space<vmem>>, vector<96x128xbf16>
    %c26_47 = arith.constant 26 : index
    %c0_48 = arith.constant 0 : index
    %67 = vector.load %arg17[%c26_47, %c0_48] : memref<216x128xbf16, #tpu.memory_space<vmem>>, vector<96x128xbf16>
    %68 = tpu.concatenate %66, %67 in 1 : vector<96x128xbf16>, vector<96x128xbf16> -> vector<96x256xbf16>
    %c0_49 = arith.constant 0 : index
    %c0_50 = arith.constant 0 : index
    %c0_51 = arith.constant 0 : index
    %69 = vector.load %arg8[%c0_49, %c0_50, %c0_51] : memref<5x256x128xbf16, #tpu.memory_space<vmem>>, vector<1x256x128xbf16>
    %70 = vector.shape_cast %69 : vector<1x256x128xbf16> to vector<256x128xbf16>
    %cst_52 = arith.constant dense<0.000000e+00> : vector<96x128xf32>
    %71 = tpu.matmul %68, %70, %cst_52 {dimension_numbers = #tpu.dot_dimension_numbers<[1], [0], [0], [1], [0, 0, 1, 1], [], []>} : vector<96x256xbf16>, vector<256x128xbf16>, vector<96x128xf32> -> vector<96x128xf32>
    %c27_53 = arith.constant 27 : index
    %c0_54 = arith.constant 0 : index
    %72 = vector.load %arg17[%c27_53, %c0_54] : memref<216x128xbf16, #tpu.memory_space<vmem>>, vector<96x128xbf16>
    %c49_55 = arith.constant 49 : index
    %c0_56 = arith.constant 0 : index
    %73 = vector.load %arg17[%c49_55, %c0_56] : memref<216x128xbf16, #tpu.memory_space<vmem>>, vector<96x128xbf16>
    %74 = tpu.concatenate %72, %73 in 1 : vector<96x128xbf16>, vector<96x128xbf16> -> vector<96x256xbf16>
    %c1_57 = arith.constant 1 : index
    %c0_58 = arith.constant 0 : index
    %c0_59 = arith.constant 0 : index
    %75 = vector.load %arg8[%c1_57, %c0_58, %c0_59] : memref<5x256x128xbf16, #tpu.memory_space<vmem>>, vector<1x256x128xbf16>
    %76 = vector.shape_cast %75 : vector<1x256x128xbf16> to vector<256x128xbf16>
    %cst_60 = arith.constant dense<0.000000e+00> : vector<96x128xf32>
    %77 = tpu.matmul %74, %76, %cst_60 {dimension_numbers = #tpu.dot_dimension_numbers<[1], [0], [0], [1], [0, 0, 1, 1], [], []>} : vector<96x256xbf16>, vector<256x128xbf16>, vector<96x128xf32> -> vector<96x128xf32>
    %78 = arith.addf %71, %77 : vector<96x128xf32>
    %c50_61 = arith.constant 50 : index
    %c0_62 = arith.constant 0 : index
    %79 = vector.load %arg17[%c50_61, %c0_62] : memref<216x128xbf16, #tpu.memory_space<vmem>>, vector<96x128xbf16>
    %c51_63 = arith.constant 51 : index
    %c0_64 = arith.constant 0 : index
    %80 = vector.load %arg17[%c51_63, %c0_64] : memref<216x128xbf16, #tpu.memory_space<vmem>>, vector<96x128xbf16>
    %81 = tpu.concatenate %79, %80 in 1 : vector<96x128xbf16>, vector<96x128xbf16> -> vector<96x256xbf16>
    %c2_65 = arith.constant 2 : index
    %c0_66 = arith.constant 0 : index
    %c0_67 = arith.constant 0 : index
    %82 = vector.load %arg8[%c2_65, %c0_66, %c0_67] : memref<5x256x128xbf16, #tpu.memory_space<vmem>>, vector<1x256x128xbf16>
    %83 = vector.shape_cast %82 : vector<1x256x128xbf16> to vector<256x128xbf16>
    %cst_68 = arith.constant dense<0.000000e+00> : vector<96x128xf32>
    %84 = tpu.matmul %81, %83, %cst_68 {dimension_numbers = #tpu.dot_dimension_numbers<[1], [0], [0], [1], [0, 0, 1, 1], [], []>} : vector<96x256xbf16>, vector<256x128xbf16>, vector<96x128xf32> -> vector<96x128xf32>
    %85 = arith.addf %78, %84 : vector<96x128xf32>
    %c73_69 = arith.constant 73 : index
    %c0_70 = arith.constant 0 : index
    %86 = vector.load %arg17[%c73_69, %c0_70] : memref<216x128xbf16, #tpu.memory_space<vmem>>, vector<96x128xbf16>
    %c74_71 = arith.constant 74 : index
    %c0_72 = arith.constant 0 : index
    %87 = vector.load %arg17[%c74_71, %c0_72] : memref<216x128xbf16, #tpu.memory_space<vmem>>, vector<96x128xbf16>
    %88 = tpu.concatenate %86, %87 in 1 : vector<96x128xbf16>, vector<96x128xbf16> -> vector<96x256xbf16>
    %c3_73 = arith.constant 3 : index
    %c0_74 = arith.constant 0 : index
    %c0_75 = arith.constant 0 : index
    %89 = vector.load %arg8[%c3_73, %c0_74, %c0_75] : memref<5x256x128xbf16, #tpu.memory_space<vmem>>, vector<1x256x128xbf16>
    %90 = vector.shape_cast %89 : vector<1x256x128xbf16> to vector<256x128xbf16>
    %cst_76 = arith.constant dense<0.000000e+00> : vector<96x128xf32>
    %91 = tpu.matmul %88, %90, %cst_76 {dimension_numbers = #tpu.dot_dimension_numbers<[1], [0], [0], [1], [0, 0, 1, 1], [], []>} : vector<96x256xbf16>, vector<256x128xbf16>, vector<96x128xf32> -> vector<96x128xf32>
    %92 = arith.addf %85, %91 : vector<96x128xf32>
    %c75_77 = arith.constant 75 : index
    %c0_78 = arith.constant 0 : index
    %93 = vector.load %arg17[%c75_77, %c0_78] : memref<216x128xbf16, #tpu.memory_space<vmem>>, vector<96x128xbf16>
    %c25_79 = arith.constant 25 : index
    %c0_80 = arith.constant 0 : index
    %94 = vector.load %arg17[%c25_79, %c0_80] : memref<216x128xbf16, #tpu.memory_space<vmem>>, vector<96x128xbf16>
    %95 = tpu.concatenate %93, %94 in 1 : vector<96x128xbf16>, vector<96x128xbf16> -> vector<96x256xbf16>
    %c4_81 = arith.constant 4 : index
    %c0_82 = arith.constant 0 : index
    %c0_83 = arith.constant 0 : index
    %96 = vector.load %arg8[%c4_81, %c0_82, %c0_83] : memref<5x256x128xbf16, #tpu.memory_space<vmem>>, vector<1x256x128xbf16>
    %97 = vector.shape_cast %96 : vector<1x256x128xbf16> to vector<256x128xbf16>
    %cst_84 = arith.constant dense<0.000000e+00> : vector<96x128xf32>
    %98 = tpu.matmul %95, %97, %cst_84 {dimension_numbers = #tpu.dot_dimension_numbers<[1], [0], [0], [1], [0, 0, 1, 1], [], []>} : vector<96x256xbf16>, vector<256x128xbf16>, vector<96x128xf32> -> vector<96x128xf32>
    %99 = arith.addf %92, %98 : vector<96x128xf32>
    %c0_85 = arith.constant 0 : index
    %c0_86 = arith.constant 0 : index
    %100 = vector.load %arg9[%c0_85, %c0_86] : memref<1x128xf32, #tpu.memory_space<vmem>>, vector<1x128xf32>
    %101 = vector.broadcast %100 : vector<1x128xf32> to vector<96x128xf32>
    %102 = arith.addf %99, %101 : vector<96x128xf32>
    %cst_87 = arith.constant 0.000000e+00 : f32
    %103 = vector.broadcast %cst_87 : f32 to vector<96x128xf32>
    %104 = arith.maximumf %102, %103 : vector<96x128xf32>
    %105 = arith.truncf %104 : vector<96x128xf32> to vector<96x128xbf16>
    %c1_88 = arith.constant 1 : index
    %c0_89 = arith.constant 0 : index
    %c0_90 = arith.constant 0 : index
    %106 = vector.load %arg12[%c1_88, %c0_89, %c0_90] : memref<3x128x128xbf16, #tpu.memory_space<vmem>>, vector<1x128x128xbf16>
    %107 = vector.shape_cast %106 : vector<1x128x128xbf16> to vector<128x128xbf16>
    %cst_91 = arith.constant dense<0.000000e+00> : vector<96x128xf32>
    %108 = tpu.matmul %105, %107, %cst_91 {dimension_numbers = #tpu.dot_dimension_numbers<[1], [0], [0], [1], [0, 0, 1, 1], [], []>} : vector<96x128xbf16>, vector<128x128xbf16>, vector<96x128xf32> -> vector<96x128xf32>
    %109 = arith.addf %65, %108 : vector<96x128xf32>
    %c0_92 = arith.constant 0 : index
    %c0_93 = arith.constant 0 : index
    %110 = vector.load %arg17[%c0_92, %c0_93] : memref<216x128xbf16, #tpu.memory_space<vmem>>, vector<96x128xbf16>
    %c2_94 = arith.constant 2 : index
    %c0_95 = arith.constant 0 : index
    %111 = vector.load %arg17[%c2_94, %c0_95] : memref<216x128xbf16, #tpu.memory_space<vmem>>, vector<96x128xbf16>
    %112 = tpu.concatenate %110, %111 in 1 : vector<96x128xbf16>, vector<96x128xbf16> -> vector<96x256xbf16>
    %c0_96 = arith.constant 0 : index
    %c0_97 = arith.constant 0 : index
    %c0_98 = arith.constant 0 : index
    %113 = vector.load %arg10[%c0_96, %c0_97, %c0_98] : memref<5x256x128xbf16, #tpu.memory_space<vmem>>, vector<1x256x128xbf16>
    %114 = vector.shape_cast %113 : vector<1x256x128xbf16> to vector<256x128xbf16>
    %cst_99 = arith.constant dense<0.000000e+00> : vector<96x128xf32>
    %115 = tpu.matmul %112, %114, %cst_99 {dimension_numbers = #tpu.dot_dimension_numbers<[1], [0], [0], [1], [0, 0, 1, 1], [], []>} : vector<96x256xbf16>, vector<256x128xbf16>, vector<96x128xf32> -> vector<96x128xf32>
    %c4_100 = arith.constant 4 : index
    %c0_101 = arith.constant 0 : index
    %116 = vector.load %arg17[%c4_100, %c0_101] : memref<216x128xbf16, #tpu.memory_space<vmem>>, vector<96x128xbf16>
    %c48 = arith.constant 48 : index
    %c0_102 = arith.constant 0 : index
    %117 = vector.load %arg17[%c48, %c0_102] : memref<216x128xbf16, #tpu.memory_space<vmem>>, vector<96x128xbf16>
    %118 = tpu.concatenate %116, %117 in 1 : vector<96x128xbf16>, vector<96x128xbf16> -> vector<96x256xbf16>
    %c1_103 = arith.constant 1 : index
    %c0_104 = arith.constant 0 : index
    %c0_105 = arith.constant 0 : index
    %119 = vector.load %arg10[%c1_103, %c0_104, %c0_105] : memref<5x256x128xbf16, #tpu.memory_space<vmem>>, vector<1x256x128xbf16>
    %120 = vector.shape_cast %119 : vector<1x256x128xbf16> to vector<256x128xbf16>
    %cst_106 = arith.constant dense<0.000000e+00> : vector<96x128xf32>
    %121 = tpu.matmul %118, %120, %cst_106 {dimension_numbers = #tpu.dot_dimension_numbers<[1], [0], [0], [1], [0, 0, 1, 1], [], []>} : vector<96x256xbf16>, vector<256x128xbf16>, vector<96x128xf32> -> vector<96x128xf32>
    %122 = arith.addf %115, %121 : vector<96x128xf32>
    %c50_107 = arith.constant 50 : index
    %c0_108 = arith.constant 0 : index
    %123 = vector.load %arg17[%c50_107, %c0_108] : memref<216x128xbf16, #tpu.memory_space<vmem>>, vector<96x128xbf16>
    %c52 = arith.constant 52 : index
    %c0_109 = arith.constant 0 : index
    %124 = vector.load %arg17[%c52, %c0_109] : memref<216x128xbf16, #tpu.memory_space<vmem>>, vector<96x128xbf16>
    %125 = tpu.concatenate %123, %124 in 1 : vector<96x128xbf16>, vector<96x128xbf16> -> vector<96x256xbf16>
    %c2_110 = arith.constant 2 : index
    %c0_111 = arith.constant 0 : index
    %c0_112 = arith.constant 0 : index
    %126 = vector.load %arg10[%c2_110, %c0_111, %c0_112] : memref<5x256x128xbf16, #tpu.memory_space<vmem>>, vector<1x256x128xbf16>
    %127 = vector.shape_cast %126 : vector<1x256x128xbf16> to vector<256x128xbf16>
    %cst_113 = arith.constant dense<0.000000e+00> : vector<96x128xf32>
    %128 = tpu.matmul %125, %127, %cst_113 {dimension_numbers = #tpu.dot_dimension_numbers<[1], [0], [0], [1], [0, 0, 1, 1], [], []>} : vector<96x256xbf16>, vector<256x128xbf16>, vector<96x128xf32> -> vector<96x128xf32>
    %129 = arith.addf %122, %128 : vector<96x128xf32>
    %c96 = arith.constant 96 : index
    %c0_114 = arith.constant 0 : index
    %130 = vector.load %arg17[%c96, %c0_114] : memref<216x128xbf16, #tpu.memory_space<vmem>>, vector<96x128xbf16>
    %c98 = arith.constant 98 : index
    %c0_115 = arith.constant 0 : index
    %131 = vector.load %arg17[%c98, %c0_115] : memref<216x128xbf16, #tpu.memory_space<vmem>>, vector<96x128xbf16>
    %132 = tpu.concatenate %130, %131 in 1 : vector<96x128xbf16>, vector<96x128xbf16> -> vector<96x256xbf16>
    %c3_116 = arith.constant 3 : index
    %c0_117 = arith.constant 0 : index
    %c0_118 = arith.constant 0 : index
    %133 = vector.load %arg10[%c3_116, %c0_117, %c0_118] : memref<5x256x128xbf16, #tpu.memory_space<vmem>>, vector<1x256x128xbf16>
    %134 = vector.shape_cast %133 : vector<1x256x128xbf16> to vector<256x128xbf16>
    %cst_119 = arith.constant dense<0.000000e+00> : vector<96x128xf32>
    %135 = tpu.matmul %132, %134, %cst_119 {dimension_numbers = #tpu.dot_dimension_numbers<[1], [0], [0], [1], [0, 0, 1, 1], [], []>} : vector<96x256xbf16>, vector<256x128xbf16>, vector<96x128xf32> -> vector<96x128xf32>
    %136 = arith.addf %129, %135 : vector<96x128xf32>
    %c100 = arith.constant 100 : index
    %c0_120 = arith.constant 0 : index
    %137 = vector.load %arg17[%c100, %c0_120] : memref<216x128xbf16, #tpu.memory_space<vmem>>, vector<96x128xbf16>
    %c0_121 = arith.constant 0 : index
    %c0_122 = arith.constant 0 : index
    %138 = vector.load %arg17[%c0_121, %c0_122] : memref<216x128xbf16, #tpu.memory_space<vmem>>, vector<96x128xbf16>
    %139 = tpu.concatenate %137, %138 in 1 : vector<96x128xbf16>, vector<96x128xbf16> -> vector<96x256xbf16>
    %c4_123 = arith.constant 4 : index
    %c0_124 = arith.constant 0 : index
    %c0_125 = arith.constant 0 : index
    %140 = vector.load %arg10[%c4_123, %c0_124, %c0_125] : memref<5x256x128xbf16, #tpu.memory_space<vmem>>, vector<1x256x128xbf16>
    %141 = vector.shape_cast %140 : vector<1x256x128xbf16> to vector<256x128xbf16>
    %cst_126 = arith.constant dense<0.000000e+00> : vector<96x128xf32>
    %142 = tpu.matmul %139, %141, %cst_126 {dimension_numbers = #tpu.dot_dimension_numbers<[1], [0], [0], [1], [0, 0, 1, 1], [], []>} : vector<96x256xbf16>, vector<256x128xbf16>, vector<96x128xf32> -> vector<96x128xf32>
    %143 = arith.addf %136, %142 : vector<96x128xf32>
    %c0_127 = arith.constant 0 : index
    %c0_128 = arith.constant 0 : index
    %144 = vector.load %arg11[%c0_127, %c0_128] : memref<1x128xf32, #tpu.memory_space<vmem>>, vector<1x128xf32>
    %145 = vector.broadcast %144 : vector<1x128xf32> to vector<96x128xf32>
    %146 = arith.addf %143, %145 : vector<96x128xf32>
    %cst_129 = arith.constant 0.000000e+00 : f32
    %147 = vector.broadcast %cst_129 : f32 to vector<96x128xf32>
    %148 = arith.maximumf %146, %147 : vector<96x128xf32>
    %149 = arith.truncf %148 : vector<96x128xf32> to vector<96x128xbf16>
    %c2_130 = arith.constant 2 : index
    %c0_131 = arith.constant 0 : index
    %c0_132 = arith.constant 0 : index
    %150 = vector.load %arg12[%c2_130, %c0_131, %c0_132] : memref<3x128x128xbf16, #tpu.memory_space<vmem>>, vector<1x128x128xbf16>
    %151 = vector.shape_cast %150 : vector<1x128x128xbf16> to vector<128x128xbf16>
    %cst_133 = arith.constant dense<0.000000e+00> : vector<96x128xf32>
    %152 = tpu.matmul %149, %151, %cst_133 {dimension_numbers = #tpu.dot_dimension_numbers<[1], [0], [0], [1], [0, 0, 1, 1], [], []>} : vector<96x128xbf16>, vector<128x128xbf16>, vector<96x128xf32> -> vector<96x128xf32>
    %153 = arith.addf %109, %152 : vector<96x128xf32>
    %c0_134 = arith.constant 0 : index
    %c0_135 = arith.constant 0 : index
    %154 = vector.load %arg13[%c0_134, %c0_135] : memref<1x128xf32, #tpu.memory_space<vmem>>, vector<1x128xf32>
    %155 = vector.broadcast %154 : vector<1x128xf32> to vector<96x128xf32>
    %156 = arith.addf %153, %155 : vector<96x128xf32>
    %cst_136 = arith.constant 0.000000e+00 : f32
    %157 = vector.broadcast %cst_136 : f32 to vector<96x128xf32>
    %158 = arith.subf %157, %156 : vector<96x128xf32>
    %159 = math.exp %158 : vector<96x128xf32>
    %cst_137 = arith.constant 1.000000e+00 : f32
    %160 = vector.broadcast %cst_137 : f32 to vector<96x128xf32>
    %161 = arith.addf %160, %159 : vector<96x128xf32>
    %162 = tpu.reciprocal %161 {approx = true} : vector<96x128xf32> -> vector<96x128xf32>
    %163 = arith.mulf %54, %162 : vector<96x128xf32>
    %164 = arith.addf %54, %163 : vector<96x128xf32>
    %165 = arith.addf %164, %49 : vector<96x128xf32>
    %c0_138 = arith.constant 0 : index
    %c0_139 = arith.constant 0 : index
    %166 = vector.load %arg14[%c0_138, %c0_139] : memref<1x128xf32, #tpu.memory_space<vmem>>, vector<1x128xf32>
    %167 = vector.broadcast %166 : vector<1x128xf32> to vector<96x128xf32>
    %168 = arith.mulf %165, %167 : vector<96x128xf32>
    %cst_140 = arith.constant dense<0.000000e+00> : vector<96xf32>
    %169 = vector.multi_reduction <add>, %168, %cst_140 [1] : vector<96x128xf32> to vector<96xf32>
    %170 = vector.shape_cast %169 : vector<96xf32> to vector<96x1xf32>
    %c0_141 = arith.constant 0 : index
    %c0_142 = arith.constant 0 : index
    %171 = vector.load %arg15[%c0_141, %c0_142] : memref<1x1xf32, #tpu.memory_space<vmem>>, vector<1x1xf32>
    %172 = vector.broadcast %171 : vector<1x1xf32> to vector<96x1xf32>
    %173 = arith.addf %170, %172 : vector<96x1xf32>
    %cst_143 = arith.constant 0.000000e+00 : f32
    %174 = vector.broadcast %cst_143 : f32 to vector<96x1xf32>
    %175 = arith.subf %174, %173 : vector<96x1xf32>
    %176 = math.exp %175 : vector<96x1xf32>
    %cst_144 = arith.constant 1.000000e+00 : f32
    %177 = vector.broadcast %cst_144 : f32 to vector<96x1xf32>
    %178 = arith.addf %177, %176 : vector<96x1xf32>
    %179 = tpu.reciprocal %178 : vector<96x1xf32> -> vector<96x1xf32>
    %180 = vector.broadcast %179 : vector<96x1xf32> to vector<96x128xf32>
    %181 = arith.mulf %49, %180 : vector<96x128xf32>
    %182 = arith.addf %181, %164 : vector<96x128xf32>
    %183 = arith.truncf %182 : vector<96x128xf32> to vector<96x128xbf16>
    %c0_145 = arith.constant 0 : index
    %c0_146 = arith.constant 0 : index
    %c0_147 = arith.constant 0 : index
    %184 = vector.load %arg16[%c0_145, %c0_146, %c0_147] : memref<1x96x128xbf16, #tpu.memory_space<vmem>>, vector<1x96x128xbf16>
    %185 = vector.shape_cast %184 : vector<1x96x128xbf16> to vector<96x128xbf16>
    %186 = vector.shape_cast %183 : vector<96x128xbf16> to vector<1x96x128xbf16>
    tpu.vector_store %arg16[%c0_145, %c0_146, %c0_147], %186 {strides = array<i32>} : memref<1x96x128xbf16, #tpu.memory_space<vmem>>, vector<1x96x128xbf16>,
    return
  }
  func.func @transform_2(%arg0: i32, %arg1: i32) -> (i32, i32, i32) {
    %c0_i32 = arith.constant 0 : i32
    %c0_i32_0 = arith.constant 0 : i32
    %c0_i32_1 = arith.constant 0 : i32
    %c0_i32_2 = arith.constant 0 : i32
    return %c0_i32, %c0_i32_0, %c0_i32_1 : i32, i32, i32
  }
  func.func @transform_3(%arg0: i32, %arg1: i32) -> (i32, i32) {
    %c0_i32 = arith.constant 0 : i32
    %c0_i32_0 = arith.constant 0 : i32
    %c0_i32_1 = arith.constant 0 : i32
    return %c0_i32, %c0_i32_0 : i32, i32
  }
  func.func @transform_4(%arg0: i32, %arg1: i32) -> (i32, i32) {
    %c0_i32 = arith.constant 0 : i32
    %c0_i32_0 = arith.constant 0 : i32
    %c0_i32_1 = arith.constant 0 : i32
    return %c0_i32, %c0_i32_0 : i32, i32
  }
  func.func @transform_5(%arg0: i32, %arg1: i32) -> (i32, i32) {
    %c0_i32 = arith.constant 0 : i32
    %c0_i32_0 = arith.constant 0 : i32
    %c0_i32_1 = arith.constant 0 : i32
    return %c0_i32, %c0_i32_0 : i32, i32
  }
  func.func @transform_6(%arg0: i32, %arg1: i32) -> (i32, i32, i32) {
    %c0_i32 = arith.constant 0 : i32
    %c0_i32_0 = arith.constant 0 : i32
    %c0_i32_1 = arith.constant 0 : i32
    %c0_i32_2 = arith.constant 0 : i32
    return %c0_i32, %c0_i32_0, %c0_i32_1 : i32, i32, i32
  }
  func.func @transform_7(%arg0: i32, %arg1: i32) -> (i32, i32) {
    %c0_i32 = arith.constant 0 : i32
    %c0_i32_0 = arith.constant 0 : i32
    %c0_i32_1 = arith.constant 0 : i32
    return %c0_i32, %c0_i32_0 : i32, i32
  }
  func.func @transform_8(%arg0: i32, %arg1: i32) -> (i32, i32, i32) {
    %c0_i32 = arith.constant 0 : i32
    %c0_i32_0 = arith.constant 0 : i32
    %c0_i32_1 = arith.constant 0 : i32
    %c0_i32_2 = arith.constant 0 : i32
    return %c0_i32, %c0_i32_0, %c0_i32_1 : i32, i32, i32
  }
  func.func @transform_9(%arg0: i32, %arg1: i32) -> (i32, i32) {
    %c0_i32 = arith.constant 0 : i32
    %c0_i32_0 = arith.constant 0 : i32
    %c0_i32_1 = arith.constant 0 : i32
    return %c0_i32, %c0_i32_0 : i32, i32
  }
  func.func @transform_10(%arg0: i32, %arg1: i32) -> (i32, i32, i32) {
    %c0_i32 = arith.constant 0 : i32
    %c0_i32_0 = arith.constant 0 : i32
    %c0_i32_1 = arith.constant 0 : i32
    %c0_i32_2 = arith.constant 0 : i32
    return %c0_i32, %c0_i32_0, %c0_i32_1 : i32, i32, i32
  }
  func.func @transform_11(%arg0: i32, %arg1: i32) -> (i32, i32) {
    %c0_i32 = arith.constant 0 : i32
    %c0_i32_0 = arith.constant 0 : i32
    %c0_i32_1 = arith.constant 0 : i32
    return %c0_i32, %c0_i32_0 : i32, i32
  }
  func.func @transform_12(%arg0: i32, %arg1: i32) -> (i32, i32) {
    %c0_i32 = arith.constant 0 : i32
    %c0_i32_0 = arith.constant 0 : i32
    %c0_i32_1 = arith.constant 0 : i32
    return %c0_i32, %c0_i32_0 : i32, i32
  }
  func.func @transform_13(%arg0: i32, %arg1: i32) -> (i32, i32) {
    %c0_i32 = arith.constant 0 : i32
    %c0_i32_0 = arith.constant 0 : i32
    %c0_i32_1 = arith.constant 0 : i32
    return %c0_i32, %c0_i32_0 : i32, i32
  }
  func.func @transform_14(%arg0: i32, %arg1: i32) -> (i32, i32, i32) {
    %c0_i32 = arith.constant 0 : i32
    %c0_i32_0 = arith.constant 0 : i32
    return %arg0, %arg1, %c0_i32 : i32, i32, i32
  }
}

</mosaic_0001>

<bundles_post_ra>
// kernel: tpu_custom_call.1
= control target key start
LH: loop header
LB: loop body
LE: loop exit
PB: predicated region body
PF: predicated region fallthrough
CT: control target
= control target key end

     0   :  { %s11410_s0 = inlined_call_operand.hbm [shape: bf16[1008,128], index: 0, kind: input, shape index: {}]   ;;  %s11411_s1 = inlined_call_operand.hbm [shape: bf16[1008,128], index: 1, kind: input, shape index: {}]   ;;  %s11412_s2 = inlined_call_operand.hbm [shape: bf16[5,256,128], index: 2, kind: input, shape index: {}]   ;;  %s11413_s3 = inlined_call_operand.vmem [shape: f32[1,128], index: 3, kind: input, shape index: {}]   ;;  %s11414_s4 = inlined_call_operand.hbm [shape: bf16[128,128], index: 4, kind: input, shape index: {}]   ;;  %s11415_s5 = inlined_call_operand.vmem [shape: f32[1,128], index: 5, kind: input, shape index: {}]   ;;  %s11416_s6 = inlined_call_operand.hbm [shape: bf16[5,256,128], index: 6, kind: input, shape index: {}]   ;;  %s11417_s7 = inlined_call_operand.vmem [shape: f32[1,128], index: 7, kind: input, shape index: {}]   ;;  %s11418_s8 = inlined_call_operand.hbm [shape: bf16[5,256,128], index: 8, kind: input, shape index: {}]   ;;  %s11419_s9 = inlined_call_operand.vmem [shape: f32[1,128], index: 9, kind: input, shape index: {}]   ;;  %s11420_s10 = inlined_call_operand.hbm [shape: bf16[3,128,128], index: 10, kind: input, shape index: {}]   ;;  %s11421_s11 = inlined_call_operand.vmem [shape: f32[1,128], index: 11, kind: input, shape index: {}]   ;;  %s11422_s12 = inlined_call_operand.vmem [shape: f32[1,128], index: 12, kind: input, shape index: {}]   ;;  %s11423_s13 = inlined_call_operand.<no memory space> [shape: f32[1,1], index: 13, kind: input, shape index: {}]   ;;  %s11424_s14 = inlined_call_operand.hbm [shape: bf16[2,384,128], index: 14, kind: output, shape index: {}]  }
   0x1   :  { %11459 = sst [smem:[#allocation93_spill]] %s11412_s2  ;;  %v19_v0 = vstv %s11423_s13 }
   0x2   :  { %11460 = sst [smem:[#allocation94_spill]] %s11414_s4  ;;  %20 = vst [vmem:[#allocation5] sm:$0x1] %v19_v0 }
   0x3   :  { %11461 = sst [smem:[#allocation95_spill]] %s11416_s6 }
   0x4   :  { %11462 = sst [smem:[#allocation96_spill]] %s11418_s8 }
   0x5   :  { %11463 = sst [smem:[#allocation97_spill]] %s11424_s14 }
   0x6   :  { %21 = vsyncpa [#allocation7], 0 }
   0x7   :  { %22 = vsyncpa [#allocation10], 0 }
   0x8   :  { %23 = vsyncpa [#allocation13], 0 }
   0x9   :  { %24 = vsyncpa [#allocation8], 0 }
   0xa   :  { %26 = vsyncpa [#allocation8 + $0x1], 0  ;;  %s9358_s15 = smov 0   ;;  %s9360_s16 = smov 0  }
   0xb   :  { %s9362_s17 = smov 0   ;;  %s9364_s18 = smov 0  }
   0xc   :  { %s9366_s19 = smov 0   ;;  %s9368_s20 = smov 0  }
   0xd   :  { %s9370_s21 = smov 0   ;;  %s9372_s13 = smov 0  }
   0xe LB: > { %11464 = sst [smem:[#allocation28_spill]] %s9237_s15  ;;  %s6992_s22 = sadd.s32 4294967295, %s9265_s13   ;;  %s9265_s13 = sphi %s9372_s13, %s32_s13   ;;  %s9261_s21 = sphi %s9370_s21, %s11688_s21   ;;  %s9257_s20 = sphi %s9368_s20, %s11687_s20   ;;  %s9253_s19 = sphi %s9366_s19, %s11686_s19   ;;  %s9249_s18 = sphi %s9364_s18, %s11685_s18   ;;  %s9245_s17 = sphi %s9362_s17, %s11684_s17   ;;  %s9241_s16 = sphi %s9360_s16, %s11690_s16   ;;  %s9237_s15 = sphi %s9358_s15, %s11689_s15  }
   0xf   : > { %11465 = sst [smem:[#allocation29_spill]] %s9245_s17  ;;  %s6993_s23 = sadd.s32 4294967294, %s9265_s13  }
  0x10   : > { %11466 = sst [smem:[#allocation30_spill]] %s9257_s20  ;;  %s41_s24 = sadd.s32 1, %s9257_s20 }
  0x11   : > { %11467 = sst [smem:[#allocation31_spill]] %s9261_s21  ;;  %s44_s25 = sadd.s32 1, %s9261_s21 }
  0x12   : > { %11468 = sst [smem:[#allocation32_spill]] %s9265_s13  ;;  %p42_p0 = scmp.ge.s32.totalorder %s41_s24, 4 }
  0x13   : > { %s305_s26 = sadd.s32 1, %s9245_s17  ;;  %p315_p1 = scmp.ne.s32.totalorder %s9245_s17, %s9241_s16 }
  0x14   : > { %p316_p2 = scmp.eq.s32.totalorder %s6992_s22, 7  ;;  %s11692_s24 = smov (%p42_p0, %s41_s24), 0 }
  0x15   : > { %11469 = sst [smem:[#allocation33_spill]] %s11692_s24  ;;  %s11694_s25 = smov (!%p42_p0, %s44_s25), %s9261_s21 }
  0x16   : > { %s301_s27 = ssub.s32 %s9257_s20, %s11692_s24  ;;  %p9410_p3 = por %p316_p2, %p315_p1 }
  0x17   : > { %p46_p4 = scmp.ge.s32.totalorder %s11694_s25, 2  ;;  %p321_p5 = scmp.ne.s32.totalorder %s9241_s16, %s9237_s15 }
  0x18   : > { %p322_p6 = scmp.eq.s32.totalorder %s6993_s23, 7  ;;  %p6994_p7 = scmp.ge.s32.totalorder %s9265_s13, 1 }
  0x19   : > { %s11696_s25 = smov (%p46_p4, %s11694_s25), 0  ;;  %p329_p9 = scmp.lt.s32.totalorder %s9265_s13, 9 }
  0x1a   : > { %11471 = sst [smem:[#allocation34_spill]] %s11696_s25  ;;  %p9419_p8 = por %p322_p6, %p321_p5 }
  0x1b   : > { %s300_s30 = ssub.s32 %s9261_s21, %s11696_s25  ;;  %p9426_p10 = pnand %p6994_p7, %p329_p9 }
  0x1c   : > { %s11472_s29 = scalar_select %p9419_p8, 1, 0 }
  0x1d   : > { %s302_s14 = sor.u32 %s301_s27, %s300_s30  ;;  %p9430_p12 = scmp.eq.s32.totalorder %s6992_s22, 0 }
  0x1e   : > { %11473 = sst [smem:[#allocation35_spill]] %s11472_s29  ;;  %p303_p11 = scmp.eq.s32.totalorder %s302_s14, 0 }
  0x1f   : > { %p8401_p13 = pneg %p9426_p10  ;;  %s9267_s27 = smov [#allocation9]  }
  0x20   : > { %s9437_s23 = scalar_select %p303_p11, %s9245_s17, %s305_s26  }
  0x21   : > { %p9441_p0 = pnand %p9430_p12, %p8401_p13  ;;  %s357_s30 = sshll.u32 %s9267_s27, 4  ;;  %s358_s30 = int_to_ptr.vmem [resolvable:$true] %s357_s30 }
  0x22   : > { %11476 = sst [smem:[#allocation36_spill]] %s9437_s23  ;;  %s9268_s25 = smov [#allocation12]  }
  0x23   : > { %s389_s14 = sshll.u32 %s9268_s25, 4  ;;  %p9447_p1 = pneg %p9441_p0  ;;  %s390_s14 = int_to_ptr.vmem [resolvable:$true] %s389_s14 }
  0x24   : > { %s8994_s21 = scalar_lea.vmem %s358_s30, 1024  ;;  %p9002_p6 = scmp.lt.s32.totalorder %s358_s30, %s358_s30 }
  0x25   : > { %p8995_p2 = scmp.ne.s32.totalorder %s358_s30, %s8994_s21  ;;  %p9003_p7 = scmp.lt.s32.totalorder %s8994_s21, %s8994_s21 }
  0x27   : > { %p8997_p4 = pnand %p8995_p2, %p9447_p1  ;;  %p9004_p9 = por %p9003_p7, %p9002_p6 }
  0x29   : > { %p8998_p5 = pneg %p8997_p4 }
  0x2b   : > { %p9005_p11 = pnand %p9004_p9, %p8998_p5 }
  0x2d   : > { %9008 = shalt.err (!%p9005_p11)
}
  0x2e   : > { %s9269_s26 = smov 64   ;;  %s9270_s25 = smov 4  }
  0x2f   : > { %s11479_s4 = sld [smem:[#allocation94_spill]]  ;;  %s9020_s17 = scalar_lea.vmem %s390_s14, 10240 }
  0x30   : > { %p9021_p13 = scmp.ne.s32.totalorder %s390_s14, %s9020_s17  ;;  %p9028_p5 = scmp.lt.s32.totalorder %s390_s14, %s390_s14 }
  0x31   : > { %p9029_p6 = scmp.lt.s32.totalorder %s9020_s17, %s9020_s17 }
  0x32   : > { %p9023_p2 = pnand %p9021_p13, %p9447_p1 }
  0x33   : > { %p9030_p7 = por %p9029_p6, %p9028_p5 }
  0x34   : > { %p9024_p4 = pneg %p9023_p2 }
  0x35   : > { %8407 = dma.hbm_to_vmem [thread:$0]  (!%p9441_p0), %s11479_s4, 1024, %s358_s30, [#allocation10], %s9269_s26, %s9269_s26, %s9270_s25  }
  0x36   : > { %p9031_p9 = pnand %p9030_p7, %p9024_p4 }
  0x38   : > { %9034 = shalt.err (!%p9031_p9)
}
  0x39   : > { %s11480_s8 = sld [smem:[#allocation96_spill]]  ;;  %s9271_s23 = smov [#allocation6]  }
  0x3a   : > { %s341_s30 = sshll.u32 %s9271_s23, 4  ;;  %s9272_s27 = smov [#allocation11]   ;;  %s342_s30 = int_to_ptr.vmem [resolvable:$true] %s341_s30 }
  0x3b   : > { %s373_s4 = sshll.u32 %s9272_s27, 4  ;;  %s9046_s13 = scalar_lea.vmem %s342_s30, 10240  ;;  %s374_s4 = int_to_ptr.vmem [resolvable:$true] %s373_s4 }
  0x3c   : > { %p9047_p11 = scmp.ne.s32.totalorder %s342_s30, %s9046_s13  ;;  %p9054_p4 = scmp.lt.s32.totalorder %s342_s30, %s342_s30 }
  0x3d   : > { %p9055_p5 = scmp.lt.s32.totalorder %s9046_s13, %s9046_s13 }
  0x3e   : > { %p9049_p13 = pnand %p9047_p11, %p9447_p1 }
  0x3f   : > { %8413 = dma.hbm_to_vmem [thread:$0]  (!%p9441_p0), %s11480_s8, 10240, %s390_s14, [#allocation13], %s9269_s26, %s9269_s26, %s9270_s25  }
  0x40   : > { %p9050_p2 = pneg %p9049_p13  ;;  %p9056_p6 = por %p9055_p5, %p9054_p4 }
  0x42   : > { %p9057_p7 = pnand %p9056_p6, %p9050_p2 }
  0x44   : > { %9060 = shalt.err (!%p9057_p7)
}
  0x45   : > { %s11481_s2 = sld [smem:[#allocation93_spill]]  ;;  %s9072_s14 = scalar_lea.vmem %s374_s4, 10240 }
  0x46   : > { %p9073_p9 = scmp.ne.s32.totalorder %s374_s4, %s9072_s14  ;;  %p9080_p8 = scmp.lt.s32.totalorder %s374_s4, %s374_s4 }
  0x47   : > { %p9081_p4 = scmp.lt.s32.totalorder %s9072_s14, %s9072_s14 }
  0x48   : > { %p9075_p11 = pnand %p9073_p9, %p9447_p1 }
  0x49   : > { %p9082_p2 = por %p9081_p4, %p9080_p8 }
  0x4a   : > { %p9076_p13 = pneg %p9075_p11 }
  0x4b   : > { %8404 = dma.hbm_to_vmem [thread:$0]  (!%p9441_p0), %s11481_s2, 10240, %s342_s30, [#allocation7], %s9269_s26, %s9269_s26, %s9270_s25  }
  0x4c   : > { %p9083_p5 = pnand %p9082_p2, %p9076_p13 }
  0x4e   : > { %9086 = shalt.err (!%p9083_p5)
}
  0x4f   : > { %s11482_s6 = sld [smem:[#allocation95_spill]]  ;;  %s9273_s23 = smov [#allocation14]  }
  0x50   : > { %s405_s30 = sshll.u32 %s9273_s23, 4  ;;  %s406_s30 = int_to_ptr.vmem [resolvable:$true] %s405_s30 }
  0x51   : > { %s9098_s27 = scalar_lea.vmem %s406_s30, 3072  ;;  %p9106_p9 = scmp.lt.s32.totalorder %s406_s30, %s406_s30 }
  0x52   : > { %p9099_p6 = scmp.ne.s32.totalorder %s406_s30, %s9098_s27  ;;  %p9107_p11 = scmp.lt.s32.totalorder %s9098_s27, %s9098_s27 }
  0x54   : > { %p9101_p7 = pnand %p9099_p6, %p9447_p1  ;;  %p9108_p13 = por %p9107_p11, %p9106_p9 }
  0x55   : > { %8410 = dma.hbm_to_vmem [thread:$0]  (!%p9441_p0), %s11482_s6, 10240, %s374_s4, [#allocation10], %s9269_s26, %s9269_s26, %s9270_s25  }
  0x56   : > { %p9102_p8 = pneg %p9101_p7 }
  0x58   : > { %p9109_p4 = pnand %p9108_p13, %p9102_p8 }
  0x5a   : > { %9112 = shalt.err (!%p9109_p4)
}
  0x5b   : > { %8416 = dma.hbm_to_vmem [thread:$0]  (!%p9441_p0), %s11420_s10, 3072, %s406_s30, [#allocation13], %s9269_s26, %s9269_s26, %s9270_s25  }
  0x5c   : > { %430 = sbr.rel (%p9426_p10) target bundleno = 1851 (0x73b), region = 68 }
  0x61   : > { %9216 = dma.done.wait (%p9430_p12), [#allocation7], 10240  }
  0x62   : > { %9218 = vsyncadd (%p9430_p12), [#allocation7], 4294957056 }
  0x63   : > { %9220 = dma.done.wait (%p9430_p12), [#allocation10], 11264  }
  0x64   : > { %9222 = vsyncadd (%p9430_p12), [#allocation10], 4294956032 }
  0x65   : > { %9224 = dma.done.wait (%p9430_p12), [#allocation13], 13312  }
  0x66   : > { %9226 = vsyncadd (%p9430_p12), [#allocation13], 4294953984  ;;  %s11435_s24 = sand.u32 1, %s9241_s16   ;;  %s485_s29 = smul.u32 504, %s9253_s19 }
  0x67   : > { %s9519_s22 = smul.u32 48, %s11435_s24  ;;  %s9274_s25 = smov [#allocation2]  }
  0x68   : > { %s486_s26 = smul.u32 96, %s9249_s18  ;;  %s499_s17 = sshll.u32 %s9274_s25, 4  ;;  %s500_s17 = int_to_ptr.vmem [resolvable:$true] %s499_s17 }
  0x69   : > { %s9275_s21 = smov [#allocation3]  }
  0x6a   : > { %s487_s14 = sadd.s32 %s486_s26, %s485_s29  ;;  %s513_s23 = sshll.u32 %s9275_s21, 4  ;;  %s9522_s23 = int_to_ptr.vmem [resolvable:$true] %s513_s23 }
  0x6b   : > { %s488_s13 = sshra.s32 %s487_s14, 3  ;;  %s9115_s29 = scalar_lea.hbm %s11410_s0, 8064 }
  0x6c   : > { %s7006_s30 = sshll.u32 %s488_s13, 6 }
  0x6d   : > { %s491_s15 = scalar_lea.hbm %s11410_s0, %s7006_s30  ;;  %s9530_s24 = scalar_lea.hbm %s11411_s1, %s7006_s30 }
  0x6e   : > { %s9113_s6 = scalar_lea.hbm %s491_s15, 1728  ;;  %p9116_p12 = scmp.lt.s32.totalorder %s491_s15, %s11410_s0 }
  0x6f   : > { %p9114_p10 = scmp.ne.s32.totalorder %s491_s15, %s9113_s6  ;;  %p9117_p0 = scmp.lt.s32.totalorder %s9115_s29, %s9113_s6 }
  0x71   : > { %p9118_p1 = por %p9117_p0, %p9116_p12 }
  0x73   : > { %p9119_p2 = pnand %p9118_p1, %p9114_p10 }
  0x75   : > { %9122 = shalt.err (!%p9119_p2)  }
  0x76   : > { %s9123_s13 = scalar_lea.vmem %s500_s17, 1728  ;;  %p9128_p6 = scmp.lt.s32.totalorder %s500_s17, %s500_s17 }
  0x77   : > { %p9124_p5 = scmp.ne.s32.totalorder %s500_s17, %s9123_s13  ;;  %p9129_p7 = scmp.lt.s32.totalorder %s9123_s13, %s9123_s13 }
  0x79   : > { %p9130_p8 = por %p9129_p7, %p9128_p6 }
  0x7b   : > { %p9131_p9 = pnand %p9130_p8, %p9124_p5 }
  0x7d   : > { %9134 = shalt.err (!%p9131_p9)  }
  0x7e   : > { %502 = dma.hbm_to_vmem [thread:$0]  %s491_s15, 1728, %s500_s17, [#allocation4] }
  0x7f   : > { %s9135_s2 = scalar_lea.hbm %s9530_s24, 1728  ;;  %s9137_s6 = scalar_lea.hbm %s11411_s1, 8064 }
  0x80   : > { %p9136_p11 = scmp.ne.s32.totalorder %s9530_s24, %s9135_s2  ;;  %p9138_p13 = scmp.lt.s32.totalorder %s9530_s24, %s11411_s1 }
  0x81   : > { %p9139_p4 = scmp.lt.s32.totalorder %s9137_s6, %s9135_s2 }
  0x83   : > { %p9140_p10 = por %p9139_p4, %p9138_p13 }
  0x85   : > { %p9141_p12 = pnand %p9140_p10, %p9136_p11 }
  0x87   : > { %9144 = shalt.err (!%p9141_p12)  }
  0x88   : > { %s9145_s17 = scalar_lea.vmem %s9522_s23, 1728  ;;  %p9150_p1 = scmp.lt.s32.totalorder %s9522_s23, %s9522_s23 }
  0x89   : > { %p9146_p0 = scmp.ne.s32.totalorder %s9522_s23, %s9145_s17  ;;  %p9151_p2 = scmp.lt.s32.totalorder %s9145_s17, %s9145_s17 }
  0x8b   : > { %p9152_p5 = por %p9151_p2, %p9150_p1 }
  0x8d   : > { %p9153_p6 = pnand %p9152_p5, %p9146_p0 }
  0x8f   : > { %9156 = shalt.err (!%p9153_p6)  }
  0x90   : > { %516 = dma.hbm_to_vmem [thread:$0]  %s9530_s24, 1728, %s9522_s23, [#allocation4 + $0x1] }
  0x91   : > { %s9554_s27 = scalar_lea.vmem [#allocation15], %s9519_s22 }
  0x92   : > { %9227 = dma.done.wait [#allocation4 + $0x1], 1728 }
  0x93   : > { %9228 = vsyncadd [#allocation4 + $0x1], 4294965568  ;;  %v8508_v1 = vld [vmem:[#allocation6 + $0xf8] sm:$0xff]   ;;  %v8512_v5 = vld [vmem:[#allocation6 + $0xf0] sm:$0xff]   ;;  %vm681_vm0 = vcmask 1040384   ;;  %vm1357_vm3 = vcmask 1046528  }
  0x94   : > { %v8509_v2 = vld [vmem:[#allocation6 + $0x78] sm:$0xff]   ;;  %7429 = vmatprep.subr.bf16.mxu0 %v8508_v1  ;;  %v8513_v6 = vld [vmem:[#allocation6 + $0x70] sm:$0xff]   ;;  %v8516_v9 = vld [vmem:[#allocation6 + $0xe8] sm:$0xff]   ;;  %vm571_vm1 = vsmask.f32 7424 }
  0x95   : > { %v8510_v3 = vld [vmem:[#allocation6 + $0xb8] sm:$0xff]   ;;  %7481 = vmatprep.subr.bf16.mxu1 %v8509_v2  ;;  %v8514_v7 = vld [vmem:[#allocation6 + $0xb0] sm:$0xff]   ;;  %v8517_v10 = vld [vmem:[#allocation6 + $0x68] sm:$0xff]   ;;  %vm728_vm2 = vsmask.f32 6400 }
  0x96   : > { %v8511_v4 = vld [vmem:[#allocation6 + $0x38] sm:$0xff]   ;;  %7430 = vmatpush3.bf16.msra.mxu0 %v8510_v3  ;;  %v8515_v8 = vld [vmem:[#allocation6 + $0x30] sm:$0xff]   ;;  %v8518_v11 = vld [vmem:[#allocation6 + $0xa8] sm:$0xff]  }
  0x97   : > { %7482 = vmatpush3.bf16.msra.mxu1 %v8511_v4  ;;  %7431 = vmatprep.subr.bf16.mxu0 %v8512_v5  ;;  %v8519_v12 = vld [vmem:[#allocation6 + $0x28] sm:$0xff]   ;;  %v8520_v13 = vld [vmem:[#allocation6 + $0xe0] sm:$0xff]   ;;  %v8524_v17 = vld [vmem:[#allocation6 + $0xd8] sm:$0xff]  }
  0x98   : > { %7483 = vmatprep.subr.bf16.mxu1 %v8513_v6  ;;  %v8521_v14 = vld [vmem:[#allocation6 + $0x60] sm:$0xff]   ;;  %v8525_v18 = vld [vmem:[#allocation6 + $0x58] sm:$0xff]   ;;  %v8528_v21 = vld [vmem:[#allocation6 + $0xd0] sm:$0xff]  }
  0x99   : > { %v8522_v15 = vld [vmem:[#allocation6 + $0xa0] sm:$0xff]   ;;  %v8526_v19 = vld [vmem:[#allocation6 + $0x98] sm:$0xff]   ;;  %v8529_v22 = vld [vmem:[#allocation6 + $0x50] sm:$0xff]  }
  0x9a   : > { %7432 = vmatpush3.bf16.msra.mxu0 %v8514_v7  ;;  %v8523_v16 = vld [vmem:[#allocation6 + $0x20] sm:$0xff]   ;;  %v8527_v20 = vld [vmem:[#allocation6 + $0x18] sm:$0xff]   ;;  %v8530_v23 = vld [vmem:[#allocation6 + $0x90] sm:$0xff]  }
  0x9b   : > { %7484 = vmatpush3.bf16.msra.mxu1 %v8515_v8  ;;  %7433 = vmatprep.subr.bf16.mxu0 %v8516_v9  ;;  %v8531_v24 = vld [vmem:[#allocation6 + $0x10] sm:$0xff]   ;;  %v8532_v25 = vld [vmem:[#allocation6 + $0xc8] sm:$0xff]   ;;  %v8536_v29 = vld [vmem:[#allocation6 + $0xc0] sm:$0xff]  }
  0x9c   : > { %7485 = vmatprep.subr.bf16.mxu1 %v8517_v10  ;;  %v8533_v26 = vld [vmem:[#allocation6 + $0x48] sm:$0xff]   ;;  %v8537_v30 = vld [vmem:[#allocation6 + $0x40] sm:$0xff]   ;;  %v526_v36 = vld [vmem:[#allocation3 + $0x20] sm:$0xf] }
  0x9d   : > { %v8534_v27 = vld [vmem:[#allocation6 + $0x88] sm:$0xff]   ;;  %v8538_v31 = vld [vmem:[#allocation6 + $0x80] sm:$0xff]   ;;  %v527_v37 = vld [vmem:[#allocation3 + $0x24] sm:$0xf] }
  0x9e   : > { %7434 = vmatpush3.bf16.msra.mxu0 %v8518_v11  ;;  %v8535_v28 = vld [vmem:[#allocation6 + $0x8] sm:$0xff]   ;;  %v8539_v32 = vld [vmem:[#allocation6] sm:$0xff]   ;;  %v9564_v41 = vcombine.low %v526_v36, %v527_v37  ;;  %v8547_v49 = vld [vmem:[#allocation6 + $0x178] sm:$0xff]  }
  0x9f   : > { %7486 = vmatpush3.bf16.msra.mxu1 %v8519_v12  ;;  %7435 = vmatprep.subr.bf16.mxu0 %v8520_v13  ;;  %v523_v33 = vld [vmem:[#allocation3 + $0x14] sm:$0xf]  ;;  %v524_v34 = vld [vmem:[#allocation3 + $0x18] sm:$0xf]  ;;  %v9556_v35 = vld [vmem:[#allocation3 + $0x1c] sm:$0xf] }
  0xa0   : > { %7487 = vmatprep.subr.bf16.mxu1 %v8521_v14  ;;  %v9558_v38 = vcombine.low %v523_v33, %v524_v34  ;;  %v7017_v39 = vcombine.low %v524_v34, %v9556_v35  ;;  %v9562_v40 = vcombine.low %v9556_v35, %v526_v36  ;;  %v522_v42 = vld [vmem:[#allocation3 + $0x10] sm:$0xf]  ;;  %v534_v43 = vld [vmem:[#allocation3 + $0xc] sm:$0xe]  ;;  %v683_v50 = vrot.slane %v9564_v41, 7  ;;  %v8552_v34 = vld [vmem:[#allocation6 + $0x130] sm:$0xff]  }
  0xa1   : > { %v521_v44 = vld [vmem:[#allocation3 + $0xc] sm:$0xf]  ;;  %v7015_v46 = vcombine.low %v534_v43, %v522_v42  ;;  %v528_v5 = vld [vmem:[#allocation3 + $0x28] sm:$0xf]  ;;  %v9591_v36 = vld [vmem:[#allocation3 + $0x34] sm:$0xf] }
  0xa2   : > { %7436 = vmatpush3.bf16.msra.mxu0 %v8522_v15  ;;  %v682_v45 = vrot.slane %v7017_v39, 7  ;;  %v580_v47 = vshll.u32 %v9558_v38, 16  ;;  %v584_v48 = vshrl.u32 %v9558_v38, 16  ;;  %v588_v51 = vshll.u32 %v9562_v40, 16  ;;  %v529_v10 = vld [vmem:[#allocation3 + $0x2c] sm:$0xf] }
  0xa3   : > { %7488 = vmatpush3.bf16.msra.mxu1 %v8523_v16  ;;  %7437 = vmatprep.subr.bf16.mxu0 %v8524_v17  ;;  %v9570_v52 = vcombine.low %v521_v44, %v522_v42  ;;  %v573_v55 = vshrl.u32 %v7015_v46, 16  ;;  %v575_v56 = vshll.u32 %v7015_v46, 16 }
  0xa4   : > { %7489 = vmatprep.subr.bf16.mxu1 %v8525_v18  ;;  %v737_v53 = vshrl.u32 %v682_v45, 16  ;;  %v740_v54 = vshll.u32 %v682_v45, 16  ;;  %v684_v57 = vsel %vm681_vm0, %v682_v45, %v683_v50  ;;  %v582_v58 = vrot.slane %v580_v47, 1 }
  0xa5   : > { %v590_v59 = vrot.slane %v588_v51, 1  ;;  %v732_v60 = vrot.slane %v584_v48, 1  ;;  %v745_v63 = vshrl.u32 %v684_v57, 16  ;;  %v748_v0 = vshll.u32 %v684_v57, 16 }
  0xa6   : > { %7438 = vmatpush3.bf16.msra.mxu0 %v8526_v19  ;;  %v739_v61 = vrot.slane %v737_v53, 1  ;;  %v742_v62 = vrot.slane %v740_v54, 2  ;;  %v577_v1 = vrot.slane %v575_v56, 1  ;;  %v586_v2 = vor.u32 %v584_v48, %v582_v58  ;;  %v8558_v48 = vld [vmem:[#allocation6 + $0x1f8] sm:$0xff]  }
  0xa7   : > { %7490 = vmatpush3.bf16.msra.mxu1 %v8527_v20  ;;  %7439 = vmatprep.subr.bf16.mxu0 %v8528_v21  ;;  %v729_v3 = vrot.slane %v573_v55, 1  ;;  %v730_v4 = vrot.slane %v575_v56, 2  ;;  %v747_v7 = vrot.slane %v745_v63, 1  ;;  %v750_v8 = vrot.slane %v748_v0, 2  ;;  %v8548_v20 = vld [vmem:[#allocation6 + $0x138] sm:$0xff]   ;;  %v8553_v56 = vld [vmem:[#allocation6 + $0x168] sm:$0xff]  }
  0xa8   : > { %7491 = vmatprep.subr.bf16.mxu1 %v8529_v22  ;;  %v743_v6 = vor.u32 %v742_v62, %v739_v61  ;;  %v733_v9 = vrot.slane %v580_v47, 2  ;;  %v578_v11 = vor.u32 %v577_v1, %v573_v55  ;;  %v9574_v12 = vsel %vm571_vm1, %v586_v2, %v590_v59  ;;  %v8554_v61 = vld [vmem:[#allocation6 + $0x128] sm:$0xff]  }
  0xa9   : > { %v731_v13 = vor.u32 %v730_v4, %v729_v3  ;;  %v1013_v14 = vshrl.u32 %v9570_v52, 16  ;;  %v9577_v15 = vor.u32 %v750_v8, %v747_v7  ;;  %v1028_v16 = vshll.u32 %v9574_v12, 16  ;;  %v532_v7 = vld [vmem:[#allocation3 + $0x38] sm:$0xf] }
  0xaa   : > { %7440 = vmatpush3.bf16.msra.mxu0 %v8530_v23  ;;  %v734_v17 = vor.u32 %v733_v9, %v732_v60  ;;  %v1015_v18 = vshll.u32 %v9570_v52, 16  ;;  %v583_v19 = vsel %vm571_vm1, %v578_v11, %v582_v58  ;;  %v9582_v21 = vcombine.low %v528_v5, %v529_v10 }
  0xab   : > { %7492 = vmatpush3.bf16.msra.mxu1 %v8531_v24  ;;  %7441 = vmatprep.subr.bf16.mxu0 %v8532_v25  ;;  %v9584_v22 = vcombine.low %v527_v37, %v528_v5  ;;  %v592_v23 = vshrl.u32 %v9562_v40, 16  ;;  %v752_v24 = vsel %vm728_vm2, %v743_v6, %v9577_v15  ;;  %v1021_v25 = vshrl.u32 %v583_v19, 16  ;;  %v8557_v5 = vld [vmem:[#allocation6 + $0x160] sm:$0xff]   ;;  %v8561_v6 = vld [vmem:[#allocation6 + $0x1f0] sm:$0xff]  }
  0xac   : > { %7493 = vmatprep.subr.bf16.mxu1 %v8533_v26  ;;  %v1023_v26 = vshll.u32 %v583_v19, 16  ;;  %963 = vmatprep.mubr.bf16.mxu0 %v752_v24  ;;  %v1032_v42 = vshrl.u32 %v9574_v12, 16  ;;  %v754_v46 = vrot.slane %v588_v51, 2 }
  0xad   : > { %v594_v33 = vor.u32 %v592_v23, %v590_v59  ;;  %v596_v39 = vshll.u32 %v9584_v22, 16  ;;  %v753_v43 = vrot.slane %v592_v23, 1 }
  0xae   : > { %7442 = vmatpush3.bf16.msra.mxu0 %v8534_v27  ;;  %v1030_v27 = vrot.slane %v1028_v16, 1  ;;  %v1025_v37 = vrot.slane %v1023_v26, 1  ;;  %v8564_v16 = vld [vmem:[#allocation6 + $0x1b0] sm:$0xff]  }
  0xaf   : > { %7494 = vmatpush3.bf16.msra.mxu1 %v8535_v28  ;;  %7443 = vmatprep.subr.bf16.mxu0 %v8536_v29  ;;  %v8549_v28 = vld [vmem:[#allocation6 + $0x170] sm:$0xff]   ;;  %v530_v29 = vld [vmem:[#allocation3 + $0x30] sm:$0xf]  ;;  %v598_v55 = vrot.slane %v596_v39, 1  ;;  %v9600_v60 = vor.u32 %v754_v46, %v753_v43  ;;  %v8566_v43 = vld [vmem:[#allocation6 + $0x118] sm:$0xff]  }
  0xb0   : > { %7495 = vmatprep.subr.bf16.mxu1 %v8537_v30  ;;  %v735_v30 = vsel %vm728_vm2, %v731_v13, %v734_v17  ;;  %v9597_v47 = vcombine.low %v530_v29, %v9591_v36  ;;  %v1034_v59 = vor.u32 %v1032_v42, %v1030_v27  ;;  %v9613_v4 = vcombine.low %v529_v10, %v530_v29  ;;  %v8559_v29 = vld [vmem:[#allocation6 + $0x120] sm:$0xff]  }
  0xb1   : > { %v9605_v1 = vsel %vm571_vm1, %v594_v33, %v598_v55  ;;  %v600_v13 = vshrl.u32 %v9584_v22, 16  ;;  %v9624_v33 = vcombine.low %v9591_v36, %v532_v7 }
  0xb2   : > { %7444 = vmatpush3.bf16.msra.mxu0 %v8538_v31  ;;  %v1017_v31 = vrot.slane %v1015_v18, 1  ;;  %v687_v62 = vrot.slane %v9597_v47, 7  ;;  %v1036_v2 = vshll.u32 %v9605_v1, 16  ;;  %v1040_v19 = vshrl.u32 %v9605_v1, 16 }
  0xb3   : > { %7496 = vmatpush3.bf16.msra.mxu1 %v8539_v32  ;;  %7533 = vmatprep.subr.bf16.mxu0 %v8547_v49  ;;  %v685_v32 = vrot.slane %v9582_v21, 7  ;;  %v1026_v49 = vor.u32 %v1025_v37, %v1021_v25  ;;  %v602_v25 = vor.u32 %v600_v13, %v598_v55 }
  0xb4   : > { %v1018_v44 = vor.u32 %v1017_v31, %v1013_v14  ;;  %7585 = vmatprep.subr.bf16.mxu1 %v8558_v48  ;;  %v659_v14 = vld [vmem:[#allocation3 + $0x3c] sm:$0xf]  ;;  %v1038_v18 = vrot.slane %v1036_v2, 1  ;;  %v9644_v2 = vld [vmem:[#allocation3 + $0x40] sm:$0xff]  }
  0xb5   : > { %964 = vmatmul.mubr.bf16.vlgmr.msra.gmra.mxu0 %v735_v30  ;;  %v686_v45 = vsel %vm681_vm0, %v683_v50, %v685_v32  ;;  %v8560_v50 = vld [vmem:[#allocation6 + $0x1b8] sm:$0xff]   ;;  %v1031_v51 = vsel %vm571_vm1, %v1026_v49, %v1030_v27  ;;  %v688_v3 = vsel %vm681_vm0, %v685_v32, %v687_v62  ;;  %v9621_v32 = vcombine.low %v532_v7, %v659_v14 }
  0xb6   : > { %7534 = vmatpush3.bf16.msra.mxu0 %v8548_v20  ;;  %v758_v53 = vshrl.u32 %v686_v45, 16  ;;  %v761_v54 = vshll.u32 %v686_v45, 16  ;;  %v1019_v57 = vsel %vm571_vm1, %v1018_v44, %v582_v58  ;;  %1212 = vmatprep.mubr.bf16.mxu1 %v1031_v51  ;;  %v756_v58 = vsel %vm728_vm2, %v734_v17, %v9600_v60  ;;  %v8565_v30 = vld [vmem:[#allocation6 + $0x158] sm:$0xff]   ;;  %v8568_v44 = vld [vmem:[#allocation6 + $0x1a8] sm:$0xff]  }
  0xb7   : > { %7535 = vmatprep.subr.bf16.mxu0 %v8549_v28  ;;  %1213 = vmatmul.mubr.bf16.vlgmr.msra.gmra.mxu1 %v1019_v57  ;;  %v771_v9 = vshrl.u32 %v688_v3, 16  ;;  %v774_v11 = vshll.u32 %v688_v3, 16  ;;  %v604_v17 = vshll.u32 %v9613_v4, 16  ;;  %v767_v20 = vrot.slane %v596_v39, 2 }
  0xb8   : > { %v760_v63 = vrot.slane %v758_v53, 1  ;;  %v763_v0 = vrot.slane %v761_v54, 2  ;;  %7586 = vmatpush3.bf16.msra.mxu1 %v8560_v50  ;;  %v1039_v26 = vsel %vm571_vm1, %v1034_v59, %v1038_v18  ;;  %v766_v28 = vrot.slane %v600_v13, 1 }
  0xb9   : > { %v773_v23 = vrot.slane %v771_v9, 1  ;;  %v776_v24 = vrot.slane %v774_v11, 2  ;;  %7587 = vmatprep.subr.bf16.mxu1 %v8561_v6  ;;  %v606_v27 = vrot.slane %v604_v17, 1  ;;  %1220 = vmatprep.mubr.bf16.mxu1 %v1039_v26  ;;  %v780_v42 = vrot.slane %v604_v17, 2 }
  0xba   : > { %7536 = vmatpush3.bf16.msra.mxu0 %v8552_v34  ;;  %v764_v8 = vor.u32 %v763_v0, %v760_v63  ;;  %v8567_v34 = vld [vmem:[#allocation6 + $0x1e8] sm:$0xff]   ;;  %v9630_v39 = vor.u32 %v767_v20, %v766_v28  ;;  %v1042_v46 = vor.u32 %v1040_v19, %v1038_v18  ;;  %v689_v36 = vrot.slane %v9621_v32, 7  ;;  %v8574_v18 = vld [vmem:[#allocation6 + $0x1a0] sm:$0xff]  }
  0xbb   : > { %7537 = vmatprep.subr.bf16.mxu0 %v8553_v56  ;;  %v777_v31 = vor.u32 %v776_v24, %v773_v23  ;;  %v9628_v37 = vsel %vm571_vm1, %v602_v25, %v606_v27  ;;  %v612_v53 = vshll.u32 %v9624_v33, 16  ;;  %v8569_v56 = vld [vmem:[#allocation6 + $0x150] sm:$0xff]   ;;  %v9650_v6 = vld [vmem:[#allocation3 + $0x3c] ss:$0 sps:$4 sm:$0x11]   ;;  %v616_v9 = vshrl.u32 %v9624_v33, 16 }
  0xbc   : > { %v765_v10 = vsel %vm728_vm2, %v9577_v15, %v764_v8  ;;  %v608_v15 = vshrl.u32 %v9613_v4, 16  ;;  %7588 = vmatpush3.bf16.msra.mxu1 %v8564_v16  ;;  %v1044_v48 = vshll.u32 %v9628_v37, 16  ;;  %v1048_v54 = vshrl.u32 %v9628_v37, 16 }
  0xbd   : > { %971 = vmatprep.mubr.bf16.mxu0 %v765_v10  ;;  %v778_v45 = vsel %vm728_vm2, %v764_v8, %v777_v31  ;;  %7589 = vmatprep.subr.bf16.mxu1 %v8567_v34  ;;  %v690_v59 = vsel %vm681_vm0, %v687_v62, %v689_v36  ;;  %v769_v50 = vsel %vm728_vm2, %v9600_v60, %v9630_v39  ;;  %v614_v0 = vrot.slane %v612_v53, 1  ;;  %v8573_v60 = vld [vmem:[#allocation6 + $0x110] sm:$0xff]  }
  0xbe   : > { %7538 = vmatpush3.bf16.msra.mxu0 %v8554_v61  ;;  %v610_v49 = vor.u32 %v608_v15, %v606_v27  ;;  %v779_v55 = vrot.slane %v608_v15, 1  ;;  %v1046_v57 = vrot.slane %v1044_v48, 1  ;;  %v8570_v61 = vld [vmem:[#allocation6 + $0x1e0] sm:$0xff]   ;;  %v784_v51 = vshrl.u32 %v690_v59, 16  ;;  %v8575_v27 = vld [vmem:[#allocation6 + $0x1d8] sm:$0xff]   ;;  %v8578_v48 = vld [vmem:[#allocation6 + $0x108] sm:$0xff]  }
  0xbf   : > { %972 = vmatmul.mubr.bf16.gmra.mxu0 %v756_v58  ;;  %7539 = vmatprep.subr.bf16.mxu0 %v8557_v5  ;;  %v787_v63 = vshll.u32 %v690_v59, 16  ;;  %v691_v8 = vrot.slane %v9644_v2, 7  ;;  %v620_v16 = vshll.u32 %v9650_v6, 16  ;;  %v618_v20 = vor.u32 %v616_v9, %v614_v0 }
  0xc0   : > { %979 = vmatprep.mubr.bf16.mxu0 %v778_v45  ;;  %1221 = vmatmul.mubr.bf16.gmra.mxu1 %v9574_v12  ;;  %v1047_v58 = vsel %vm571_vm1, %v1042_v46, %v1046_v57  ;;  %v786_v12 = vrot.slane %v784_v51, 1  ;;  %v9648_v62 = vsel %vm571_vm1, %v610_v49, %v614_v0  ;;  %v1050_v5 = vor.u32 %v1048_v54, %v1046_v57  ;;  %v8577_v45 = vld [vmem:[#allocation6 + $0x148] sm:$0xff]   ;;  %v8581_v54 = vld [vmem:[#allocation6 + $0x190] sm:$0xff]   ;;  %v9673_v57 = vld [vmem:[#allocation3 + $0x48] ss:$0 sps:$4 sm:$0x11]  }
  0xc1   : > { %7590 = vmatpush3.bf16.msra.mxu1 %v8568_v44  ;;  %1228 = vmatprep.mubr.bf16.mxu1 %v1047_v58  ;;  %v789_v3 = vrot.slane %v787_v63, 2  ;;  %v1052_v7 = vshll.u32 %v9648_v62, 16  ;;  %v1056_v11 = vshrl.u32 %v9648_v62, 16  ;;  %v781_v14 = vor.u32 %v780_v42, %v779_v55  ;;  %v8582_v63 = vld [vmem:[#allocation3 + $0x3c] ss:$0 sps:$4 sm:$0x33]  }
  0xc2   : > { %7540 = vmatpush3.bf16.msra.mxu0 %v8559_v29  ;;  %7591 = vmatprep.subr.bf16.mxu1 %v8570_v61  ;;  %v692_v19 = vsel %vm681_vm0, %v689_v36, %v691_v8  ;;  %v792_v10 = vrot.slane %v616_v9, 1  ;;  %v622_v26 = vrot.slane %v620_v16, 1  ;;  %v793_v29 = vrot.slane %v612_v53, 2  ;;  %v8583_v0 = vld [vmem:[#allocation6 + $0x140] sm:$0xff]  }
  0xc3   : > { %7541 = vmatprep.subr.bf16.mxu0 %v8565_v30  ;;  %v790_v13 = vor.u32 %v789_v3, %v786_v12  ;;  %v1054_v17 = vrot.slane %v1052_v7, 1  ;;  %v797_v24 = vshrl.u32 %v692_v19, 16  ;;  %v800_v25 = vshll.u32 %v692_v19, 16  ;;  %v8576_v30 = vld [vmem:[#allocation6 + $0x198] sm:$0xff]   ;;  %v8584_v7 = vld [vmem:[#allocation6 + $0x1c8] sm:$0xff]   ;;  %v8585_v9 = vld [vmem:[#allocation6 + $0x100] sm:$0xff]  }
  0xc4   : > { %v782_v15 = vsel %vm728_vm2, %v9630_v39, %v781_v14  ;;  %v624_v36 = vshrl.u32 %v9650_v6, 16  ;;  %v8579_v39 = vld [vmem:[#allocation6 + $0x1d0] sm:$0xff]   ;;  %v8587_v19 = vld [vmem:[#allocation6 + $0x1c0] sm:$0xff]  }
  0xc5   : > { %v791_v23 = vsel %vm728_vm2, %v777_v31, %v790_v13  ;;  %7592 = vmatpush3.bf16.msra.mxu1 %v8574_v18  ;;  %v1055_v28 = vsel %vm571_vm1, %v1050_v5, %v1054_v17  ;;  %v799_v34 = vrot.slane %v797_v24, 1  ;;  %v802_v42 = vrot.slane %v800_v25, 2 }
  0xc6   : > { %7542 = vmatpush3.bf16.msra.mxu0 %v8566_v43  ;;  %v9664_v31 = vsel %vm571_vm1, %v618_v20, %v622_v26  ;;  %7593 = vmatprep.subr.bf16.mxu1 %v8575_v27  ;;  %v1058_v43 = vor.u32 %v1056_v11, %v1054_v17  ;;  %v1068_v59 = vshll.u32 %v624_v36, 16  ;;  %v806_v5 = vshrl.u32 %v8582_v63, 16 }
  0xc7   : > { %980 = vmatmul.mubr.bf16.gmra.mxu0 %v769_v50  ;;  %7543 = vmatprep.subr.bf16.mxu0 %v8569_v56  ;;  %v1060_v44 = vshll.u32 %v9664_v31, 16  ;;  %v9667_v46 = vor.u32 %v802_v42, %v799_v34  ;;  %v1064_v53 = vshrl.u32 %v9664_v31, 16  ;;  %v794_v56 = vor.u32 %v793_v29, %v792_v10  ;;  %v8589_v29 = vld [vmem:[#allocation6 + $0x278] sm:$0xff]  }
  0xc8   : > { %1229 = vmatmul.mubr.bf16.gmra.mxu1 %v9605_v1  ;;  %987 = vmatprep.mubr.bf16.mxu0 %v791_v23  ;;  %v1261_v1 = vld [vmem:[#allocation3 + $0x18] sm:$0xe]  ;;  %v693_v50 = vrot.slane %v9673_v57, 7  ;;  %v1070_v51 = vrot.slane %v1068_v59, 1  ;;  %v808_v18 = vrot.slane %v806_v5, 1  ;;  %v1277_v23 = vshll.u32 %v9564_v41, 16 }
  0xc9   : > { %1236 = vmatprep.mubr.bf16.mxu1 %v1055_v28  ;;  %7594 = vmatpush3.bf16.msra.mxu1 %v8576_v30  ;;  %v1062_v49 = vrot.slane %v1060_v44, 1  ;;  %v804_v55 = vsel %vm728_vm2, %v790_v13, %v9667_v46  ;;  %v9678_v58 = vcombine.low %v1261_v1, %v9556_v35  ;;  %v795_v12 = vsel %vm728_vm2, %v781_v14, %v794_v56  ;;  %v8586_v35 = vld [vmem:[#allocation6 + $0x188] sm:$0xff]   ;;  %v8588_v28 = vld [vmem:[#allocation6 + $0x180] sm:$0xff]  }
  0xca   : > { %7544 = vmatpush3.bf16.msra.mxu0 %v8573_v60  ;;  %7595 = vmatprep.subr.bf16.mxu1 %v8579_v39  ;;  %v694_v3 = vsel %vm681_vm0, %v691_v8, %v693_v50  ;;  %v809_v60 = vshll.u32 %v8582_v63, 16  ;;  %v1281_v26 = vshrl.u32 %v9564_v41, 16  ;;  %v1285_v27 = vshll.u32 %v9582_v21, 16  ;;  %v9690_v42 = vld [vmem:[#allocation3 + $0x2c] sm:$0xff]   ;;  %v9695_v1 = vld [vmem:[#allocation3 + $0x34] sm:$0xff]  }
  0xcb   : > { %7545 = vmatprep.subr.bf16.mxu0 %v8577_v45  ;;  %v1063_v61 = vsel %vm571_vm1, %v1058_v43, %v1062_v49  ;;  %v815_v11 = vshrl.u32 %v694_v3, 16  ;;  %v818_v13 = vshll.u32 %v694_v3, 16  ;;  %v1066_v16 = vor.u32 %v1064_v53, %v1062_v49  ;;  %v1586_v45 = vld [vmem:[#allocation3 + $0x28] sm:$0xf]  ;;  %v1598_v39 = vld [vmem:[#allocation3 + $0x24] sm:$0xe] }
  0xcc   : > { %v811_v17 = vrot.slane %v809_v60, 2  ;;  %v1270_v8 = vshrl.u32 %v9678_v58, 16  ;;  %v1272_v10 = vshll.u32 %v9678_v58, 16  ;;  %v1358_v34 = vrot.slane %v9678_v58, 1  ;;  %v1585_v63 = vld [vmem:[#allocation3 + $0x24] sm:$0xf] }
  0xcd   : > { %7596 = vmatpush3.bf16.msra.mxu1 %v8581_v54  ;;  %v820_v14 = vrot.slane %v818_v13, 2  ;;  %v1071_v25 = vsel %vm571_vm1, %v1066_v16, %v1070_v51  ;;  %v1287_v44 = vrot.slane %v1285_v27, 1  ;;  %v1643_v53 = vshll.u32 %v9690_v42, 16 }
  0xce   : > { %7546 = vmatpush3.bf16.msra.mxu0 %v8578_v48  ;;  %7597 = vmatprep.subr.bf16.mxu1 %v8584_v7  ;;  %v812_v20 = vor.u32 %v811_v17, %v808_v18  ;;  %v1274_v30 = vrot.slane %v1272_v10, 1  ;;  %v1651_v59 = vshll.u32 %v9695_v1, 16  ;;  %v7074_v3 = vcombine.low %v1585_v63, %v1586_v45  ;;  %v8598_v63 = vld [vmem:[#allocation6 + $0x268] sm:$0xff]  }
  0xcf   : > { %988 = vmatmul.mubr.bf16.gmra.mxu0 %v782_v15  ;;  %7547 = vmatprep.subr.bf16.mxu0 %v8583_v0  ;;  %v1279_v15 = vrot.slane %v1277_v23, 1  ;;  %v1645_v51 = vrot.slane %v1643_v53, 1  ;;  %v1289_v7 = vshrl.u32 %v9582_v21, 16  ;;  %v1364_v18 = vrot.slane %v9582_v21, 1  ;;  %v8595_v23 = vld [vmem:[#allocation6 + $0x270] sm:$0xff]  }
  0xd0   : > { %995 = vmatprep.mubr.bf16.mxu0 %v804_v55  ;;  %1237 = vmatmul.mubr.bf16.gmra.mxu1 %v9628_v37  ;;  %v817_v37 = vrot.slane %v815_v11, 1  ;;  %v813_v48 = vsel %vm728_vm2, %v794_v56, %v812_v20  ;;  %v1275_v36 = vor.u32 %v1274_v30, %v1270_v8  ;;  %v9702_v55 = vcombine.low %v1598_v39, %v1586_v45  ;;  %v8593_v11 = vld [vmem:[#allocation6 + $0x238] sm:$0xff]  }
  0xd1   : > { %1244 = vmatprep.mubr.bf16.mxu1 %v1063_v61  ;;  %7598 = vmatpush3.bf16.msra.mxu1 %v8586_v35  ;;  %v1283_v49 = vor.u32 %v1281_v26, %v1279_v15  ;;  %v1359_v56 = vrot.slane %v9564_v41, 1  ;;  %v1293_v41 = vshll.u32 %v9597_v47, 16  ;;  %v1723_v13 = vshrl.u32 %v7074_v3, 16 }
  0xd2   : > { %7548 = vmatpush3.bf16.msra.mxu0 %v8585_v9  ;;  %v821_v24 = vor.u32 %v820_v14, %v817_v37  ;;  %7599 = vmatprep.subr.bf16.mxu1 %v8587_v19  ;;  %v1280_v54 = vsel %vm571_vm1, %v1275_v36, %v1279_v15  ;;  %v1636_v0 = vshrl.u32 %v9702_v55, 16  ;;  %v1638_v58 = vshll.u32 %v9702_v55, 16  ;;  %v9724_v37 = vld [vmem:[#allocation3 + $0x3c] sm:$0xff]   ;;  %v9735_v15 = vld [vmem:[#allocation3 + $0x44] sm:$0xff]  }
  0xd3   : > { %7637 = vmatprep.subr.bf16.mxu0 %v8589_v29  ;;  %v1361_v61 = vrot.slane %v1280_v54, 1  ;;  %v1725_v16 = vshll.u32 %v7074_v3, 16  ;;  %v1291_v35 = vor.u32 %v1289_v7, %v1287_v44  ;;  %v1295_v19 = vrot.slane %v1293_v41, 1  ;;  %v8596_v36 = vld [vmem:[#allocation6 + $0x230] sm:$0xff]  }
  0xd4   : > { %v822_v43 = vsel %vm728_vm2, %v9667_v46, %v821_v24  ;;  %v1288_v46 = vsel %vm571_vm1, %v1283_v49, %v1287_v44  ;;  %v1640_v9 = vrot.slane %v1638_v58, 1  ;;  %v1360_v14 = vsel %vm1357_vm3, %v1358_v34, %v1359_v56 }
  0xd5   : > { %7600 = vmatpush3.bf16.msra.mxu1 %v8588_v28  ;;  %v1362_v50 = vrot.slane %v1288_v46, 1  ;;  %v1727_v10 = vrot.slane %v1725_v16, 1  ;;  %v1296_v24 = vsel %vm571_vm1, %v1291_v35, %v1295_v19  ;;  %v1365_v49 = vsel %vm1357_vm3, %v1359_v56, %v1364_v18 }
  0xd6   : > { %v1641_v20 = vor.u32 %v1640_v9, %v1636_v0  ;;  %v1366_v30 = vrot.slane %v1296_v24, 1  ;;  %v1297_v39 = vshrl.u32 %v9597_v47, 16  ;;  %v1667_v56 = vshll.u32 %v9735_v15, 16 }
  0xd7   : > { %996 = vmatmul.mubr.bf16.gmra.mxu0 %v795_v12  ;;  %v1653_v12 = vrot.slane %v1651_v59, 1  ;;  %v1363_v5 = vsel %vm1357_vm3, %v1361_v61, %v1362_v50  ;;  %v1728_v29 = vor.u32 %v1727_v10, %v1723_v13  ;;  %v1309_v10 = vshll.u32 %v9644_v2, 16 }
  0xd8   : > { %1245 = vmatmul.mubr.bf16.gmra.mxu1 %v9648_v62  ;;  %1003 = vmatprep.mubr.bf16.mxu0 %v822_v43  ;;  %v1647_v62 = vshrl.u32 %v9690_v42, 16  ;;  %v1646_v27 = vsel %vm571_vm1, %v1641_v20, %v1645_v51  ;;  %v1669_v35 = vrot.slane %v1667_v56, 1  ;;  %v1994_v42 = vrot.slane %v9613_v4, 7 }
  0xd9   : > { %1252 = vmatprep.mubr.bf16.mxu1 %v1071_v25  ;;  %v1659_v25 = vshll.u32 %v9724_v37, 16  ;;  %v1731_v34 = vshrl.u32 %v1646_v27, 16  ;;  %v1733_v43 = vshll.u32 %v1646_v27, 16  ;;  %v1729_v41 = vsel %vm571_vm1, %v1728_v29, %v1645_v51 }
  0xda   : > { %v1649_v60 = vor.u32 %v1647_v62, %v1645_v51 }
  0xdb   : > { %v1661_v45 = vrot.slane %v1659_v25, 1  ;;  %v1735_v54 = vrot.slane %v1733_v43, 1 }
  0xdc   : > { %v9722_v17 = vsel %vm571_vm1, %v1649_v60, %v1653_v12  ;;  %v1663_v60 = vshrl.u32 %v9724_v37, 16 }
  0xdd   : > { %v1738_v8 = vshll.u32 %v9722_v17, 16  ;;  %v1742_v26 = vshrl.u32 %v9722_v17, 16  ;;  %v1736_v7 = vor.u32 %v1735_v54, %v1731_v34  ;;  %v1311_v34 = vrot.slane %v1309_v10, 1  ;;  %v8607_v54 = vld [vmem:[#allocation3 + $0x48] ss:$0 sps:$4 sm:$0x33]  }
  0xde   : > { %v1665_v16 = vor.u32 %v1663_v60, %v1661_v45 }
  0xdf   : > { %1004 = vmatmul.mubr.bf16.gmra.mxu0 %v813_v48  ;;  %v1740_v28 = vrot.slane %v1738_v8, 1  ;;  %v1367_v48 = vsel %vm1357_vm3, %v1362_v50, %v1366_v30  ;;  %v8599_v50 = vld [vmem:[#allocation6 + $0x228] sm:$0xff]   ;;  %v8601_v8 = vld [vmem:[#allocation6 + $0x260] sm:$0xff]  }
  0xe0   : > { %1524 = vmatprep.mubr.bf16.mxu0 %v1363_v5  ;;  %1253 = vmatmul.mubr.bf16.gmra.mxu1 %v9664_v31  ;;  %v1655_v31 = vshrl.u32 %v9695_v1, 16  ;;  %v1299_v5 = vor.u32 %v1297_v39, %v1295_v19  ;;  %v1305_v19 = vshrl.u32 %v9621_v32, 16  ;;  %v9768_v27 = vsel %vm571_vm1, %v1665_v16, %v1669_v35 }
  0xe1   : > { %v1744_v61 = vor.u32 %v1742_v26, %v1740_v28  ;;  %v1741_v20 = vsel %vm571_vm1, %v1736_v7, %v1740_v28  ;;  %v1368_v26 = vrot.slane %v9597_v47, 1  ;;  %v1754_v29 = vshll.u32 %v9768_v27, 16  ;;  %v9783_v7 = vld [vmem:[#allocation3 + $0x54] ss:$0 sps:$4 sm:$0x11]  }
  0xe2   : > { %v1657_v44 = vor.u32 %v1655_v31, %v1653_v12  ;;  %v1301_v12 = vshll.u32 %v9621_v32, 16  ;;  %1922 = vmatprep.mubr.bf16.mxu1 %v1741_v20  ;;  %v8606_v20 = vld [vmem:[#allocation6 + $0x250] sm:$0xff]   ;;  %v2070_v1 = vrot.slane %v1663_v60, 1 }
  0xe3   : > { %v1756_v47 = vrot.slane %v1754_v29, 1  ;;  %v1321_v29 = vshrl.u32 %v8607_v54, 16 }
  0xe4   : > { %v9747_v46 = vsel %vm571_vm1, %v1657_v44, %v1661_v45  ;;  %v1303_v9 = vrot.slane %v1301_v12, 1  ;;  %v8602_v45 = vld [vmem:[#allocation6 + $0x220] sm:$0xff]  }
  0xe5   : > { %v1746_v3 = vshll.u32 %v9747_v46, 16 }
  0xe6   : > { %v1304_v51 = vsel %vm571_vm1, %v1299_v5, %v1303_v9  ;;  %v1307_v28 = vor.u32 %v1305_v19, %v1303_v9  ;;  %v1317_v5 = vshll.u32 %v8607_v54, 16  ;;  %v1683_v19 = vshll.u32 %v9783_v7, 16 }
  0xe7   : > { %1525 = vmatmul.mubr.bf16.vlgmr.msra.gmra.mxu0 %v1360_v14  ;;  %v1748_v13 = vrot.slane %v1746_v3, 1  ;;  %v9760_v14 = vld [vmem:[#allocation3 + $0x4c] sm:$0xff]   ;;  %v1370_v24 = vrot.slane %v1304_v51, 1  ;;  %v1369_v3 = vsel %vm1357_vm3, %v1364_v18, %v1368_v26 }
  0xe8   : > { %7638 = vmatpush3.bf16.msra.mxu0 %v8593_v11  ;;  %1532 = vmatprep.mubr.bf16.mxu0 %v1367_v48  ;;  %v1750_v11 = vshrl.u32 %v9747_v46, 16  ;;  %v1671_v48 = vshrl.u32 %v9735_v15, 16  ;;  %v1312_v39 = vsel %vm571_vm1, %v1307_v28, %v1311_v34  ;;  %v8605_v18 = vld [vmem:[#allocation6 + $0x218] sm:$0xff]   ;;  %v1685_v10 = vrot.slane %v1683_v19, 1 }
  0xe9   : > { %7639 = vmatprep.subr.bf16.mxu0 %v8595_v23  ;;  %v1749_v23 = vsel %vm571_vm1, %v1744_v61, %v1748_v13  ;;  %1923 = vmatmul.mubr.bf16.vlgmr.msra.gmra.mxu1 %v1729_v41  ;;  %v1371_v43 = vsel %vm1357_vm3, %v1366_v30, %v1370_v24  ;;  %v1313_v61 = vshrl.u32 %v9644_v2, 16 }
  0xea   : > { %1930 = vmatprep.mubr.bf16.mxu1 %v1749_v23  ;;  %v1752_v44 = vor.u32 %v1750_v11, %v1748_v13  ;;  %v1673_v12 = vor.u32 %v1671_v48, %v1669_v35  ;;  %v1758_v11 = vshrl.u32 %v9768_v27, 16  ;;  %v1679_v13 = vshrl.u32 %v9760_v14, 16 }
  0xeb   : > { %v1319_v35 = vrot.slane %v1317_v5, 1  ;;  %v1372_v23 = vrot.slane %v9621_v32, 1  ;;  %v1687_v5 = vshrl.u32 %v9783_v7, 16  ;;  %v2083_v37 = vrot.slane %v1671_v48, 1 }
  0xec   : > { %7640 = vmatpush3.bf16.msra.mxu0 %v8596_v36  ;;  %v1675_v36 = vshll.u32 %v9760_v14, 16  ;;  %v1757_v41 = vsel %vm571_vm1, %v1752_v44, %v1756_v47  ;;  %v1760_v28 = vor.u32 %v1758_v11, %v1756_v47  ;;  %v8613_v11 = vld [vmem:[#allocation6 + $0x200] sm:$0xff]   ;;  %v2096_v48 = vrot.slane %v1679_v13, 1 }
  0xed   : > { %7641 = vmatprep.subr.bf16.mxu0 %v8598_v63  ;;  %v1374_v63 = vrot.slane %v1312_v39, 1  ;;  %v1988_v39 = vrot.slane %v9558_v38, 7  ;;  %v1323_v32 = vor.u32 %v1321_v29, %v1319_v35  ;;  %v1376_v38 = vrot.slane %v9644_v2, 1 }
  0xee   : > { %v1677_v30 = vrot.slane %v1675_v36, 1  ;;  %v2097_v15 = vrot.slane %v1675_v36, 2 }
  0xef   : > { %1533 = vmatmul.mubr.bf16.gmra.mxu0 %v1365_v49  ;;  %v8603_v49 = vld [vmem:[#allocation6 + $0x258] sm:$0xff]   ;;  %v1375_v16 = vsel %vm1357_vm3, %v1370_v24, %v1374_v63  ;;  %v8608_v24 = vld [vmem:[#allocation6 + $0x210] sm:$0xff]  }
  0xf0   : > { %7642 = vmatpush3.bf16.msra.mxu0 %v8599_v50  ;;  %1540 = vmatprep.mubr.bf16.mxu0 %v1371_v43  ;;  %v1315_v50 = vor.u32 %v1313_v61, %v1311_v34  ;;  %v9787_v9 = vsel %vm571_vm1, %v1673_v12, %v1677_v30  ;;  %v1681_v51 = vor.u32 %v1679_v13, %v1677_v30  ;;  %v8611_v30 = vld [vmem:[#allocation6 + $0x208] sm:$0xff]  }
  0xf1   : > { %7643 = vmatprep.subr.bf16.mxu0 %v8601_v8  ;;  %v1762_v21 = vshll.u32 %v9787_v9, 16  ;;  %1931 = vmatmul.mubr.bf16.gmra.mxu1 %v9722_v17  ;;  %v1987_v17 = vrot.slane %v9570_v52, 7  ;;  %v1766_v61 = vshrl.u32 %v9787_v9, 16 }
  0xf2   : > { %v1320_v8 = vsel %vm571_vm1, %v1315_v50, %v1319_v35  ;;  %1938 = vmatprep.mubr.bf16.mxu1 %v1757_v41  ;;  %v9800_v44 = vsel %vm571_vm1, %v1681_v51, %v1685_v10  ;;  %v1990_v35 = vrot.slane %v9562_v40, 7  ;;  %v1380_v40 = vrot.slane %v9673_v57, 1 }
  0xf3   : > { %v1764_v34 = vrot.slane %v1762_v21, 1  ;;  %v1378_v43 = vrot.slane %v1320_v8, 1  ;;  %v1770_v12 = vshll.u32 %v9800_v44, 16  ;;  %v1989_v50 = vsel %vm681_vm0, %v1987_v17, %v1988_v39 }
  0xf4   : > { %7644 = vmatpush3.bf16.msra.mxu0 %v8602_v45  ;;  %v8610_v45 = vld [vmem:[#allocation6 + $0x248] sm:$0xff]   ;;  %v2049_v21 = vshrl.u32 %v1989_v50, 16  ;;  %v1774_v19 = vshrl.u32 %v9800_v44, 16  ;;  %v1991_v29 = vsel %vm681_vm0, %v1988_v39, %v1990_v35  ;;  %v2033_v39 = vrot.slane %v1636_v0, 1 }
  0xf5   : > { %7645 = vmatprep.subr.bf16.mxu0 %v8603_v49  ;;  %v1373_v49 = vsel %vm1357_vm3, %v1368_v26, %v1372_v23  ;;  %v1765_v54 = vsel %vm571_vm1, %v1760_v28, %v1764_v34  ;;  %v1379_v47 = vsel %vm1357_vm3, %v1374_v63, %v1378_v43  ;;  %v1768_v52 = vor.u32 %v1766_v61, %v1764_v34 }
  0xf6   : > { %v1382_v26 = vrot.slane %v1323_v32, 1  ;;  %v2041_v63 = vshrl.u32 %v1987_v17, 16  ;;  %v1772_v41 = vrot.slane %v1770_v12, 1  ;;  %v2051_v10 = vrot.slane %v2049_v21, 1 }
  0xf7   : > { %1541 = vmatmul.mubr.bf16.gmra.mxu0 %v1369_v3  ;;  %v8612_v3 = vld [vmem:[#allocation6 + $0x240] sm:$0xff]   ;;  %v1381_v61 = vsel %vm1357_vm3, %v1376_v38, %v1380_v40  ;;  %v2036_v57 = vrot.slane %v1647_v62, 1  ;;  %v2037_v32 = vrot.slane %v1643_v53, 2 }
  0xf8   : > { %1548 = vmatprep.mubr.bf16.mxu0 %v1375_v16  ;;  %7646 = vmatpush3.bf16.msra.mxu0 %v8605_v18  ;;  %v2044_v16 = vshll.u32 %v1987_v17, 16  ;;  %v2052_v18 = vshll.u32 %v1989_v50, 16  ;;  %v1383_v2 = vsel %vm1357_vm3, %v1378_v43, %v1382_v26  ;;  %v2043_v51 = vrot.slane %v2041_v63, 1 }
  0xf9   : > { %7647 = vmatprep.subr.bf16.mxu0 %v8606_v20  ;;  %1939 = vmatmul.mubr.bf16.gmra.mxu1 %v9747_v46  ;;  %v1377_v46 = vsel %vm1357_vm3, %v1372_v23, %v1376_v38  ;;  %v1778_v20 = vshll.u32 %v1687_v5, 16  ;;  %v1773_v7 = vsel %vm571_vm1, %v1768_v52, %v1772_v41  ;;  %v1776_v23 = vor.u32 %v1774_v19, %v1772_v41 }
  0xfa   : > { %1946 = vmatprep.mubr.bf16.mxu1 %v1765_v54  ;;  %v2046_v8 = vrot.slane %v2044_v16, 2  ;;  %v2065_v17 = vshll.u32 %v1991_v29, 16  ;;  %v2038_v0 = vor.u32 %v2037_v32, %v2036_v57  ;;  %v2057_v50 = vrot.slane %v1655_v31, 1 }
  0xfb   : > { %v1780_v28 = vrot.slane %v1778_v20, 1  ;;  %v2058_v38 = vrot.slane %v1651_v59, 2  ;;  %v1996_v16 = vrot.slane %v9624_v33, 7  ;;  %v2071_v59 = vrot.slane %v1659_v25, 2 }
  0xfc   : > { %7648 = vmatpush3.bf16.msra.mxu0 %v8608_v24  ;;  %v2054_v24 = vrot.slane %v2052_v18, 2  ;;  %v2047_v34 = vor.u32 %v2046_v8, %v2043_v51  ;;  %v1998_v20 = vrot.slane %v9650_v6, 7  ;;  %v2084_v25 = vrot.slane %v1667_v56, 2  ;;  %v8614_v56 = vld [vmem:[#allocation3 + $0x54] ss:$0 sps:$4 sm:$0x33]  }
  0xfd   : > { %7649 = vmatprep.subr.bf16.mxu0 %v8610_v45  ;;  %v2062_v45 = vshrl.u32 %v1991_v29, 16  ;;  %v1781_v54 = vsel %vm571_vm1, %v1776_v23, %v1780_v28  ;;  %v2059_v63 = vor.u32 %v2058_v38, %v2057_v50 }
  0xfe   : > { %v2055_v43 = vor.u32 %v2054_v24, %v2051_v10  ;;  %v1999_v10 = vsel %vm681_vm0, %v1996_v16, %v1998_v20  ;;  %v2085_v24 = vor.u32 %v2084_v25, %v2083_v37 }
  0xff   : > { %1549 = vmatmul.mubr.bf16.gmra.mxu0 %v1373_v49  ;;  %v1992_v49 = vrot.slane %v9584_v22, 7  ;;  %v2064_v12 = vrot.slane %v2062_v45, 1  ;;  %v2067_v22 = vrot.slane %v2065_v17, 2  ;;  %v2060_v31 = vsel %vm728_vm2, %v2038_v0, %v2059_v63 }
 0x100   : > { %1556 = vmatprep.mubr.bf16.mxu0 %v1379_v47  ;;  %7650 = vmatpush3.bf16.msra.mxu0 %v8611_v30  ;;  %v2056_v47 = vsel %vm728_vm2, %v2047_v34, %v2055_v43  ;;  %v2119_v40 = vshrl.u32 %v1999_v10, 16  ;;  %v2122_v6 = vshll.u32 %v1999_v10, 16  ;;  %v2098_v45 = vor.u32 %v2097_v15, %v2096_v48 }
 0x101   : > { %7651 = vmatprep.subr.bf16.mxu0 %v8612_v3  ;;  %1947 = vmatmul.mubr.bf16.gmra.mxu1 %v9768_v27  ;;  %v2034_v27 = vrot.slane %v1638_v58, 2  ;;  %v1993_v30 = vsel %vm681_vm0, %v1990_v35, %v1992_v49  ;;  %v2068_v58 = vor.u32 %v2067_v22, %v2064_v12  ;;  %v1995_v5 = vsel %vm681_vm0, %v1992_v49, %v1994_v42 }
 0x102   : > { %1954 = vmatprep.mubr.bf16.mxu1 %v1773_v7  ;;  %v2075_v62 = vshrl.u32 %v1993_v30, 16  ;;  %v2078_v3 = vshll.u32 %v1993_v30, 16  ;;  %v2088_v41 = vshrl.u32 %v1995_v5, 16  ;;  %v1997_v35 = vsel %vm681_vm0, %v1994_v42, %v1996_v16 }
 0x103   : > { %v2035_v55 = vor.u32 %v2034_v27, %v2033_v39  ;;  %v2101_v19 = vshrl.u32 %v1997_v35, 16  ;;  %v2104_v33 = vshll.u32 %v1997_v35, 16  ;;  %v2121_v34 = vrot.slane %v2119_v40, 1 }
 0x104   : > { %7652 = vmatpush3.bf16.msra.mxu0 %v8613_v11  ;;  %v2077_v52 = vrot.slane %v2075_v62, 1  ;;  %v2080_v26 = vrot.slane %v2078_v3, 2  ;;  %v2091_v11 = vshll.u32 %v1995_v5, 16  ;;  %v2090_v18 = vrot.slane %v2088_v41, 1 }
 0x105   : > { %v2039_v53 = vsel %vm728_vm2, %v2035_v55, %v2038_v0  ;;  %v2103_v7 = vrot.slane %v2101_v19, 1  ;;  %v2106_v8 = vrot.slane %v2104_v33, 2  ;;  %v2110_v17 = vshrl.u32 %v8614_v56, 16 }
 0x106   : > { %v2081_v4 = vor.u32 %v2080_v26, %v2077_v52  ;;  %v2113_v49 = vshll.u32 %v8614_v56, 16  ;;  %v2099_v39 = vsel %vm728_vm2, %v2085_v24, %v2098_v45 }
 0x107   : > { %1557 = vmatmul.mubr.bf16.gmra.mxu0 %v1377_v46  ;;  %v2072_v46 = vor.u32 %v2071_v59, %v2070_v1  ;;  %v2107_v29 = vor.u32 %v2106_v8, %v2103_v7  ;;  %v2112_v27 = vrot.slane %v2110_v17, 1 }
 0x108   : > { %1564 = vmatprep.mubr.bf16.mxu0 %v1383_v2  ;;  %v2082_v21 = vsel %vm728_vm2, %v2068_v58, %v2081_v4  ;;  %v2115_v57 = vrot.slane %v2113_v49, 2 }
 0x109   : > { %1955 = vmatmul.mubr.bf16.gmra.mxu1 %v9787_v9  ;;  %v2069_v9 = vsel %vm728_vm2, %v2055_v43, %v2068_v58  ;;  %v2073_v51 = vsel %vm728_vm2, %v2059_v63, %v2072_v46  ;;  %v2086_v23 = vsel %vm728_vm2, %v2072_v46, %v2085_v24  ;;  %v2124_v43 = vrot.slane %v2122_v6, 2 }
 0x10a   : > { %1962 = vmatprep.mubr.bf16.mxu1 %v1781_v54  ;;  %v2116_v14 = vor.u32 %v2115_v57, %v2112_v27 }
 0x10c   : > { %v2117_v36 = vsel %vm728_vm2, %v2098_v45, %v2116_v14 }
 0x10f   : > { %1565 = vmatmul.mubr.bf16.gmra.mxu0 %v1381_v61  ;;  %v2125_v61 = vor.u32 %v2124_v43, %v2121_v34 }
 0x110   : > { %2267 = vmatprep.mubr.bf16.mxu0 %v2056_v47 }
 0x111   : > { %1963 = vmatmul.mubr.bf16.gmra.mxu1 %v9800_v44  ;;  %v2093_v44 = vrot.slane %v2091_v11, 2  ;;  %v2126_v13 = vsel %vm728_vm2, %v2107_v29, %v2125_v61 }
 0x113   : > { %v2094_v2 = vor.u32 %v2093_v44, %v2090_v18 }
 0x115   : > { %v2095_v60 = vsel %vm728_vm2, %v2081_v4, %v2094_v2  ;;  %v2108_v28 = vsel %vm728_vm2, %v2094_v2, %v2107_v29 }
 0x117   : > { %2268 = vmatmul.mubr.bf16.vlgmr.msra.gmra.mxu0 %v2039_v53 }
 0x118   : > { %2275 = vmatprep.mubr.bf16.mxu0 %v2069_v9 }
 0x11f   : > { %2276 = vmatmul.mubr.bf16.gmra.mxu0 %v2060_v31 }
 0x120   : > { %2283 = vmatprep.mubr.bf16.mxu0 %v2082_v21 }
 0x127   : > { %2284 = vmatmul.mubr.bf16.gmra.mxu0 %v2073_v51 }
 0x128   : > { %2291 = vmatprep.mubr.bf16.mxu0 %v2095_v60 }
 0x12f   : > { %2292 = vmatmul.mubr.bf16.gmra.mxu0 %v2086_v23 }
 0x130   : > { %2299 = vmatprep.mubr.bf16.mxu0 %v2108_v28 }
 0x137   : > { %2300 = vmatmul.mubr.bf16.gmra.mxu0 %v2099_v39 }
 0x138   : > { %2307 = vmatprep.mubr.bf16.mxu0 %v2126_v13 }
 0x13f   : > { %2308 = vmatmul.mubr.bf16.gmra.mxu0 %v2117_v36 }
 0x175   : > { %v7445_v32 = vpop.f32.mrf.mxu0 }
 0x177   : > { %v7446_v54 = vpop.f32.mrf.mxu0  ;;  %v7497_v22 = vpop.f32.mrf.mxu1 }
 0x178   : > { %v7447_v47 = vadd.f32 %v7446_v54, %v7445_v32 }
 0x179   : > { %v7448_v12 = vpop.f32.mrf.mxu0  ;;  %v7498_v0 = vpop.f32.mrf.mxu1 }
 0x17a   : > { %v7499_v58 = vadd.f32 %v7498_v0, %v7497_v22 }
 0x17b   : > { %v7449_v30 = vpop.f32.mrf.mxu0  ;;  %v7500_v62 = vpop.f32.mrf.mxu1 }
 0x17c   : > { %v7450_v55 = vadd.f32 %v7449_v30, %v7448_v12  ;;  %v9869_v42 = vadd.f32 %v7499_v58, %v7447_v47 }
 0x17d   : > { %v7501_v53 = vpop.f32.mrf.mxu1 }
 0x17e   : > { %v7502_v38 = vadd.f32 %v7501_v53, %v7500_v62 }
 0x17f   : > { %v7451_v3 = vpop.f32.mrf.mxu0 }
 0x180   : > { %v7503_v52 = vpop.f32.mrf.mxu1  ;;  %v9871_v5 = vadd.f32 %v7502_v38, %v7450_v55 }
 0x181   : > { %v7452_v50 = vpop.f32.mrf.mxu0 }
 0x182   : > { %v7453_v9 = vadd.f32 %v7452_v50, %v7451_v3  ;;  %v7504_v63 = vpop.f32.mrf.mxu1 }
 0x183   : > { %v7454_v26 = vpop.f32.mrf.mxu0  ;;  %v7505_v41 = vadd.f32 %v7504_v63, %v7503_v52 }
 0x184   : > { %v7506_v16 = vpop.f32.mrf.mxu1 }
 0x185   : > { %v7455_v4 = vpop.f32.mrf.mxu0  ;;  %v9873_v1 = vadd.f32 %v7505_v41, %v7453_v9 }
 0x186   : > { %v7456_v11 = vadd.f32 %v7455_v4, %v7454_v26  ;;  %v7507_v59 = vpop.f32.mrf.mxu1 }
 0x187   : > { %v7457_v31 = vpop.f32.mrf.mxu0  ;;  %v7508_v18 = vadd.f32 %v7507_v59, %v7506_v16 }
 0x188   : > { %v7509_v35 = vpop.f32.mrf.mxu1 }
 0x189   : > { %v7458_v21 = vpop.f32.mrf.mxu0  ;;  %v9875_v2 = vadd.f32 %v7508_v18, %v7456_v11 }
 0x18a   : > { %v7459_v44 = vadd.f32 %v7458_v21, %v7457_v31  ;;  %v7510_v19 = vpop.f32.mrf.mxu1 }
 0x18b   : > { %v7460_v46 = vpop.f32.mrf.mxu0  ;;  %v7511_v20 = vadd.f32 %v7510_v19, %v7509_v35 }
 0x18c   : > { %v7512_v37 = vpop.f32.mrf.mxu1 }
 0x18d   : > { %v7461_v33 = vpop.f32.mrf.mxu0  ;;  %v1231_v60 = vadd.f32 %v7511_v20, %v7459_v44 }
 0x18e   : > { %v7462_v51 = vadd.f32 %v7461_v33, %v7460_v46  ;;  %v7513_v7 = vpop.f32.mrf.mxu1 }
 0x18f   : > { %v7463_v25 = vpop.f32.mrf.mxu0  ;;  %v7514_v10 = vadd.f32 %v7513_v7, %v7512_v37 }
 0x190   : > { %v7515_v29 = vpop.f32.mrf.mxu1 }
 0x191   : > { %v7464_v8 = vpop.f32.mrf.mxu0  ;;  %v1234_v6 = vadd.f32 %v7514_v10, %v7462_v51 }
 0x192   : > { %v7465_v24 = vadd.f32 %v7464_v8, %v7463_v25  ;;  %v7516_v23 = vpop.f32.mrf.mxu1 }
 0x193   : > { %v7466_v40 = vpop.f32.mrf.mxu0  ;;  %v7517_v15 = vadd.f32 %v7516_v23, %v7515_v29 }
 0x194   : > { %v9879_v28 = vpop.f32.mrf.mxu1 }
 0x195   : > { %v7467_v48 = vpop.f32.mrf.mxu0  ;;  %v1239_v43 = vadd.f32 %v7517_v15, %v7465_v24 }
 0x196   : > { %v9877_v56 = vadd.f32 %v7467_v48, %v7466_v40  ;;  %v9881_v45 = vpop.f32.mrf.mxu1 }
 0x197   : > { %v7469_v34 = vpop.f32.mrf.mxu0 }
 0x198   : > { %v9885_v61 = vpop.f32.mrf.mxu1 }
 0x199   : > { %v7470_v17 = vpop.f32.mrf.mxu0 }
 0x19a   : > { %v9883_v49 = vadd.f32 %v7470_v17, %v7469_v34  ;;  %v9887_v27 = vpop.f32.mrf.mxu1 }
 0x19b   : > { %v7472_v39 = vpop.f32.mrf.mxu0 }
 0x19c   : > { %v9891_v14 = vpop.f32.mrf.mxu1 }
 0x19d   : > { %v7473_v57 = vpop.f32.mrf.mxu0 }
 0x19e   : > { %v9889_v13 = vadd.f32 %v7473_v57, %v7472_v39  ;;  %v9893_v32 = vpop.f32.mrf.mxu1 }
 0x19f   : > { %v7475_v36 = vpop.f32.mrf.mxu0 }
 0x1a0   : > { %v9897_v12 = vpop.f32.mrf.mxu1 }
 0x1a1   : > { %v7476_v54 = vpop.f32.mrf.mxu0 }
 0x1a2   : > { %v9895_v47 = vadd.f32 %v7476_v54, %v7475_v36  ;;  %v9899_v30 = vpop.f32.mrf.mxu1 }
 0x1a3   : > { %v7478_v22 = vpop.f32.mrf.mxu0 }
 0x1a4   : > { %v9903_v62 = vpop.f32.mrf.mxu1 }
 0x1a5   : > { %v7479_v55 = vpop.f32.mrf.mxu0 }
 0x1a6   : > { %v9901_v0 = vadd.f32 %v7479_v55, %v7478_v22  ;;  %v9906_v9 = vpop.f32.mrf.mxu1 }
 0x1a7   : > { %v7549_v58 = vpop.f32.mrf.mxu0 }
 0x1a9   : > { %v7550_v3 = vpop.f32.mrf.mxu0  ;;  %v7601_v63 = vpop.f32.mrf.mxu1 }
 0x1aa   : > { %v7551_v53 = vadd.f32 %v7550_v3, %v7549_v58 }
 0x1ab   : > { %v7552_v50 = vpop.f32.mrf.mxu0  ;;  %v7602_v11 = vpop.f32.mrf.mxu1 }
 0x1ac   : > { %v1573_v38 = vadd.f32 %v7551_v53, %v9869_v42  ;;  %v7603_v53 = vadd.f32 %v7602_v11, %v7601_v63 }
 0x1ad   : > { %v7553_v52 = vpop.f32.mrf.mxu0  ;;  %v7604_v59 = vpop.f32.mrf.mxu1 }
 0x1ae   : > { %v7554_v26 = vadd.f32 %v7553_v52, %v7552_v50 }
 0x1af   : > { %v7555_v4 = vpop.f32.mrf.mxu0  ;;  %v7605_v44 = vpop.f32.mrf.mxu1 }
 0x1b0   : > { %v1574_v41 = vadd.f32 %v7554_v26, %v9871_v5 }
 0x1b1   : > { %v7556_v16 = vpop.f32.mrf.mxu0  ;;  %v7607_v19 = vpop.f32.mrf.mxu1 }
 0x1b2   : > { %v7557_v31 = vadd.f32 %v7556_v16, %v7555_v4  ;;  %v1971_v4 = vadd.f32 %v7603_v53, %v1573_v38  ;;  %v7606_v16 = vadd.f32 %v7605_v44, %v7604_v59 }
 0x1b3   : > { %v7558_v21 = vpop.f32.mrf.mxu0  ;;  %v7608_v20 = vpop.f32.mrf.mxu1 }
 0x1b4   : > { %v1575_v18 = vadd.f32 %v7557_v31, %v9873_v1 }
 0x1b5   : > { %v7559_v35 = vpop.f32.mrf.mxu0  ;;  %v7610_v25 = vpop.f32.mrf.mxu1 }
 0x1b6   : > { %v7560_v46 = vadd.f32 %v7559_v35, %v7558_v21  ;;  %v9934_v35 = vld [vmem:[%s11413_s3] ss:$0 sm:$0xff] }
 0x1b7   : > { %v7561_v42 = vpop.f32.mrf.mxu0  ;;  %v7611_v24 = vpop.f32.mrf.mxu1 }
 0x1b8   : > { %v1576_v33 = vadd.f32 %v7560_v46, %v9875_v2 }
 0x1b9   : > { %v7562_v51 = vpop.f32.mrf.mxu0  ;;  %v7613_v48 = vpop.f32.mrf.mxu1 }
 0x1ba   : > { %v7563_v37 = vadd.f32 %v7562_v51, %v7561_v42 }
 0x1bb   : > { %v7564_v7 = vpop.f32.mrf.mxu0  ;;  %v7614_v2 = vpop.f32.mrf.mxu1 }
 0x1bc   : > { %v1577_v5 = vadd.f32 %v7563_v37, %v1231_v60  ;;  %v1972_v37 = vadd.f32 %v7606_v16, %v1574_v41 }
 0x1bd   : > { %v7565_v8 = vpop.f32.mrf.mxu0  ;;  %v7616_v36 = vpop.f32.mrf.mxu1 }
 0x1be   : > { %v7566_v10 = vadd.f32 %v7565_v8, %v7564_v7  ;;  %v7609_v7 = vadd.f32 %v7608_v20, %v7607_v19  ;;  %v7615_v19 = vadd.f32 %v7614_v2, %v7613_v48 }
 0x1bf   : > { %v7567_v29 = vpop.f32.mrf.mxu0  ;;  %v7617_v22 = vpop.f32.mrf.mxu1 }
 0x1c0   : > { %v9911_v40 = vadd.f32 %v7566_v10, %v1234_v6  ;;  %v1973_v44 = vadd.f32 %v7609_v7, %v1575_v18  ;;  %v1975_v18 = vadd.f32 %v7615_v19, %v1577_v5  ;;  %v7520_v7 = vadd.f32 %v9881_v45, %v9879_v28 }
 0x1c1   : > { %v7568_v1 = vpop.f32.mrf.mxu0  ;;  %v7619_v58 = vpop.f32.mrf.mxu1 }
 0x1c2   : > { %v7569_v23 = vadd.f32 %v7568_v1, %v7567_v29  ;;  %v7612_v29 = vadd.f32 %v7611_v24, %v7610_v25  ;;  %v7618_v25 = vadd.f32 %v7617_v22, %v7616_v36  ;;  %v1242_v36 = vadd.f32 %v7520_v7, %v9877_v56 }
 0x1c3   : > { %v7570_v15 = vpop.f32.mrf.mxu0  ;;  %v7620_v50 = vpop.f32.mrf.mxu1  ;;  %v7523_v22 = vadd.f32 %v9887_v27, %v9885_v61  ;;  %v7526_v61 = vadd.f32 %v9893_v32, %v9891_v14 }
 0x1c4   : > { %v9913_v34 = vadd.f32 %v7569_v23, %v1239_v43  ;;  %v1974_v41 = vadd.f32 %v7612_v29, %v1576_v33 }
 0x1c5   : > { %v7571_v17 = vpop.f32.mrf.mxu0  ;;  %v7622_v21 = vpop.f32.mrf.mxu1  ;;  %v1247_v56 = vadd.f32 %v7523_v22, %v9883_v49  ;;  %v7529_v49 = vadd.f32 %v9899_v30, %v9897_v12 }
 0x1c6   : > { %v7572_v2 = vadd.f32 %v7571_v17, %v7570_v15 }
 0x1c7   : > { %v9915_v39 = vpop.f32.mrf.mxu0  ;;  %v7623_v11 = vpop.f32.mrf.mxu1 }
 0x1c8   : > { %v1580_v45 = vadd.f32 %v7572_v2, %v1242_v36 }
 0x1c9   : > { %v9917_v57 = vpop.f32.mrf.mxu0  ;;  %v7625_v53 = vpop.f32.mrf.mxu1 }
 0x1ca   : > { %v7575_v15 = vadd.f32 %v9917_v57, %v9915_v39 }
 0x1cb   : > { %v9919_v60 = vpop.f32.mrf.mxu0 }
 0x1cd   : > { %v9921_v54 = vpop.f32.mrf.mxu0 }
 0x1ce   : > { %v7578_v39 = vadd.f32 %v9921_v54, %v9919_v60 }
 0x1cf   : > { %v9923_v6 = vpop.f32.mrf.mxu0 }
 0x1d1   : > { %v9925_v55 = vpop.f32.mrf.mxu0 }
 0x1d3   : > { %v9927_v3 = vpop.f32.mrf.mxu0 }
 0x1d5   : > { %v9929_v43 = vpop.f32.mrf.mxu0 }
 0x1d7   : > { %v7653_v52 = vpop.f32.mrf.mxu0 }
 0x1d9   : > { %v7654_v26 = vpop.f32.mrf.mxu0 }
 0x1da   : > { %v7655_v31 = vadd.f32 %v7654_v26, %v7653_v52 }
 0x1db   : > { %v7656_v46 = vpop.f32.mrf.mxu0 }
 0x1dc   : > { %v2316_v42 = vadd.f32 %v7655_v31, %v1971_v4  ;;  %v7626_v31 = vpop.f32.mrf.mxu1 }
 0x1dd   : > { %v7657_v51 = vpop.f32.mrf.mxu0 }
 0x1de   : > { %v9937_v8 = vadd.f32 %v9934_v35, %v2316_v42  ;;  %v7658_v63 = vadd.f32 %v7657_v51, %v7656_v46 }
 0x1df   : > { %v7659_v10 = vpop.f32.mrf.mxu0 }
 0x1e0   : > { %11483 = vst [vmem:[#allocation37_spill] sm:$0xff] %v9937_v8  ;;  %v2317_v38 = vadd.f32 %v7658_v63, %v1972_v37  ;;  %v7628_v63 = vpop.f32.mrf.mxu1 }
 0x1e1   : > { %v7660_v59 = vpop.f32.mrf.mxu0 }
 0x1e2   : > { %v9940_v1 = vadd.f32 %v9934_v35, %v2317_v38  ;;  %v7661_v23 = vadd.f32 %v7660_v59, %v7659_v10  ;;  %v1976_v38 = vadd.f32 %v7618_v25, %v9911_v40  ;;  %v7621_v59 = vadd.f32 %v7620_v50, %v7619_v58  ;;  %v7629_v29 = vpop.f32.mrf.mxu1 }
 0x1e3   : > { %v7662_v52 = vpop.f32.mrf.mxu0  ;;  %v7624_v58 = vadd.f32 %v7623_v11, %v7622_v21  ;;  %v1255_v25 = vadd.f32 %v7529_v49, %v9895_v47 }
 0x1e4   : > { %11484 = vst [vmem:[#allocation38_spill] sm:$0xff] %v9940_v1  ;;  %v2318_v26 = vadd.f32 %v7661_v23, %v1973_v44  ;;  %v1977_v40 = vadd.f32 %v7621_v59, %v9913_v34  ;;  %v7631_v27 = vpop.f32.mrf.mxu1  ;;  %v7627_v34 = vadd.f32 %v7626_v31, %v7625_v53 }
 0x1e5   : > { %v7663_v4 = vpop.f32.mrf.mxu0  ;;  %v1978_v19 = vadd.f32 %v7624_v58, %v1580_v45 }
 0x1e6   : > { %v9943_v20 = vadd.f32 %v9934_v35, %v2318_v26  ;;  %v7664_v16 = vadd.f32 %v7663_v4, %v7662_v52  ;;  %v7632_v14 = vpop.f32.mrf.mxu1 }
 0x1e7   : > { %v7665_v46 = vpop.f32.mrf.mxu0 }
 0x1e8   : > { %11485 = vst [vmem:[#allocation39_spill] sm:$0xff] %v9943_v20  ;;  %v2319_v42 = vadd.f32 %v7664_v16, %v1974_v41  ;;  %v1581_v41 = vadd.f32 %v7575_v15, %v1247_v56  ;;  %v1250_v16 = vadd.f32 %v7526_v61, %v9889_v13  ;;  %v7532_v13 = vadd.f32 %v9906_v9, %v9903_v62  ;;  %v7634_v12 = vpop.f32.mrf.mxu1 }
 0x1e9   : > { %v7666_v51 = vpop.f32.mrf.mxu0 }
 0x1ea   : > { %v9946_v24 = vadd.f32 %v9934_v35, %v2319_v42  ;;  %v7667_v37 = vadd.f32 %v7666_v51, %v7665_v46  ;;  %v1582_v42 = vadd.f32 %v7578_v39, %v1250_v16  ;;  %v7581_v51 = vadd.f32 %v9925_v55, %v9923_v6  ;;  %v7635_v47 = vpop.f32.mrf.mxu1 }
 0x1eb   : > { %v7668_v33 = vpop.f32.mrf.mxu0  ;;  %v1979_v54 = vadd.f32 %v7627_v34, %v1581_v41  ;;  %v7636_v36 = vadd.f32 %v7635_v47, %v7634_v12 }
 0x1ec   : > { %11486 = vst [vmem:[#allocation40_spill] sm:$0xff] %v9946_v24  ;;  %v2320_v48 = vadd.f32 %v7667_v37, %v1975_v18  ;;  %v7630_v18 = vadd.f32 %v7629_v29, %v7628_v63  ;;  %v1583_v7 = vadd.f32 %v7581_v51, %v1255_v25 }
 0x1ed   : > { %v7669_v10 = vpop.f32.mrf.mxu0 }
 0x1ee   : > { %v9952_v44 = vadd.f32 %v9934_v35, %v2320_v48  ;;  %v7670_v5 = vadd.f32 %v7669_v10, %v7668_v33  ;;  %v7584_v33 = vadd.f32 %v9929_v43, %v9927_v3  ;;  %v1980_v55 = vadd.f32 %v7630_v18, %v1582_v42 }
 0x1ef   : > { %v7671_v23 = vpop.f32.mrf.mxu0  ;;  %v7633_v48 = vadd.f32 %v7632_v14, %v7631_v27  ;;  %v1258_v10 = vadd.f32 %v7532_v13, %v9901_v0 }
 0x1f0   : > { %11487 = vst [vmem:[#allocation41_spill] sm:$0xff] %v9952_v44  ;;  %v2321_v28 = vadd.f32 %v7670_v5, %v1976_v38 }
 0x1f1   : > { %v7672_v17 = vpop.f32.mrf.mxu0  ;;  %v1584_v62 = vadd.f32 %v7584_v33, %v1258_v10  ;;  %v1981_v5 = vadd.f32 %v7633_v48, %v1583_v7 }
 0x1f2   : > { %v9961_v50 = vadd.f32 %v9934_v35, %v2321_v28  ;;  %v7673_v52 = vadd.f32 %v7672_v17, %v7671_v23 }
 0x1f3   : > { %v7674_v26 = vpop.f32.mrf.mxu0  ;;  %v1982_v28 = vadd.f32 %v7636_v36, %v1584_v62 }
 0x1f4   : > { %11488 = vst [vmem:[#allocation42_spill] sm:$0xff] %v9961_v50  ;;  %v2322_v4 = vadd.f32 %v7673_v52, %v1977_v40 }
 0x1f5   : > { %v7675_v57 = vpop.f32.mrf.mxu0 }
 0x1f6   : > { %v9969_v21 = vadd.f32 %v9934_v35, %v2322_v4  ;;  %v7676_v11 = vadd.f32 %v7675_v57, %v7674_v26 }
 0x1f7   : > { %v7677_v32 = vpop.f32.mrf.mxu0 }
 0x1f8   : > { %11489 = vst [vmem:[#allocation43_spill] sm:$0xff] %v9969_v21  ;;  %v2323_v46 = vadd.f32 %v7676_v11, %v1978_v19 }
 0x1f9   : > { %v7678_v60 = vpop.f32.mrf.mxu0 }
 0x1fa   : > { %v9977_v53 = vadd.f32 %v9934_v35, %v2323_v46  ;;  %v7679_v31 = vadd.f32 %v7678_v60, %v7677_v32 }
 0x1fb   : > { %v7680_v30 = vpop.f32.mrf.mxu0 }
 0x1fc   : > { %11490 = vst [vmem:[#allocation44_spill] sm:$0xff] %v9977_v53  ;;  %v2324_v37 = vadd.f32 %v7679_v31, %v1979_v54 }
 0x1fd   : > { %v7681_v6 = vpop.f32.mrf.mxu0 }
 0x1fe   : > { %v9985_v63 = vadd.f32 %v9934_v35, %v2324_v37  ;;  %v7682_v2 = vadd.f32 %v7681_v6, %v7680_v30 }
 0x1ff   : > { %v7683_v38 = vpop.f32.mrf.mxu0 }
 0x200   : > { %11491 = vst [vmem:[#allocation45_spill] sm:$0xff] %v9985_v63  ;;  %v2325_v59 = vadd.f32 %v7682_v2, %v1980_v55 }
 0x201   : > { %v7684_v9 = vpop.f32.mrf.mxu0 }
 0x202   : > { %v9989_v22 = vadd.f32 %v9934_v35, %v2325_v59  ;;  %v7685_v3 = vadd.f32 %v7684_v9, %v7683_v38 }
 0x203   : > { %v7686_v43 = vpop.f32.mrf.mxu0 }
 0x204   : > { %11492 = vst [vmem:[#allocation46_spill] sm:$0xff] %v9989_v22  ;;  %v2326_v29 = vadd.f32 %v7685_v3, %v1981_v5 }
 0x205   : > { %v7687_v23 = vpop.f32.mrf.mxu0 }
 0x206   : > { %v9992_v45 = vadd.f32 %v9934_v35, %v2326_v29  ;;  %v7688_v15 = vadd.f32 %v7687_v23, %v7686_v43 }
 0x208   : > { %11493 = vst [vmem:[#allocation47_spill] sm:$0xff] %v9992_v45  ;;  %v2327_v0 = vadd.f32 %v7688_v15, %v1982_v28 }
 0x20a   : > { %v9995_v17 = vadd.f32 %v9934_v35, %v2327_v0 }
 0x20c   : > { %11494 = vst [vmem:[#allocation48_spill] sm:$0xff] %v9995_v17 }
 0x20d   : > { %9229 = dma.done.wait [#allocation4], 1728 }
 0x20e   : > { %9230 = vsyncadd [#allocation4], 4294965568  ;;  %v8617_v40 = vld [vmem:[#allocation9 + $0x38] sm:$0xff]   ;;  %v8618_v58 = vld [vmem:[#allocation9 + $0x30] sm:$0xff]   ;;  %vm4823_vm4 = vcmask 1041408   ;;  %vm4868_vm5 = vcmask 1045504  }
 0x20f   : > { %8265 = vmatprep.subr.bf16.mxu1 %v8617_v40  ;;  %v8619_v52 = vld [vmem:[#allocation9 + $0x28] sm:$0xff]   ;;  %v8620_v56 = vld [vmem:[#allocation9 + $0x20] sm:$0xff]   ;;  %v8621_v35 = vld [vmem:[#allocation9 + $0x18] sm:$0xff]   ;;  %vm6507_vm6 = vcmask 1047554   ;;  %s6853_s30 = smul.u32 12, %s9249_s18  ;;  %s6861_s17 = sshll.u32 %s9554_s27, 4  ;;  %s11354_s17 = int_to_ptr.vmem [resolvable:$true] %s6861_s17 }
 0x210   : > { %8266 = vmatpush3.bf16.msra.mxu1 %v8617_v40  ;;  %v2349_v61 = vld [vmem:[#allocation2 + $0x18] sm:$0xe]  ;;  %v9997_v27 = vld [vmem:[#allocation2 + $0x1c] sm:$0xf]  ;;  %v9999_v26 = vld [vmem:[#allocation2 + $0x20] sm:$0xff]   ;;  %s8378_s20 = smul.u32 48, %s9253_s19 }
 0x211   : > { %8267 = vmatprep.subr.bf16.mxu1 %v8618_v58  ;;  %v10002_v4 = vcombine.low %v2349_v61, %v9997_v27  ;;  %v10006_v39 = vrot.slane %v9999_v26, 1  ;;  %v8629_v57 = vld [vmem:[#allocation11 + $0x78] sm:$0xff]   ;;  %v10013_v11 = vld [vmem:[#allocation2 + $0x28] sm:$0xff]   ;;  %v2755_v54 = vrot.slane %v9999_v26, 7  ;;  %v8643_v31 = vld [vmem:[#allocation11 + $0x60] sm:$0xff]   ;;  %s11677_s23 = sld [smem:[#allocation97_spill]] }
 0x212   : > { %v8631_v19 = vld [vmem:[#allocation11 + $0x38] sm:$0xff]   ;;  %7755 = vmatprep.subr.bf16.mxu0 %v8629_v57  ;;  %v8633_v16 = vld [vmem:[#allocation11 + $0x70] sm:$0xff]   ;;  %v8637_v32 = vld [vmem:[#allocation11 + $0x68] sm:$0xff]   ;;  %v2757_v46 = vrot.slane %v10013_v11, 7  ;;  %v2434_v12 = vrot.slane %v10013_v11, 1  ;;  %s6858_s18 = sadd.s32 %s8378_s20, %s6853_s30  ;;  %s11678_s4 = sand.u32 1, %s9241_s16  }
 0x213   : > { %v2431_v41 = vrot.slane %v10002_v4, 1  ;;  %7756 = vmatpush3.bf16.msra.mxu0 %v8631_v19  ;;  %v8622_v49 = vld [vmem:[#allocation9 + $0x10] sm:$0xff]   ;;  %v8623_v42 = vld [vmem:[#allocation9 + $0x8] sm:$0xff]   ;;  %v10019_v18 = vld [vmem:[#allocation2 + $0x38] sm:$0xff]   ;;  %v3339_v37 = vshll.u32 %v10002_v4, 16  ;;  %s7377_s19 = sshll.u32 %s6858_s18, 6 }
 0x214   : > { %8268 = vmatpush3.bf16.msra.mxu1 %v8618_v58  ;;  %7757 = vmatprep.subr.bf16.mxu0 %v8633_v16  ;;  %v8635_v14 = vld [vmem:[#allocation11 + $0x30] sm:$0xff]   ;;  %v8640_v60 = vld [vmem:[#allocation11 + $0x28] sm:$0xff]   ;;  %v2758_v25 = vsel %vm681_vm0, %v2755_v54, %v2757_v46  ;;  %v8624_v13 = vld [vmem:[#allocation9] sm:$0xff]   ;;  %v2761_v10 = vrot.slane %v10019_v18, 7  ;;  %v10037_v3 = vsel %vm1357_vm3, %v10006_v39, %v2434_v12  ;;  %v2438_v28 = vrot.slane %v10019_v18, 1  ;;  %s11359_s25 = scalar_lea.sflag [#allocation8], %s11678_s4 }
 0x215   : > { %8269 = vmatprep.subr.bf16.mxu1 %v8619_v52  ;;  %v10010_v34 = vsel %vm1357_vm3, %v2431_v41, %v10006_v39  ;;  %v10016_v51 = vld [vmem:[#allocation2 + $0x30] sm:$0xff]   ;;  %v8645_v30 = vld [vmem:[#allocation11 + $0x20] sm:$0xff]   ;;  %v2829_v33 = vshrl.u32 %v2758_v25, 16  ;;  %v2832_v48 = vshll.u32 %v2758_v25, 16  ;;  %v10033_v36 = vrot.slane %v3339_v37, 1  ;;  %v8636_v61 = vld [vmem:[#allocation11 + $0xe8] sm:$0xff]  }
 0x216   : > { %8281 = vmatprep.mubr.bf16.mxu1 %v10010_v34  ;;  %v8628_v7 = vld [vmem:[#allocation11 + $0xf8] sm:$0xff]   ;;  %v2759_v6 = vrot.slane %v10016_v51, 7  ;;  %v2436_v2 = vrot.slane %v10016_v51, 1  ;;  %v10029_v38 = vld [vmem:[#allocation2 + $0x40] sm:$0xff]   ;;  %v8632_v59 = vld [vmem:[#allocation11 + $0xf0] sm:$0xff]   ;;  %s9157_s29 = scalar_lea.vmem %s11354_s17, 768 }
 0x217   : > { %7758 = vmatpush3.bf16.msra.mxu0 %v8635_v14  ;;  %v8647_v55 = vld [vmem:[#allocation11 + $0x58] sm:$0xff]   ;;  %v10039_v43 = vrot.slane %v2829_v33, 1  ;;  %v10041_v29 = vrot.slane %v2832_v48, 2  ;;  %v8653_v15 = vld [vmem:[#allocation11 + $0x50] sm:$0xff]   ;;  %v2361_v58 = vld [vmem:[#allocation2 + $0x48] sm:$0x1]  ;;  %s11352_s15 = scalar_lea.hbm %s11677_s23, %s7377_s19  ;;  %p9158_p7 = scmp.ne.s32.totalorder %s11354_s17, %s9157_s29 }
 0x218   : > { %8270 = vmatpush3.bf16.msra.mxu1 %v8619_v52  ;;  %7759 = vmatprep.subr.bf16.mxu0 %v8637_v32  ;;  %v8630_v47 = vld [vmem:[#allocation11 + $0xb8] sm:$0xff]   ;;  %v2760_v9 = vsel %vm681_vm0, %v2757_v46, %v2759_v6  ;;  %v10044_v23 = vsel %vm1357_vm3, %v2434_v12, %v2436_v2  ;;  %v2762_v0 = vsel %vm681_vm0, %v2759_v6, %v2761_v10  ;;  %v8634_v40 = vld [vmem:[#allocation11 + $0xb0] sm:$0xff]   ;;  %v10051_v57 = vrot.slane %v10029_v38, 1  ;;  %v8657_v19 = vld [vmem:[#allocation11 + $0x48] sm:$0xff]   ;;  %s9277_s26 = smov [#allocation15]  }
 0x219   : > { %8271 = vmatprep.subr.bf16.mxu1 %v8620_v56  ;;  %v8650_v62 = vld [vmem:[#allocation11 + $0x18] sm:$0xff]   ;;  %v8655_v52 = vld [vmem:[#allocation11 + $0x10] sm:$0xff]   ;;  %v2855_v41 = vshrl.u32 %v2762_v0, 16  ;;  %v8639_v16 = vld [vmem:[#allocation11 + $0xa8] sm:$0xff]   ;;  %v2858_v14 = vshll.u32 %v2762_v0, 16  ;;  %v3344_v32 = vshll.u32 %v9999_v26, 16  ;;  %p9159_p8 = pnand %p9158_p7, %p9410_p3 }
 0x21a   : > { %v8642_v46 = vld [vmem:[#allocation11 + $0xe0] sm:$0xff]   ;;  %v10066_v12 = vsel %vm1357_vm3, %v2438_v28, %v10051_v57  ;;  %v8772_v8 = vld [vmem:[#allocation12 + $0x130] sm:$0xff]   ;;  %s9161_s14 = sshll.u32 %s9277_s26, 4  ;;  %s9162_s14 = int_to_ptr.vmem [resolvable:$false] %s9161_s14 }
 0x21b   : > { %7760 = vmatpush3.bf16.msra.mxu0 %v8640_v60  ;;  %v11436_v60 = vrot.slane %v10029_v38, 7  ;;  %v10068_v37 = vrot.slane %v2855_v41, 1  ;;  %v8663_v48 = vld [vmem:[#allocation11] sm:$0xff]   ;;  %p9160_p9 = pneg %p9159_p8  ;;  %s9163_s13 = scalar_lea.vmem %s9162_s14, 1536 }
 0x21c   : > { %8272 = vmatpush3.bf16.msra.mxu1 %v8620_v56  ;;  %7761 = vmatprep.subr.bf16.mxu0 %v8643_v31  ;;  %v2842_v56 = vshrl.u32 %v2760_v9, 16  ;;  %v10058_v31 = vsel %vm1357_vm3, %v2436_v2, %v2438_v28  ;;  %v2616_v2 = vld [vmem:[#allocation2 + $0x18] sm:$0xf]  ;;  %v2615_v28 = vld [vmem:[#allocation2 + $0x14] sm:$0xf]  ;;  %p9164_p11 = scmp.lt.s32.totalorder %s11354_s17, %s9162_s14  ;;  %p9165_p13 = scmp.lt.s32.totalorder %s9163_s13, %s9157_s29 }
 0x21d   : > { %8273 = vmatprep.subr.bf16.mxu1 %v8621_v35  ;;  %v10082_v0 = vcombine.low %v2615_v28, %v2616_v2  ;;  %v8662_v50 = vld [vmem:[#allocation11 + $0x80] sm:$0xff]  }
 0x21e   : > { %v10060_v25 = vrot.slane %v2842_v56, 1  ;;  %p9166_p4 = por %p9165_p13, %p9164_p11 }
 0x21f   : > { %7762 = vmatpush3.bf16.msra.mxu0 %v8645_v30  ;;  %v8661_v30 = vld [vmem:[#allocation11 + $0x40] sm:$0xff]   ;;  %v2671_v41 = vshll.u32 %v10082_v0, 16 }
 0x220   : > { %8274 = vmatpush3.bf16.msra.mxu1 %v8621_v35  ;;  %7763 = vmatprep.subr.bf16.mxu0 %v8647_v55  ;;  %v2845_v35 = vshll.u32 %v2760_v9, 16  ;;  %v8646_v55 = vld [vmem:[#allocation11 + $0xd8] sm:$0xff]   ;;  %p9167_p10 = pnand %p9166_p4, %p9160_p9 }
 0x221   : > { %8275 = vmatprep.subr.bf16.mxu1 %v8622_v49  ;;  %v2614_v9 = vld [vmem:[#allocation2 + $0x10] sm:$0xf]  ;;  %v2673_v28 = vrot.slane %v2671_v41, 1 }
 0x223   : > { %7764 = vmatpush3.bf16.msra.mxu0 %v8650_v62  ;;  %v7141_v62 = vcombine.low %v2616_v2, %v9997_v27 }
 0x224   : > { %8276 = vmatpush3.bf16.msra.mxu1 %v8622_v49  ;;  %7765 = vmatprep.subr.bf16.mxu0 %v8653_v15  ;;  %v10053_v49 = vcombine.low %v2361_v58, %v2361_v58  ;;  %v2626_v15 = vld [vmem:[#allocation2 + $0xc] sm:$0xe]  ;;  %v10086_v58 = vrot.slane %v3344_v32, 1 }
 0x225   : > { %8277 = vmatprep.subr.bf16.mxu1 %v8623_v42  ;;  %v2754_v56 = vrot.slane %v7141_v62, 7  ;;  %v8652_v32 = vld [vmem:[#allocation11 + $0xd0] sm:$0xff]  }
 0x226   : > { %v2442_v33 = vrot.slane %v10053_v49, 1 }
 0x227   : > { %7766 = vmatpush3.bf16.msra.mxu0 %v8655_v52  ;;  %v8649_v52 = vld [vmem:[#allocation11 + $0x98] sm:$0xff]  }
 0x228   : > { %8278 = vmatpush3.bf16.msra.mxu1 %v8623_v42  ;;  %7767 = vmatprep.subr.bf16.mxu0 %v8657_v19  ;;  %v8659_v42 = vld [vmem:[#allocation11 + $0x8] sm:$0xff]   ;;  %v2675_v19 = vshrl.u32 %v10082_v0, 16 }
 0x229   : > { %8279 = vmatprep.subr.bf16.mxu1 %v8624_v13 }
 0x22b   : > { %7768 = vmatpush3.bf16.msra.mxu0 %v8659_v42  ;;  %v2808_v42 = vshrl.u32 %v2754_v56, 16 }
 0x22c   : > { %8280 = vmatpush3.bf16.msra.mxu1 %v8624_v13  ;;  %v10062_v13 = vrot.slane %v2845_v35, 2  ;;  %7769 = vmatprep.subr.bf16.mxu0 %v8661_v30  ;;  %v2613_v35 = vld [vmem:[#allocation2 + $0xc] sm:$0xf]  ;;  %v2811_v30 = vshll.u32 %v2754_v56, 16 }
 0x22d   : > { %7703 = vmatprep.subr.bf16.mxu1 %v8628_v7  ;;  %v8644_v7 = vld [vmem:[#allocation11 + $0xa0] sm:$0xff]  }
 0x22e   : > { %v2813_v5 = vrot.slane %v2811_v30, 2 }
 0x22f   : > { %8282 = vmatmul.mubr.bf16.vlgmr.msra.gmra.mxu1 %v10037_v3  ;;  %7770 = vmatpush3.bf16.msra.mxu0 %v8663_v48 }
 0x230   : > { %7704 = vmatpush3.bf16.msra.mxu1 %v8630_v47  ;;  %8285 = vmatprep.mubr.bf16.mxu1 %v10044_v23  ;;  %v10073_v47 = vrot.slane %v2858_v14, 2 }
 0x231   : > { %7705 = vmatprep.subr.bf16.mxu1 %v8632_v59  ;;  %v10078_v59 = vsel %vm681_vm0, %v2761_v10, %v11436_v60  ;;  %v10090_v10 = vsel %vm1357_vm3, %v10051_v57, %v2442_v33 }
 0x232   : > { %v2868_v27 = vshrl.u32 %v10078_v59, 16  ;;  %v2871_v14 = vshll.u32 %v10078_v59, 16  ;;  %v10102_v59 = vcombine.low %v2613_v35, %v2614_v9  ;;  %v2803_v35 = vrot.slane %v2675_v19, 1 }
 0x234   : > { %7706 = vmatpush3.bf16.msra.mxu1 %v8634_v40  ;;  %v10084_v40 = vld [vmem:[#allocation2 + $0x1c] sm:$0xff]   ;;  %v10105_v45 = vrot.slane %v2868_v27, 1  ;;  %v10128_v63 = vrot.slane %v2871_v14, 2 }
 0x235   : > { %7707 = vmatprep.subr.bf16.mxu1 %v8636_v61  ;;  %v7139_v61 = vcombine.low %v2626_v15, %v2614_v9  ;;  %v2810_v15 = vrot.slane %v2808_v42, 1  ;;  %v11495_v44 = vshll.u32 %v10084_v40, 16 }
 0x237   : > { %8286 = vmatmul.mubr.bf16.gmra.mxu1 %v10058_v31  ;;  %v2664_v33 = vshrl.u32 %v7139_v61, 16  ;;  %v2666_v62 = vshll.u32 %v7139_v61, 16  ;;  %v2814_v17 = vor.u32 %v2813_v5, %v2810_v15  ;;  %v10125_v15 = vld [vmem:[#allocation2 + $0x2c] sm:$0xff]  }
 0x238   : > { %7708 = vmatpush3.bf16.msra.mxu1 %v8639_v16  ;;  %8289 = vmatprep.mubr.bf16.mxu1 %v10066_v12  ;;  %v11440_v16 = vshll.u32 %v10084_v40, 16 }
 0x239   : > { %7709 = vmatprep.subr.bf16.mxu1 %v8642_v46  ;;  %v2756_v46 = vsel %vm681_vm0, %v2754_v56, %v2755_v54  ;;  %v2668_v22 = vrot.slane %v2666_v62, 1  ;;  %v2677_v56 = vor.u32 %v2675_v19, %v2673_v28  ;;  %v2801_v61 = vrot.slane %v2666_v62, 2 }
 0x23a   : > { %v2816_v48 = vshrl.u32 %v2756_v46, 16  ;;  %v2819_v2 = vshll.u32 %v2756_v46, 16  ;;  %v2681_v60 = vrot.slane %v11440_v16, 1  ;;  %v2800_v46 = vrot.slane %v2664_v33, 1  ;;  %v10112_v16 = vld [vmem:[#allocation2 + $0x24] sm:$0xff]  }
 0x23b   : > { %v2669_v30 = vor.u32 %v2668_v22, %v2664_v33  ;;  %v2683_v22 = vshrl.u32 %v10084_v40, 16  ;;  %v2804_v33 = vrot.slane %v2671_v41, 2  ;;  %v10123_v62 = vor.u32 %v10041_v29, %v10039_v43  ;;  %v8669_v29 = vld [vmem:[#allocation11 + $0x178] sm:$0xff]  }
 0x23c   : > { %7710 = vmatpush3.bf16.msra.mxu1 %v8644_v7  ;;  %v8654_v7 = vld [vmem:[#allocation11 + $0x90] sm:$0xff]   ;;  %v2818_v6 = vrot.slane %v2816_v48, 1  ;;  %v2821_v54 = vrot.slane %v2819_v2, 2  ;;  %v10110_v9 = vsel %vm571_vm1, %v2677_v56, %v2681_v60  ;;  %v8658_v48 = vld [vmem:[#allocation11 + $0x88] sm:$0xff]   ;;  %v2691_v41 = vshrl.u32 %v10112_v16, 16 }
 0x23d   : > { %7711 = vmatprep.subr.bf16.mxu1 %v8646_v55  ;;  %v8656_v55 = vld [vmem:[#allocation11 + $0xc8] sm:$0xff]   ;;  %v3099_v2 = vshll.u32 %v10110_v9, 16  ;;  %v2674_v27 = vsel %vm571_vm1, %v2669_v30, %v2673_v28  ;;  %v2685_v56 = vor.u32 %v2683_v22, %v2681_v60  ;;  %v2687_v30 = vshll.u32 %v10112_v16, 16 }
 0x23e   : > { %v10107_v42 = vor.u32 %v2821_v54, %v2818_v6  ;;  %v3084_v6 = vshrl.u32 %v10102_v59, 16  ;;  %v3094_v19 = vshll.u32 %v2674_v27, 16  ;;  %v8660_v54 = vld [vmem:[#allocation11 + $0xc0] sm:$0xff]   ;;  %v2802_v53 = vor.u32 %v2801_v61, %v2800_v46 }
 0x23f   : > { %8290 = vmatmul.mubr.bf16.gmra.mxu1 %v10090_v10  ;;  %v2805_v21 = vor.u32 %v2804_v33, %v2803_v35  ;;  %v2824_v14 = vrot.slane %v2683_v22, 1 }
 0x240   : > { %7712 = vmatpush3.bf16.msra.mxu1 %v8649_v52  ;;  %v3086_v52 = vshll.u32 %v10102_v59, 16  ;;  %v2823_v5 = vsel %vm728_vm2, %v2814_v17, %v10107_v42 }
 0x241   : > { %7713 = vmatprep.subr.bf16.mxu1 %v8652_v32  ;;  %3034 = vmatprep.mubr.bf16.mxu1 %v2823_v5  ;;  %v3092_v32 = vshrl.u32 %v2674_v27, 16  ;;  %v3101_v5 = vrot.slane %v3099_v2, 1  ;;  %v3103_v27 = vshrl.u32 %v10110_v9, 16  ;;  %v2806_v22 = vsel %vm728_vm2, %v2802_v53, %v2805_v21 }
 0x242   : > { %v3088_v17 = vrot.slane %v3086_v52, 1  ;;  %v2695_v52 = vshll.u32 %v10125_v15, 16  ;;  %v2699_v53 = vshrl.u32 %v10125_v15, 16 }
 0x244   : > { %7714 = vmatpush3.bf16.msra.mxu1 %v8654_v7  ;;  %v3096_v7 = vrot.slane %v3094_v19, 1  ;;  %v3089_v43 = vor.u32 %v3088_v17, %v3084_v6  ;;  %v2825_v19 = vrot.slane %v11495_v44, 2  ;;  %v2697_v61 = vrot.slane %v2695_v52, 1  ;;  %v8678_v6 = vld [vmem:[#allocation11 + $0x1f8] sm:$0xff]  }
 0x245   : > { %7715 = vmatprep.subr.bf16.mxu1 %v8656_v55  ;;  %v2689_v55 = vrot.slane %v2687_v30, 1  ;;  %v8680_v44 = vld [vmem:[#allocation11 + $0x1b8] sm:$0xff]   ;;  %7859 = vmatprep.subr.bf16.mxu0 %v8678_v6  ;;  %v8683_v6 = vld [vmem:[#allocation11 + $0x1b0] sm:$0xff]  }
 0x246   : > { %v3097_v60 = vor.u32 %v3096_v7, %v3092_v32  ;;  %v3090_v2 = vsel %vm571_vm1, %v3089_v43, %v2673_v28  ;;  %v3105_v32 = vor.u32 %v3103_v27, %v3101_v5  ;;  %v10151_v7 = vld [vmem:[#allocation2 + $0x34] sm:$0xff]   ;;  %v11497_v27 = vrot.slane %v10029_v38, 7 }
 0x247   : > { %v10139_v1 = vsel %vm571_vm1, %v2685_v56, %v2689_v55  ;;  %v2693_v46 = vor.u32 %v2691_v41, %v2689_v55  ;;  %v8681_v56 = vld [vmem:[#allocation11 + $0x1f0] sm:$0xff]  }
 0x248   : > { %7716 = vmatpush3.bf16.msra.mxu1 %v8658_v48  ;;  %v3102_v17 = vsel %vm571_vm1, %v3097_v60, %v3101_v5  ;;  %v8670_v48 = vld [vmem:[#allocation11 + $0x138] sm:$0xff]   ;;  %v3107_v35 = vshll.u32 %v10139_v1, 16  ;;  %v3111_v40 = vshrl.u32 %v10139_v1, 16  ;;  %v11496_v5 = vrot.slane %v10053_v49, 7  ;;  %v8671_v55 = vld [vmem:[#allocation11 + $0x170] sm:$0xff]  }
 0x249   : > { %7717 = vmatprep.subr.bf16.mxu1 %v8660_v54  ;;  %3283 = vmatprep.mubr.bf16.mxu0 %v3102_v17  ;;  %v10147_v28 = vsel %vm571_vm1, %v2693_v46, %v2697_v61  ;;  %v2703_v49 = vshll.u32 %v10151_v7, 16  ;;  %v8673_v17 = vld [vmem:[#allocation11 + $0x130] sm:$0xff]  }
 0x24a   : > { %3284 = vmatmul.mubr.bf16.vlgmr.msra.gmra.mxu0 %v3090_v2  ;;  %v3109_v33 = vrot.slane %v3107_v35, 1  ;;  %v3115_v54 = vshll.u32 %v10147_v28, 16  ;;  %v10158_v43 = vsel %vm681_vm0, %v11497_v27, %v11496_v5 }
 0x24b   : > { %7860 = vmatpush3.bf16.msra.mxu0 %v8680_v44  ;;  %v2886_v35 = vshrl.u32 %v10158_v43, 16  ;;  %v8674_v44 = vld [vmem:[#allocation11 + $0x168] sm:$0xff]   ;;  %v2705_v5 = vrot.slane %v2703_v49, 1 }
 0x24c   : > { %7718 = vmatpush3.bf16.msra.mxu1 %v8662_v50  ;;  %v2836_v50 = vsel %vm728_vm2, %v10107_v42, %v10123_v62  ;;  %v3110_v60 = vsel %vm571_vm1, %v3105_v32, %v3109_v33  ;;  %v3113_v2 = vor.u32 %v3111_v40, %v3109_v33  ;;  %v3117_v46 = vrot.slane %v3115_v54, 1  ;;  %7861 = vmatprep.subr.bf16.mxu0 %v8681_v56  ;;  %v8686_v33 = vld [vmem:[#allocation11 + $0x1e8] sm:$0xff]  }
 0x24d   : > { %7807 = vmatprep.subr.bf16.mxu1 %v8669_v29  ;;  %3291 = vmatprep.mubr.bf16.mxu0 %v3110_v60  ;;  %v2701_v29 = vor.u32 %v2699_v53, %v2697_v61  ;;  %v2826_v42 = vor.u32 %v2825_v19, %v2824_v14  ;;  %v2848_v32 = vor.u32 %v10062_v13, %v10060_v25  ;;  %v2837_v40 = vrot.slane %v2691_v41, 1  ;;  %v8687_v14 = vld [vmem:[#allocation11 + $0x1a8] sm:$0xff]   ;;  %v8689_v41 = vld [vmem:[#allocation11 + $0x1e0] sm:$0xff]  }
 0x24e   : > { %v3118_v54 = vsel %vm571_vm1, %v3113_v2, %v3117_v46  ;;  %v2707_v56 = vshrl.u32 %v10151_v7, 16  ;;  %v2838_v13 = vrot.slane %v2687_v30, 2  ;;  %v8679_v60 = vld [vmem:[#allocation11 + $0x120] sm:$0xff]  }
 0x24f   : > { %3035 = vmatmul.mubr.bf16.vlgmr.msra.gmra.mxu1 %v2806_v22  ;;  %7862 = vmatpush3.bf16.msra.mxu0 %v8683_v6  ;;  %v8675_v22 = vld [vmem:[#allocation11 + $0x128] sm:$0xff]   ;;  %v10173_v61 = vsel %vm571_vm1, %v2701_v29, %v2705_v5  ;;  %v2827_v25 = vsel %vm728_vm2, %v2805_v21, %v2826_v42  ;;  %v2849_v27 = vsel %vm728_vm2, %v10123_v62, %v2848_v32  ;;  %v8684_v21 = vld [vmem:[#allocation11 + $0x158] sm:$0xff]   ;;  %v8692_v30 = vld [vmem:[#allocation11 + $0x1a0] sm:$0xff]  }
 0x250   : > { %7808 = vmatpush3.bf16.msra.mxu1 %v8670_v48  ;;  %3042 = vmatprep.mubr.bf16.mxu1 %v2836_v50  ;;  %v3119_v48 = vshrl.u32 %v10147_v28, 16  ;;  %v3123_v19 = vshll.u32 %v10173_v61, 16  ;;  %v10184_v50 = vld [vmem:[#allocation2 + $0x3c] ss:$0 sps:$4 sm:$0x11]   ;;  %v2839_v29 = vor.u32 %v2838_v13, %v2837_v40  ;;  %v8693_v62 = vld [vmem:[#allocation11 + $0x1d8] sm:$0xff]  }
 0x251   : > { %7809 = vmatprep.subr.bf16.mxu1 %v8671_v55  ;;  %7863 = vmatprep.subr.bf16.mxu0 %v8686_v33  ;;  %v8677_v55 = vld [vmem:[#allocation11 + $0x160] sm:$0xff]   ;;  %v2861_v33 = vor.u32 %v10073_v47, %v10068_v37  ;;  %v8697_v47 = vld [vmem:[#allocation11 + $0x1d0] sm:$0xff]   ;;  %v2863_v13 = vrot.slane %v2707_v56, 1 }
 0x252   : > { %3292 = vmatmul.mubr.bf16.gmra.mxu0 %v10110_v9  ;;  %v3121_v2 = vor.u32 %v3119_v48, %v3117_v46  ;;  %v3125_v6 = vrot.slane %v3123_v19, 1  ;;  %v2709_v9 = vor.u32 %v2707_v56, %v2705_v5  ;;  %v2851_v46 = vrot.slane %v2695_v52, 2  ;;  %v8685_v19 = vld [vmem:[#allocation11 + $0x118] sm:$0xff]  }
 0x253   : > { %3299 = vmatprep.mubr.bf16.mxu0 %v3118_v54  ;;  %7864 = vmatpush3.bf16.msra.mxu0 %v8687_v14  ;;  %v3127_v5 = vshrl.u32 %v10173_v61, 16  ;;  %v8694_v14 = vld [vmem:[#allocation11 + $0x198] sm:$0xff]   ;;  %v2840_v40 = vsel %vm728_vm2, %v2826_v42, %v2839_v29  ;;  %v2862_v52 = vsel %vm728_vm2, %v2848_v32, %v2861_v33  ;;  %v8691_v42 = vld [vmem:[#allocation11 + $0x110] sm:$0xff]   ;;  %v8699_v32 = vld [vmem:[#allocation2 + $0x3c] ss:$0 sps:$4 sm:$0x33]   ;;  %v10208_v56 = vor.u32 %v10128_v63, %v10105_v45 }
 0x254   : > { %7810 = vmatpush3.bf16.msra.mxu1 %v8673_v17  ;;  %7865 = vmatprep.subr.bf16.mxu0 %v8689_v41  ;;  %v2711_v17 = vshll.u32 %v10184_v50, 16  ;;  %v3126_v48 = vsel %vm571_vm1, %v3121_v2, %v3125_v6  ;;  %v2864_v41 = vrot.slane %v2703_v49, 2  ;;  %v8695_v49 = vld [vmem:[#allocation11 + $0x148] sm:$0xff]   ;;  %v8704_v45 = vld [vmem:[#allocation11 + $0x1c0] sm:$0xff]  }
 0x255   : > { %7811 = vmatprep.subr.bf16.mxu1 %v8674_v44  ;;  %v2850_v44 = vrot.slane %v2699_v53, 1  ;;  %v2715_v53 = vshrl.u32 %v10184_v50, 16  ;;  %v8703_v63 = vld [vmem:[#allocation11 + $0x188] sm:$0xff]  }
 0x256   : > { %v2713_v54 = vrot.slane %v2711_v17, 1  ;;  %v8701_v17 = vld [vmem:[#allocation11 + $0x1c8] sm:$0xff]  }
 0x257   : > { %3043 = vmatmul.mubr.bf16.gmra.mxu1 %v2827_v25  ;;  %7866 = vmatpush3.bf16.msra.mxu0 %v8692_v30  ;;  %v8688_v25 = vld [vmem:[#allocation11 + $0x150] sm:$0xff]  }
 0x258   : > { %7812 = vmatpush3.bf16.msra.mxu1 %v8675_v22  ;;  %3050 = vmatprep.mubr.bf16.mxu1 %v2849_v27  ;;  %v10194_v22 = vsel %vm571_vm1, %v2709_v9, %v2713_v54  ;;  %v2889_v27 = vshll.u32 %v10158_v43, 16  ;;  %v3139_v9 = vshll.u32 %v2715_v53, 16  ;;  %v11498_v43 = vshrl.u32 %v10002_v4, 16 }
 0x259   : > { %7813 = vmatprep.subr.bf16.mxu1 %v8677_v55  ;;  %7867 = vmatprep.subr.bf16.mxu0 %v8693_v62  ;;  %v3131_v37 = vshll.u32 %v10194_v22, 16  ;;  %v3129_v55 = vor.u32 %v3127_v5, %v3125_v6  ;;  %v10212_v6 = vrot.slane %v2886_v35, 1  ;;  %v2877_v5 = vshrl.u32 %v8699_v32, 16 }
 0x25a   : > { %3300 = vmatmul.mubr.bf16.gmra.mxu0 %v10139_v1  ;;  %v8698_v1 = vld [vmem:[#allocation11 + $0x190] sm:$0xff]   ;;  %v3141_v54 = vrot.slane %v3139_v9, 1  ;;  %v3342_v35 = vor.u32 %v10033_v36, %v11498_v43  ;;  %v3352_v53 = vshll.u32 %v10013_v11, 16 }
 0x25b   : > { %3307 = vmatprep.mubr.bf16.mxu0 %v3126_v48  ;;  %v3133_v2 = vrot.slane %v3131_v37, 1  ;;  %7868 = vmatpush3.bf16.msra.mxu0 %v8694_v14  ;;  %v8700_v48 = vld [vmem:[#allocation11 + $0x140] sm:$0xff]   ;;  %v2880_v14 = vshll.u32 %v8699_v32, 16 }
 0x25c   : > { %7814 = vmatpush3.bf16.msra.mxu1 %v8679_v60  ;;  %v10204_v60 = vor.u32 %v2851_v46, %v2850_v44  ;;  %7869 = vmatprep.subr.bf16.mxu0 %v8697_v47  ;;  %v8696_v44 = vld [vmem:[#allocation11 + $0x108] sm:$0xff]   ;;  %v2891_v46 = vrot.slane %v2889_v27, 2  ;;  %v8702_v37 = vld [vmem:[#allocation11 + $0x100] sm:$0xff]   ;;  %v3354_v36 = vrot.slane %v3352_v53, 1  ;;  %v10231_v27 = vld [vmem:[#allocation2 + $0x2c] sm:$0xff]  }
 0x25d   : > { %7815 = vmatprep.subr.bf16.mxu1 %v8684_v21  ;;  %v3135_v21 = vshrl.u32 %v10194_v22, 16  ;;  %v3134_v30 = vsel %vm571_vm1, %v3129_v55, %v3133_v2  ;;  %v8705_v47 = vld [vmem:[#allocation11 + $0x180] sm:$0xff]   ;;  %v2882_v32 = vrot.slane %v2880_v14, 2 }
 0x25e   : > { %v2853_v62 = vsel %vm728_vm2, %v2839_v29, %v10204_v60  ;;  %v2875_v29 = vsel %vm728_vm2, %v2861_v33, %v10208_v56  ;;  %v3645_v33 = vld [vmem:[#allocation2 + $0x24] sm:$0xe]  ;;  %v2892_v55 = vor.u32 %v2891_v46, %v10212_v6 }
 0x25f   : > { %3051 = vmatmul.mubr.bf16.gmra.mxu1 %v2840_v40  ;;  %7870 = vmatpush3.bf16.msra.mxu0 %v8698_v1  ;;  %v3137_v40 = vor.u32 %v3135_v21, %v3133_v2  ;;  %v10235_v1 = vld [vmem:[#allocation2 + $0x34] sm:$0xff]  }
 0x260   : > { %3058 = vmatprep.mubr.bf16.mxu1 %v2862_v52  ;;  %7816 = vmatpush3.bf16.msra.mxu1 %v8685_v19  ;;  %v3348_v19 = vshrl.u32 %v9999_v26, 16  ;;  %v8706_v52 = vld [vmem:[#allocation11 + $0x278] sm:$0xff]   ;;  %v2865_v26 = vor.u32 %v2864_v41, %v2863_v13  ;;  %v3694_v41 = vshrl.u32 %v10231_v27, 16 }
 0x261   : > { %7817 = vmatprep.subr.bf16.mxu1 %v8688_v25  ;;  %7871 = vmatprep.subr.bf16.mxu0 %v8701_v17  ;;  %v10229_v25 = vsel %vm571_vm1, %v3342_v35, %v10086_v58  ;;  %v3142_v2 = vsel %vm571_vm1, %v3137_v40, %v3141_v54  ;;  %v3698_v17 = vshll.u32 %v10235_v1, 16  ;;  %v3360_v54 = vshll.u32 %v10016_v51, 16  ;;  %v10264_v35 = vld [vmem:[#allocation2 + $0x3c] sm:$0xff]  }
 0x262   : > { %3308 = vmatmul.mubr.bf16.gmra.mxu0 %v10147_v28  ;;  %v3350_v4 = vor.u32 %v3348_v19, %v10086_v58  ;;  %v3633_v28 = vld [vmem:[#allocation2 + $0x28] sm:$0xf]  ;;  %v11449_v58 = vshll.u32 %v10231_v27, 16  ;;  %v3702_v19 = vshrl.u32 %v10235_v1, 16 }
 0x263   : > { %3315 = vmatprep.mubr.bf16.mxu0 %v3134_v30  ;;  %7872 = vmatpush3.bf16.msra.mxu0 %v8703_v63  ;;  %v10237_v9 = vcombine.low %v3645_v33, %v3633_v28  ;;  %v3356_v30 = vshrl.u32 %v10013_v11, 16  ;;  %v3362_v14 = vrot.slane %v3360_v54, 1  ;;  %v3368_v54 = vshll.u32 %v10019_v18, 16 }
 0x264   : > { %7818 = vmatpush3.bf16.msra.mxu1 %v8691_v42  ;;  %7873 = vmatprep.subr.bf16.mxu0 %v8704_v45  ;;  %v2879_v42 = vrot.slane %v2877_v5, 1  ;;  %v10240_v13 = vsel %vm571_vm1, %v3350_v4, %v3354_v36 }
 0x265   : > { %7819 = vmatprep.subr.bf16.mxu1 %v8695_v49  ;;  %v3632_v49 = vld [vmem:[#allocation2 + $0x24] sm:$0xf]  ;;  %v3683_v6 = vshrl.u32 %v10237_v9, 16  ;;  %v3685_v21 = vshll.u32 %v10237_v9, 16  ;;  %v3425_v63 = vrot.slane %v10240_v13, 1  ;;  %v3358_v5 = vor.u32 %v3356_v30, %v3354_v36 }
 0x266   : > { %v7191_v46 = vcombine.low %v3632_v49, %v3633_v28  ;;  %v2883_v53 = vor.u32 %v2882_v32, %v2879_v42  ;;  %v3364_v49 = vshrl.u32 %v10016_v51, 16  ;;  %v11499_v9 = vshll.u32 %v10231_v27, 16 }
 0x267   : > { %3059 = vmatmul.mubr.bf16.gmra.mxu1 %v2853_v62  ;;  %7874 = vmatpush3.bf16.msra.mxu0 %v8705_v47  ;;  %v3692_v62 = vrot.slane %v11449_v58, 1  ;;  %v3687_v11 = vrot.slane %v3685_v21, 1  ;;  %v10282_v42 = vsel %vm571_vm1, %v3358_v5, %v3362_v14  ;;  %v3370_v5 = vrot.slane %v3368_v54, 1 }
 0x268   : > { %3066 = vmatprep.mubr.bf16.mxu1 %v2875_v29  ;;  %7820 = vmatpush3.bf16.msra.mxu1 %v8696_v44  ;;  %v2866_v44 = vsel %vm728_vm2, %v10204_v60, %v2865_v26  ;;  %v3700_v60 = vrot.slane %v3698_v17, 1  ;;  %v3772_v43 = vshll.u32 %v7191_v46, 16  ;;  %v3770_v40 = vshrl.u32 %v7191_v46, 16 }
 0x269   : > { %7821 = vmatprep.subr.bf16.mxu1 %v8700_v48  ;;  %v2893_v48 = vsel %vm728_vm2, %v10208_v56, %v2892_v55  ;;  %v3696_v45 = vor.u32 %v3694_v41, %v3692_v62  ;;  %v3688_v56 = vor.u32 %v3687_v11, %v3683_v6  ;;  %v10279_v55 = vld [vmem:[#allocation2 + $0x44] sm:$0xff]   ;;  %v2884_v30 = vsel %vm728_vm2, %v2865_v26, %v2883_v53 }
 0x26a   : > { %3316 = vmatmul.mubr.bf16.gmra.mxu0 %v10173_v61  ;;  %v3424_v61 = vrot.slane %v10229_v25, 1  ;;  %v3774_v28 = vrot.slane %v3772_v43, 1  ;;  %v3427_v26 = vrot.slane %v10282_v42, 1  ;;  %v3380_v54 = vshrl.u32 %v10029_v38, 16 }
 0x26b   : > { %3323 = vmatprep.mubr.bf16.mxu0 %v3142_v2  ;;  %v10270_v29 = vsel %vm571_vm1, %v3696_v45, %v3700_v60  ;;  %v3693_v4 = vsel %vm571_vm1, %v3688_v56, %v3692_v62  ;;  %v3710_v45 = vshrl.u32 %v10264_v35, 16 }
 0x26c   : > { %7822 = vmatpush3.bf16.msra.mxu1 %v8702_v37  ;;  %v3706_v37 = vshll.u32 %v10264_v35, 16  ;;  %v3785_v47 = vshll.u32 %v10270_v29, 16  ;;  %v3778_v36 = vshrl.u32 %v3693_v4, 16  ;;  %v3780_v25 = vshll.u32 %v3693_v4, 16 }
 0x26d   : > { %7911 = vmatprep.subr.bf16.mxu1 %v8706_v52  ;;  %v3704_v52 = vor.u32 %v3702_v19, %v3700_v60  ;;  %v3789_v32 = vshrl.u32 %v10270_v29, 16  ;;  %v3775_v11 = vor.u32 %v3774_v28, %v3770_v40 }
 0x26e   : > { %v3708_v33 = vrot.slane %v3706_v37, 1  ;;  %v3787_v2 = vrot.slane %v3785_v47, 1  ;;  %v3366_v47 = vor.u32 %v3364_v49, %v3362_v14  ;;  %v8710_v49 = vld [vmem:[#allocation11 + $0x238] sm:$0xff]  }
 0x26f   : > { %3067 = vmatmul.mubr.bf16.gmra.mxu1 %v2866_v44  ;;  %v3782_v44 = vrot.slane %v3780_v25, 1  ;;  %v3372_v25 = vshrl.u32 %v10019_v18, 16 }
 0x270   : > { %3074 = vmatprep.mubr.bf16.mxu1 %v2893_v48  ;;  %v10289_v46 = vsel %vm571_vm1, %v3704_v52, %v3708_v33  ;;  %v3426_v48 = vsel %vm1357_vm3, %v3424_v61, %v3425_v63  ;;  %v3791_v43 = vor.u32 %v3789_v32, %v3787_v2  ;;  %v3712_v53 = vor.u32 %v3710_v45, %v3708_v33  ;;  %v10302_v61 = vld [vmem:[#allocation2 + $0x4c] sm:$0xff]  }
 0x271   : > { %v3793_v60 = vshll.u32 %v10289_v46, 16  ;;  %v3783_v51 = vor.u32 %v3782_v44, %v3778_v36  ;;  %v3797_v4 = vshrl.u32 %v10289_v46, 16  ;;  %v3718_v52 = vshrl.u32 %v10279_v55, 16 }
 0x272   : > { %3324 = vmatmul.mubr.bf16.gmra.mxu0 %v10194_v22  ;;  %v11448_v22 = vshll.u32 %v10279_v55, 16  ;;  %v3776_v36 = vsel %vm571_vm1, %v3775_v11, %v3692_v62  ;;  %v3376_v33 = vshll.u32 %v10029_v38, 16  ;;  %v10321_v18 = vsel %vm571_vm1, %v3366_v47, %v3370_v5  ;;  %v8712_v11 = vld [vmem:[#allocation11 + $0x270] sm:$0xff]  }
 0x273   : > { %v3795_v56 = vrot.slane %v3793_v60, 1  ;;  %v3788_v40 = vsel %vm571_vm1, %v3783_v51, %v3787_v2  ;;  %v11447_v2 = vshll.u32 %v10302_v61, 16  ;;  %v3428_v60 = vsel %vm1357_vm3, %v3425_v63, %v3427_v26  ;;  %v8715_v63 = vld [vmem:[#allocation11 + $0x268] sm:$0xff]  }
 0x274   : > { %v3716_v28 = vrot.slane %v11448_v22, 1  ;;  %3969 = vmatprep.mubr.bf16.mxu0 %v3788_v40  ;;  %v3429_v22 = vrot.slane %v10321_v18, 1 }
 0x275   : > { %v3796_v32 = vsel %vm571_vm1, %v3791_v43, %v3795_v56  ;;  %v3724_v62 = vrot.slane %v11447_v2, 1  ;;  %v3799_v51 = vor.u32 %v3797_v4, %v3795_v56  ;;  %v3374_v43 = vor.u32 %v3372_v25, %v3370_v5  ;;  %v8713_v2 = vld [vmem:[#allocation11 + $0x230] sm:$0xff]  }
 0x276   : > { %v3720_v14 = vor.u32 %v3718_v52, %v3716_v28 }
 0x277   : > { %3075 = vmatmul.mubr.bf16.gmra.mxu1 %v2884_v30  ;;  %v10313_v30 = vsel %vm571_vm1, %v3712_v53, %v3716_v28  ;;  %v3378_v53 = vrot.slane %v3376_v33, 1  ;;  %v8726_v28 = vld [vmem:[#allocation2 + $0x54] ss:$0 sps:$4 sm:$0x11]  }
 0x278   : > { %3571 = vmatprep.mubr.bf16.mxu1 %v3426_v48  ;;  %v3801_v44 = vshll.u32 %v10313_v30, 16  ;;  %v8724_v48 = vld [vmem:[#allocation2 + $0x48] ss:$0 sps:$4 sm:$0x33]   ;;  %v10331_v40 = vsel %vm571_vm1, %v3720_v14, %v3724_v62  ;;  %v3805_v56 = vshrl.u32 %v10313_v30, 16  ;;  %v3730_v25 = vshll.u32 %v8726_v28, 16 }
 0x279   : > { %v3384_v47 = vshll.u32 %v8724_v48, 16  ;;  %v3382_v13 = vor.u32 %v3380_v54, %v3378_v53  ;;  %v3809_v33 = vshll.u32 %v10331_v40, 16  ;;  %v3734_v14 = vshrl.u32 %v8726_v28, 16  ;;  %v8719_v28 = vld [vmem:[#allocation11 + $0x220] sm:$0xff]  }
 0x27a   : > { %3970 = vmatmul.mubr.bf16.vlgmr.msra.gmra.mxu0 %v3776_v36  ;;  %v3803_v38 = vrot.slane %v3801_v44, 1  ;;  %v3726_v36 = vshrl.u32 %v10302_v61, 16  ;;  %v4034_v44 = vrot.slane %v10102_v59, 7  ;;  %v3732_v54 = vrot.slane %v3730_v25, 1 }
 0x27b   : > { %3977 = vmatprep.mubr.bf16.mxu0 %v3796_v32  ;;  %v3386_v5 = vrot.slane %v3384_v47, 1  ;;  %v3388_v32 = vshrl.u32 %v8724_v48, 16  ;;  %v8716_v48 = vld [vmem:[#allocation11 + $0x228] sm:$0xff]   ;;  %v10355_v59 = vshll.u32 %v3734_v14, 16 }
 0x27c   : > { %v3728_v4 = vor.u32 %v3726_v36, %v3724_v62  ;;  %v3804_v58 = vsel %vm571_vm1, %v3799_v51, %v3803_v38  ;;  %v4091_v25 = vshll.u32 %v4034_v44, 16 }
 0x27d   : > { %v10347_v47 = vsel %vm571_vm1, %v3382_v13, %v3386_v5  ;;  %v10349_v62 = vor.u32 %v3388_v32, %v3386_v5  ;;  %v3807_v13 = vor.u32 %v3805_v56, %v3803_v38  ;;  %v3811_v5 = vrot.slane %v3809_v33, 1  ;;  %v8965_v32 = vld [vmem:[#allocation2 + $0x1c] sm:$0xff]  }
 0x27f   : > { %3572 = vmatmul.mubr.bf16.vlgmr.msra.gmra.mxu1 %v10010_v34  ;;  %v3812_v42 = vsel %vm571_vm1, %v3807_v13, %v3811_v5  ;;  %v4117_v13 = vrot.slane %v3710_v45, 1  ;;  %v4041_v45 = vrot.slane %v10125_v15, 7 }
 0x280   : > { %7912 = vmatpush3.bf16.msra.mxu1 %v8710_v49  ;;  %3579 = vmatprep.mubr.bf16.mxu1 %v3428_v60  ;;  %v10343_v49 = vsel %vm571_vm1, %v3374_v43, %v3378_v53  ;;  %v4035_v60 = vrot.slane %v10082_v0, 7  ;;  %v4088_v43 = vshrl.u32 %v4034_v44, 16  ;;  %v3430_v0 = vsel %vm1357_vm3, %v3427_v26, %v3429_v22 }
 0x281   : > { %7913 = vmatprep.subr.bf16.mxu1 %v8712_v11  ;;  %v10353_v11 = vsel %vm571_vm1, %v3728_v4, %v3732_v54  ;;  %v3813_v4 = vshrl.u32 %v10331_v40, 16  ;;  %v10379_v54 = vrot.slane %v3683_v6, 1 }
 0x282   : > { %3978 = vmatmul.mubr.bf16.gmra.mxu0 %v10270_v29  ;;  %v4036_v51 = vsel %vm681_vm0, %v4034_v44, %v4035_v60  ;;  %v3431_v29 = vrot.slane %v10343_v49, 1  ;;  %v3817_v53 = vshll.u32 %v10353_v11, 16  ;;  %v10373_v56 = vrot.slane %v4088_v43, 1  ;;  %v8723_v43 = vld [vmem:[#allocation11 + $0x250] sm:$0xff]  }
 0x283   : > { %3985 = vmatprep.mubr.bf16.mxu0 %v3804_v58  ;;  %v4096_v26 = vshrl.u32 %v4036_v51, 16  ;;  %v4099_v33 = vshll.u32 %v4036_v51, 16  ;;  %v10375_v44 = vrot.slane %v4091_v25, 2  ;;  %v8722_v58 = vld [vmem:[#allocation11 + $0x218] sm:$0xff]   ;;  %v4105_v51 = vrot.slane %v3698_v17, 2 }
 0x284   : > { %7914 = vmatpush3.bf16.msra.mxu1 %v8713_v2  ;;  %v8718_v2 = vld [vmem:[#allocation11 + $0x260] sm:$0xff]   ;;  %v10370_v14 = vrot.slane %v3817_v53, 1  ;;  %v3815_v53 = vor.u32 %v3813_v4, %v3811_v5  ;;  %v3432_v1 = vsel %vm1357_vm3, %v3429_v22, %v3431_v29  ;;  %v10411_v22 = vrot.slane %v3685_v21, 2 }
 0x285   : > { %7915 = vmatprep.subr.bf16.mxu1 %v8715_v63  ;;  %v8720_v63 = vld [vmem:[#allocation11 + $0x258] sm:$0xff]   ;;  %v10384_v38 = vrot.slane %v4096_v26, 1  ;;  %v10407_v18 = vrot.slane %v4099_v33, 2  ;;  %v10415_v4 = vrot.slane %v3694_v41, 1  ;;  %v4084_v21 = vrot.slane %v11499_v9, 2 }
 0x286   : > { %v3820_v35 = vsel %vm571_vm1, %v3815_v53, %v10370_v14  ;;  %v11503_v49 = vshrl.u32 %v10353_v11, 16 }
 0x287   : > { %3580 = vmatmul.mubr.bf16.gmra.mxu1 %v10037_v3 }
 0x288   : > { %7916 = vmatpush3.bf16.msra.mxu1 %v8716_v48  ;;  %3587 = vmatprep.mubr.bf16.mxu1 %v3430_v0  ;;  %v4037_v48 = vrot.slane %v8965_v32, 7  ;;  %v4104_v0 = vrot.slane %v3702_v19, 1  ;;  %v4118_v19 = vrot.slane %v3706_v37, 2  ;;  %v8727_v37 = vld [vmem:[#allocation11 + $0x248] sm:$0xff]   ;;  %v4130_v32 = vrot.slane %v3718_v52, 1 }
 0x289   : > { %7917 = vmatprep.subr.bf16.mxu1 %v8718_v2  ;;  %v4039_v2 = vrot.slane %v10112_v16, 7  ;;  %v11501_v52 = vrot.slane %v10347_v47, 1 }
 0x28a   : > { %3986 = vmatmul.mubr.bf16.gmra.mxu0 %v10289_v46  ;;  %v4038_v6 = vsel %vm681_vm0, %v4035_v60, %v4037_v48  ;;  %v10400_v60 = vor.u32 %v4105_v51, %v4104_v0  ;;  %v4119_v5 = vor.u32 %v4118_v19, %v4117_v13  ;;  %v11500_v0 = vshll.u32 %v10279_v55, 16 }
 0x28b   : > { %3993 = vmatprep.mubr.bf16.mxu0 %v3812_v42  ;;  %v4109_v17 = vshrl.u32 %v4038_v6, 16  ;;  %v4112_v46 = vshll.u32 %v4038_v6, 16  ;;  %v4040_v16 = vsel %vm681_vm0, %v4037_v48, %v4039_v2  ;;  %v8731_v42 = vld [vmem:[#allocation2 + $0x54] ss:$0 sps:$4 sm:$0x33]   ;;  %v8728_v48 = vld [vmem:[#allocation11 + $0x208] sm:$0xff]   ;;  %v3434_v27 = vsel %vm1357_vm3, %v3431_v29, %v11501_v52 }
 0x28c   : > { %7918 = vmatpush3.bf16.msra.mxu1 %v8719_v28  ;;  %v8725_v28 = vld [vmem:[#allocation11 + $0x210] sm:$0xff]   ;;  %v4122_v25 = vshrl.u32 %v4040_v16, 16  ;;  %v10419_v15 = vsel %vm728_vm2, %v10400_v60, %v4119_v5  ;;  %v4125_v33 = vshll.u32 %v4040_v16, 16  ;;  %v4131_v53 = vrot.slane %v11500_v0, 2 }
 0x28d   : > { %7919 = vmatprep.subr.bf16.mxu1 %v8720_v63  ;;  %v4042_v63 = vsel %vm681_vm0, %v4039_v2, %v4041_v45  ;;  %v4111_v26 = vrot.slane %v4109_v17, 1  ;;  %v4114_v41 = vrot.slane %v4112_v46, 2  ;;  %v4043_v51 = vrot.slane %v10151_v7, 7 }
 0x28e   : > { %v4143_v6 = vrot.slane %v3726_v36, 1  ;;  %v4138_v2 = vshll.u32 %v4042_v63, 16  ;;  %v11502_v13 = vshll.u32 %v10302_v61, 16  ;;  %v4124_v55 = vrot.slane %v4122_v25, 1 }
 0x28f   : > { %3588 = vmatmul.mubr.bf16.gmra.mxu1 %v10044_v23  ;;  %v4044_v7 = vsel %vm681_vm0, %v4041_v45, %v4043_v51  ;;  %v4045_v36 = vrot.slane %v10184_v50, 7  ;;  %v3823_v29 = vor.u32 %v11503_v49, %v10370_v14  ;;  %v4127_v61 = vrot.slane %v4125_v33, 2  ;;  %v8730_v45 = vld [vmem:[#allocation11 + $0x200] sm:$0xff]  }
 0x290   : > { %3595 = vmatprep.mubr.bf16.mxu1 %v3432_v1  ;;  %7920 = vmatpush3.bf16.msra.mxu1 %v8722_v58  ;;  %v4135_v58 = vshrl.u32 %v4042_v63, 16  ;;  %v4144_v19 = vrot.slane %v11502_v13, 2  ;;  %v4132_v1 = vor.u32 %v4131_v53, %v4130_v32  ;;  %v4148_v17 = vshrl.u32 %v4044_v7, 16  ;;  %v8732_v13 = vld [vmem:[#allocation14 + $0x78] sm:$0xff]   ;;  %v8736_v49 = vld [vmem:[#allocation14 + $0x60] sm:$0xff]  }
 0x291   : > { %7921 = vmatprep.subr.bf16.mxu1 %v8723_v43  ;;  %v8729_v43 = vld [vmem:[#allocation11 + $0x240] sm:$0xff]   ;;  %v4151_v46 = vshll.u32 %v4044_v7, 16  ;;  %v4140_v50 = vrot.slane %v4138_v2, 2  ;;  %v4160_v0 = vshll.u32 %v8731_v42, 16  ;;  %v11504_v53 = vrot.slane %v10355_v59, 1  ;;  %8293 = vmatprep.subr.bf16.mxu0 %v8732_v13 }
 0x292   : > { %3994 = vmatmul.mubr.bf16.gmra.mxu0 %v10313_v30  ;;  %v4145_v16 = vor.u32 %v4144_v19, %v4143_v6  ;;  %v4133_v63 = vsel %vm728_vm2, %v4119_v5, %v4132_v1  ;;  %v4046_v30 = vsel %vm681_vm0, %v4043_v51, %v4045_v36  ;;  %v4137_v25 = vrot.slane %v4135_v58, 1  ;;  %v8733_v19 = vld [vmem:[#allocation14 + $0x70] sm:$0xff]  }
 0x293   : > { %4001 = vmatprep.mubr.bf16.mxu0 %v3820_v35  ;;  %v4150_v14 = vrot.slane %v4148_v17, 1  ;;  %v4153_v32 = vrot.slane %v4151_v46, 2  ;;  %v4169_v9 = vshll.u32 %v4046_v30, 16  ;;  %v3828_v51 = vsel %vm571_vm1, %v3823_v29, %v11504_v53  ;;  %8294 = vmatpush3.bf16.msra.mxu0 %v8732_v13 }
 0x294   : > { %7922 = vmatpush3.bf16.msra.mxu1 %v8725_v28  ;;  %v4157_v28 = vshrl.u32 %v8731_v42, 16  ;;  %v4146_v35 = vsel %vm728_vm2, %v4132_v1, %v4145_v16  ;;  %v4162_v52 = vrot.slane %v4160_v0, 2  ;;  %v11505_v58 = vrot.slane %v10349_v62, 1  ;;  %8295 = vmatprep.subr.bf16.mxu0 %v8733_v19  ;;  %v7116_v1 = vld [vmem:[%s11415_s5] ss:$0 sm:$0xff]  ;;  %v8738_v0 = vld [vmem:[#allocation12 + $0xf0] sm:$0xff]  }
 0x295   : > { %7923 = vmatprep.subr.bf16.mxu1 %v8727_v37  ;;  %v4166_v37 = vshrl.u32 %v4046_v30, 16  ;;  %v4171_v6 = vrot.slane %v4169_v9, 2  ;;  %v4094_v59 = vor.u32 %v10375_v44, %v10373_v56  ;;  %v4102_v42 = vor.u32 %v10407_v18, %v10384_v38 }
 0x296   : > { %v4159_v5 = vrot.slane %v4157_v28, 1  ;;  %v4085_v62 = vor.u32 %v4084_v21, %v10415_v4  ;;  %v4128_v38 = vor.u32 %v4127_v61, %v4124_v55  ;;  %v4141_v18 = vor.u32 %v4140_v50, %v4137_v25  ;;  %v8735_v25 = vld [vmem:[#allocation12 + $0xf8] sm:$0xff]  }
 0x297   : > { %3596 = vmatmul.mubr.bf16.gmra.mxu1 %v10058_v31  ;;  %v4168_v33 = vrot.slane %v4166_v37, 1  ;;  %8296 = vmatpush3.bf16.msra.mxu0 %v8733_v19  ;;  %v8737_v50 = vld [vmem:[#allocation12 + $0xb8] sm:$0xff]   ;;  %v8741_v37 = vld [vmem:[#allocation14 + $0x50] sm:$0xff]   ;;  %v8754_v19 = vld [vmem:[#allocation12 + $0xc8] sm:$0xff]  }
 0x298   : > { %3603 = vmatprep.mubr.bf16.mxu1 %v3434_v27  ;;  %7924 = vmatpush3.bf16.msra.mxu1 %v8728_v48  ;;  %v11506_v48 = vrot.slane %v10347_v47, 1  ;;  %v4082_v47 = vor.u32 %v10411_v22, %v10379_v54  ;;  %v4142_v54 = vsel %vm728_vm2, %v4128_v38, %v4141_v18  ;;  %v4154_v22 = vor.u32 %v4153_v32, %v4150_v14 }
 0x299   : > { %7925 = vmatprep.subr.bf16.mxu1 %v8729_v43  ;;  %v4115_v43 = vor.u32 %v4114_v41, %v4111_v26  ;;  %v4172_v21 = vor.u32 %v4171_v6, %v4168_v33  ;;  %v8740_v33 = vld [vmem:[#allocation12 + $0xb0] sm:$0xff]  }
 0x29a   : > { %4002 = vmatmul.mubr.bf16.gmra.mxu0 %v10331_v40  ;;  %v3436_v27 = vsel %vm1357_vm3, %v11506_v48, %v11505_v58  ;;  %v4103_v40 = vsel %vm728_vm2, %v4094_v59, %v4102_v42  ;;  %v4086_v2 = vsel %vm728_vm2, %v4082_v47, %v4085_v62  ;;  %v4155_v4 = vsel %vm728_vm2, %v4141_v18, %v4154_v22  ;;  %v8743_v59 = vld [vmem:[#allocation12 + $0xa8] sm:$0xff]  }
 0x29b   : > { %4009 = vmatprep.mubr.bf16.mxu0 %v3828_v51  ;;  %v4116_v56 = vsel %vm728_vm2, %v4102_v42, %v4115_v43  ;;  %v4129_v44 = vsel %vm728_vm2, %v4115_v43, %v4128_v38  ;;  %v4173_v26 = vsel %vm728_vm2, %v4154_v22, %v4172_v21  ;;  %v8744_v51 = vld [vmem:[#allocation14 + $0x48] sm:$0xff]   ;;  %v8746_v42 = vld [vmem:[#allocation14 + $0x40] sm:$0xff]   ;;  %v10501_v22 = vld [vmem:[#allocation14 + $0x38] sm:$0xff]  }
 0x29c   : > { %7926 = vmatpush3.bf16.msra.mxu1 %v8730_v45  ;;  %v8745_v43 = vld [vmem:[#allocation12 + $0xe0] sm:$0xff]   ;;  %11516 = vst [vmem:[#allocation58_spill] sm:$0xff] %v10501_v22 }
 0x29d   : > { %7991 = vmatprep.subr.bf16.mxu1 %v8735_v25 }
 0x29f   : > { %3604 = vmatmul.mubr.bf16.gmra.mxu1 %v10066_v12 }
 0x2a0   : > { %3611 = vmatprep.mubr.bf16.mxu1 %v3436_v27  ;;  %v8742_v27 = vld [vmem:[#allocation12 + $0xe8] sm:$0xff]  }
 0x2a2   : > { %4010 = vmatmul.mubr.bf16.gmra.mxu0 %v10353_v11  ;;  %v4107_v11 = vsel %vm728_vm2, %v4085_v62, %v10400_v60  ;;  %v4163_v60 = vor.u32 %v4162_v52, %v4159_v5 }
 0x2a4   : > { %v4164_v41 = vsel %vm728_vm2, %v4145_v16, %v4163_v60 }
 0x2a7   : > { %3612 = vmatmul.mubr.bf16.gmra.mxu1 %v10090_v10 }
 0x2a8   : > { %4314 = vmatprep.mubr.bf16.mxu1 %v4103_v40 }
 0x2af   : > { %4315 = vmatmul.mubr.bf16.vlgmr.msra.gmra.mxu1 %v4086_v2 }
 0x2b0   : > { %4322 = vmatprep.mubr.bf16.mxu1 %v4116_v56  ;;  %7992 = vmatpush3.bf16.msra.mxu1 %v8737_v50  ;;  %v8747_v56 = vld [vmem:[#allocation12 + $0xa0] sm:$0xff]  }
 0x2b1   : > { %7993 = vmatprep.subr.bf16.mxu1 %v8738_v0  ;;  %v8758_v50 = vld [vmem:[#allocation12 + $0x80] sm:$0xff]  }
 0x2b4   : > { %7994 = vmatpush3.bf16.msra.mxu1 %v8740_v33 }
 0x2b5   : > { %7995 = vmatprep.subr.bf16.mxu1 %v8742_v27 }
 0x2b7   : > { %4323 = vmatmul.mubr.bf16.gmra.mxu1 %v4107_v11  ;;  %v8748_v11 = vld [vmem:[#allocation12 + $0xd8] sm:$0xff]  }
 0x2b8   : > { %4330 = vmatprep.mubr.bf16.mxu1 %v4129_v44  ;;  %7996 = vmatpush3.bf16.msra.mxu1 %v8743_v59  ;;  %v8749_v44 = vld [vmem:[#allocation12 + $0x98] sm:$0xff]  }
 0x2b9   : > { %7997 = vmatprep.subr.bf16.mxu1 %v8745_v43 }
 0x2bc   : > { %7998 = vmatpush3.bf16.msra.mxu1 %v8747_v56 }
 0x2bd   : > { %7999 = vmatprep.subr.bf16.mxu1 %v8748_v11 }
 0x2bf   : > { %4331 = vmatmul.mubr.bf16.gmra.mxu1 %v10419_v15  ;;  %v8734_v15 = vld [vmem:[#allocation14 + $0x68] sm:$0xff]  }
 0x2c0   : > { %4338 = vmatprep.mubr.bf16.mxu1 %v4142_v54  ;;  %8297 = vmatprep.subr.bf16.mxu0 %v8734_v15 }
 0x2c1   : > { %8298 = vmatpush3.bf16.msra.mxu0 %v8734_v15  ;;  %8000 = vmatpush3.bf16.msra.mxu1 %v8749_v44 }
 0x2c2   : > { %8299 = vmatprep.subr.bf16.mxu0 %v8736_v49 }
 0x2c5   : > { %8300 = vmatpush3.bf16.msra.mxu0 %v8736_v49  ;;  %v10514_v49 = vld [vmem:[#allocation2 + $0x20] sm:$0xff]  }
 0x2c7   : > { %4339 = vmatmul.mubr.bf16.gmra.mxu1 %v4133_v63  ;;  %v8739_v63 = vld [vmem:[#allocation14 + $0x58] sm:$0xff]  }
 0x2c8   : > { %4346 = vmatprep.mubr.bf16.mxu1 %v4155_v4  ;;  %8301 = vmatprep.subr.bf16.mxu0 %v8739_v63  ;;  %v8751_v4 = vld [vmem:[#allocation12 + $0xd0] sm:$0xff]  }
 0x2c9   : > { %8302 = vmatpush3.bf16.msra.mxu0 %v8739_v63  ;;  %8001 = vmatprep.subr.bf16.mxu1 %v8751_v4 }
 0x2ca   : > { %8303 = vmatprep.subr.bf16.mxu0 %v8741_v37 }
 0x2cd   : > { %8304 = vmatpush3.bf16.msra.mxu0 %v8741_v37 }
 0x2ce   : > { %8305 = vmatprep.subr.bf16.mxu0 %v8744_v51 }
 0x2cf   : > { %4347 = vmatmul.mubr.bf16.gmra.mxu1 %v4146_v35 }
 0x2d0   : > { %4354 = vmatprep.mubr.bf16.mxu1 %v4173_v26  ;;  %v8752_v26 = vld [vmem:[#allocation12 + $0x90] sm:$0xff]  }
 0x2d1   : > { %8306 = vmatpush3.bf16.msra.mxu0 %v8744_v51  ;;  %8002 = vmatpush3.bf16.msra.mxu1 %v8752_v26  ;;  %v10563_v26 = vld [vmem:[#allocation2 + $0x10] sm:$0xff]  }
 0x2d2   : > { %8307 = vmatprep.subr.bf16.mxu0 %v8746_v42  ;;  %8003 = vmatprep.subr.bf16.mxu1 %v8754_v19 }
 0x2d5   : > { %8308 = vmatpush3.bf16.msra.mxu0 %v8746_v42 }
 0x2d6   : > { %8321 = vmatprep.subr.bf16.mxu0 %v10501_v22  ;;  %v8812_v22 = vld [vmem:[#allocation12 + $0x238] sm:$0xff]  }
 0x2d7   : > { %4355 = vmatmul.mubr.bf16.gmra.mxu1 %v4164_v41 }
 0x2ef   : > { %v8283_v55 = vpop.f32.mrf.mxu1 }
 0x2f0   : > { %v2541_v36 = vadd.f32 %v8283_v55, %v7116_v1 }
 0x2f1   : > { %v10481_v7 = vpop.f32.mrf.mxu1 }
 0x2f2   : > { %11507 = vst [vmem:[#allocation49_spill] sm:$0xff] %v10481_v7  ;;  %v2581_v16 = vmax.f32 %v2541_v36, 0.0  ;;  %v10512_v36 = vld [vmem:[#allocation2 + $0x18] sm:$0xff]  }
 0x2f3   : > { %v8284_v29 = vpop.f32.mrf.mxu1 }
 0x2f4   : > { %v2544_v17 = vadd.f32 %v8284_v29, %v7116_v1 }
 0x2f5   : > { %v10483_v46 = vpop.f32.mrf.mxu1 }
 0x2f6   : > { %11508 = vst [vmem:[#allocation50_spill] sm:$0xff] %v10483_v46  ;;  %v2582_v61 = vmax.f32 %v2544_v17, 0.0  ;;  %v8788_v46 = vld [vmem:[#allocation2 + $0x40] sm:$0xff]  }
 0x2f7   : > { %v8287_v30 = vpop.f32.mrf.mxu1 }
 0x2f8   : > { %v10485_v28 = vpack.c.bf16 %v2582_v61, %v2581_v16  ;;  %v2557_v45 = vadd.f32 %v8287_v30, %v7116_v1  ;;  %v10521_v16 = vrot.slane %v10512_v36, 6  ;;  %v4825_v61 = vrot.slane %v10514_v49, 6  ;;  %v8757_v30 = vld [vmem:[#allocation12 + $0xc0] sm:$0xff]  }
 0x2f9   : > { %v10487_v35 = vpop.f32.mrf.mxu1 }
 0x2fa   : > { %11509 = vst [vmem:[#allocation51_spill] sm:$0xff] %v10485_v28  ;;  %11510 = vst [vmem:[#allocation52_spill] sm:$0xff] %v10487_v35  ;;  %v2585_v32 = vmax.f32 %v2557_v45, 0.0  ;;  %v10526_v45 = vld [vmem:[#allocation2 + $0x4] sm:$0xf]  ;;  %v4826_v37 = vsel %vm4823_vm4, %v10521_v16, %v4825_v61  ;;  %v4872_v0 = vrot.slane %v10521_v16, 2 }
 0x2fb   : > { %v8288_v14 = vpop.f32.mrf.mxu1  ;;  %11517 = vst [vmem:[#allocation59_spill] sm:$0xff] %v10521_v16  ;;  %v10535_v33 = vrot.slane %v4826_v37, 2  ;;  %v8815_v16 = vld [vmem:[#allocation12 + $0x270] sm:$0xff]  }
 0x2fc   : > { %v2560_v9 = vadd.f32 %v8288_v14, %v7116_v1  ;;  %v10532_v14 = vld [vmem:[#allocation2 + $0x8] sm:$0xff]  }
 0x2fd   : > { %v10489_v5 = vpop.f32.mrf.mxu1  ;;  %11518 = vst [vmem:[#allocation60_spill] sm:$0xff] %v10535_v33  ;;  %v4874_v27 = vsel %vm4868_vm5, %v4872_v0, %v10535_v33 }
 0x2fe   : > { %11511 = vst [vmem:[#allocation53_spill] sm:$0xff] %v10489_v5  ;;  %v2586_v53 = vmax.f32 %v2560_v9, 0.0  ;;  %5035 = vmatprep.mubr.bf16.mxu1 %v4874_v27  ;;  %v8766_v27 = vld [vmem:[#allocation12 + $0x138] sm:$0xff]  }
 0x2ff   : > { %v8291_v6 = vpop.f32.mrf.mxu1 }
 0x300   : > { %v10491_v52 = vpack.c.bf16 %v2586_v53, %v2585_v32  ;;  %v2573_v58 = vadd.f32 %v8291_v6, %v7116_v1  ;;  %v4794_v32 = vld [vmem:[#allocation2] sm:$0xc]  ;;  %v4870_v6 = vrot.slane %v10532_v14, 2 }
 0x301   : > { %v10493_v48 = vpop.f32.mrf.mxu1  ;;  %v7257_v53 = vcombine.low %v4794_v32, %v10526_v45 }
 0x302   : > { %11512 = vst [vmem:[#allocation54_spill] sm:$0xff] %v10491_v52  ;;  %11513 = vst [vmem:[#allocation55_spill] sm:$0xff] %v10493_v48  ;;  %v2589_v47 = vmax.f32 %v2573_v58, 0.0  ;;  %v8775_v52 = vld [vmem:[#allocation12 + $0x168] sm:$0xff]  }
 0x303   : > { %v8292_v40 = vpop.f32.mrf.mxu1  ;;  %v4869_v59 = vrot.slane %v7257_v53, 2 }
 0x304   : > { %v2576_v62 = vadd.f32 %v8292_v40, %v7116_v1  ;;  %v8755_v1 = vld [vmem:[#allocation12 + $0x88] sm:$0xff]  }
 0x305   : > { %v10499_v54 = vpop.f32.mrf.mxu1  ;;  %8004 = vmatpush3.bf16.msra.mxu1 %v8755_v1  ;;  %v4871_v43 = vsel %vm4868_vm5, %v4869_v59, %v4870_v6  ;;  %v4875_v1 = vrot.slane %v10563_v26, 2 }
 0x306   : > { %v2590_v2 = vmax.f32 %v2576_v62, 0.0  ;;  %11515 = vst [vmem:[#allocation57_spill] sm:$0xff] %v10499_v54  ;;  %8005 = vmatprep.subr.bf16.mxu1 %v8757_v30 }
 0x308   : > { %v10495_v38 = vpack.c.bf16 %v2590_v2, %v2589_v47  ;;  %v10547_v47 = vld [vmem:[#allocation2 + $0x28] sm:$0xff]  }
 0x309   : > { %8006 = vmatpush3.bf16.msra.mxu1 %v8758_v50  ;;  %v10555_v56 = vrot.slane %v10547_v47, 6 }
 0x30a   : > { %11514 = vst [vmem:[#allocation56_spill] sm:$0xff] %v10495_v38  ;;  %v10497_v18 = vpop.f32.mrf.mxu0  ;;  %v4879_v38 = vrot.slane %v10512_v36, 2 }
 0x30b   : > { %11519 = vst [vmem:[#allocation61_spill] sm:$0xff] %v10555_v56  ;;  %v4828_v4 = vsel %vm4823_vm4, %v4825_v61, %v10555_v56  ;;  %v4876_v61 = vsel %vm4868_vm5, %v4870_v6, %v4875_v1 }
 0x30c   : > { %v10503_v21 = vpop.f32.mrf.mxu0  ;;  %5036 = vmatmul.mubr.bf16.vlgmr.msra.gmra.mxu1 %v4871_v43  ;;  %v4880_v54 = vsel %vm4868_vm5, %v4875_v1, %v4879_v38 }
 0x30e   : > { %v10506_v41 = vpop.f32.mrf.mxu0 }
 0x30f   : > { %v7719_v60 = vpop.f32.mrf.mxu1 }
 0x310   : > { %v10510_v55 = vpop.f32.mrf.mxu0 }
 0x311   : > { %v7720_v13 = vpop.f32.mrf.mxu1 }
 0x312   : > { %v10508_v15 = vadd.f32 %v7720_v13, %v7719_v60  ;;  %v10518_v17 = vpop.f32.mrf.mxu0  ;;  %v10565_v13 = vrot.slane %v4828_v4, 2  ;;  %v8771_v4 = vld [vmem:[#allocation12 + $0x170] sm:$0xff]  }
 0x313   : > { %v10516_v29 = vpop.f32.mrf.mxu1 }
 0x314   : > { %v10528_v25 = vpop.f32.mrf.mxu0  ;;  %11520 = vst [vmem:[#allocation62_spill] sm:$0xff] %v10565_v13  ;;  %v10573_v50 = vsel %vm4868_vm5, %v10535_v33, %v10565_v13 }
 0x315   : > { %v10524_v63 = vpop.f32.mrf.mxu1  ;;  %11521 = vst [vmem:[#allocation63_spill] sm:$0xff] %v10573_v50  ;;  %5043 = vmatprep.mubr.bf16.mxu1 %v10573_v50 }
 0x316   : > { %v10538_v51 = vpop.f32.mrf.mxu0  ;;  %5044 = vmatmul.mubr.bf16.gmra.mxu1 %v4876_v61 }
 0x317   : > { %v7725_v9 = vpop.f32.mrf.mxu1 }
 0x318   : > { %v10545_v40 = vpop.f32.mrf.mxu0 }
 0x319   : > { %v7726_v58 = vpop.f32.mrf.mxu1 }
 0x31a   : > { %v10543_v42 = vadd.f32 %v7726_v58, %v7725_v9  ;;  %v10552_v2 = vpop.f32.mrf.mxu0  ;;  %v8774_v9 = vld [vmem:[#allocation2 + $0x30] sm:$0xff]  }
 0x31b   : > { %v10549_v62 = vpop.f32.mrf.mxu1  ;;  %v8765_v58 = vld [vmem:[#allocation12 + $0x178] sm:$0xff]   ;;  %v4829_v59 = vrot.slane %v8774_v9, 6 }
 0x31c   : > { %v10559_v44 = vpop.f32.mrf.mxu0  ;;  %8095 = vmatprep.subr.bf16.mxu1 %v8765_v58 }
 0x31d   : > { %v10557_v11 = vpop.f32.mrf.mxu1  ;;  %8096 = vmatpush3.bf16.msra.mxu1 %v8766_v27 }
 0x31e   : > { %v10567_v19 = vpop.f32.mrf.mxu0  ;;  %8097 = vmatprep.subr.bf16.mxu1 %v8771_v4  ;;  %v8779_v4 = vld [vmem:[#allocation2 + $0x38] sm:$0xff]  }
 0x31f   : > { %v7731_v60 = vpop.f32.mrf.mxu1  ;;  %v4831_v5 = vrot.slane %v8779_v4, 6 }
 0x320   : > { %v10577_v32 = vpop.f32.mrf.mxu0 }
 0x321   : > { %v7732_v30 = vpop.f32.mrf.mxu1  ;;  %8098 = vmatpush3.bf16.msra.mxu1 %v8772_v8  ;;  %v4883_v8 = vrot.slane %v10514_v49, 2  ;;  %v8783_v49 = vld [vmem:[#allocation12 + $0x120] sm:$0xff]  }
 0x322   : > { %v10575_v37 = vadd.f32 %v7732_v30, %v7731_v60  ;;  %v10583_v53 = vpop.f32.mrf.mxu0  ;;  %v4830_v30 = vsel %vm4823_vm4, %v10555_v56, %v4829_v59  ;;  %8099 = vmatprep.subr.bf16.mxu1 %v8775_v52 }
 0x323   : > { %v10581_v0 = vpop.f32.mrf.mxu1  ;;  %v4881_v6 = vrot.slane %v4830_v30, 2  ;;  %v8776_v30 = vld [vmem:[#allocation12 + $0x128] sm:$0xff]  }
 0x324   : > { %v10587_v60 = vpop.f32.mrf.mxu0 }
 0x325   : > { %v10585_v43 = vpop.f32.mrf.mxu1  ;;  %11522 = vst [vmem:[#allocation64_spill] sm:$0xff] %v10587_v60  ;;  %v4882_v9 = vsel %vm4868_vm5, %v10565_v13, %v4881_v6  ;;  %8100 = vmatpush3.bf16.msra.mxu1 %v8776_v30  ;;  %v4884_v30 = vsel %vm4868_vm5, %v4879_v38, %v4883_v8  ;;  %v8786_v38 = vld [vmem:[#allocation12 + $0x158] sm:$0xff]  }
 0x326   : > { %v10591_v20 = vpop.f32.mrf.mxu0  ;;  %5051 = vmatprep.mubr.bf16.mxu1 %v4882_v9 }
 0x327   : > { %v7737_v24 = vpop.f32.mrf.mxu1  ;;  %11523 = vst [vmem:[#allocation65_spill] sm:$0xff] %v10591_v20  ;;  %5052 = vmatmul.mubr.bf16.gmra.mxu1 %v4880_v54  ;;  %v8781_v54 = vld [vmem:[#allocation12 + $0x160] sm:$0xff]   ;;  %v5307_v20 = vrot.slane %v10058_v31, 1 }
 0x328   : > { %v10598_v58 = vpop.f32.mrf.mxu0  ;;  %8101 = vmatprep.subr.bf16.mxu1 %v8781_v54 }
 0x329   : > { %v7738_v61 = vpop.f32.mrf.mxu1  ;;  %11525 = vst [vmem:[#allocation67_spill] sm:$0xff] %v10598_v58  ;;  %8102 = vmatpush3.bf16.msra.mxu1 %v8783_v49  ;;  %v8816_v58 = vld [vmem:[#allocation12 + $0x230] sm:$0xff]  }
 0x32a   : > { %v10596_v28 = vadd.f32 %v7738_v61, %v7737_v24  ;;  %v10603_v48 = vpop.f32.mrf.mxu0  ;;  %v4832_v61 = vsel %vm4823_vm4, %v4829_v59, %v4831_v5  ;;  %8103 = vmatprep.subr.bf16.mxu1 %v8786_v38 }
 0x32b   : > { %v10601_v27 = vpop.f32.mrf.mxu1  ;;  %11527 = vst [vmem:[#allocation69_spill] sm:$0xff] %v10603_v48  ;;  %v4885_v1 = vrot.slane %v4832_v61, 2 }
 0x32c   : > { %11524 = vst [vmem:[#allocation66_spill] sm:$0xff] %v10596_v28  ;;  %11526 = vst [vmem:[#allocation68_spill] sm:$0xff] %v10601_v27  ;;  %v10607_v35 = vpop.f32.mrf.mxu0 }
 0x32d   : > { %v10605_v36 = vpop.f32.mrf.mxu1  ;;  %11529 = vst [vmem:[#allocation71_spill] sm:$0xff] %v10607_v35  ;;  %v4886_v52 = vsel %vm4868_vm5, %v4881_v6, %v4885_v1 }
 0x32e   : > { %11528 = vst [vmem:[#allocation70_spill] sm:$0xff] %v10605_v36  ;;  %v10610_v9 = vpop.f32.mrf.mxu0  ;;  %5059 = vmatprep.mubr.bf16.mxu1 %v4886_v52 }
 0x32f   : > { %v7743_v24 = vpop.f32.mrf.mxu1  ;;  %11530 = vst [vmem:[#allocation72_spill] sm:$0xff] %v10610_v9  ;;  %5060 = vmatmul.mubr.bf16.gmra.mxu1 %v4884_v30 }
 0x330   : > { %v10615_v56 = vpop.f32.mrf.mxu0 }
 0x331   : > { %v7744_v13 = vpop.f32.mrf.mxu1  ;;  %11532 = vst [vmem:[#allocation74_spill] sm:$0xff] %v10615_v56  ;;  %v8787_v56 = vld [vmem:[#allocation12 + $0x118] sm:$0xff]  }
 0x332   : > { %v10613_v7 = vadd.f32 %v7744_v13, %v7743_v24  ;;  %v10621_v59 = vpop.f32.mrf.mxu0  ;;  %v4833_v13 = vrot.slane %v8788_v46, 6  ;;  %8104 = vmatpush3.bf16.msra.mxu1 %v8787_v56 }
 0x333   : > { %v10618_v4 = vpop.f32.mrf.mxu1  ;;  %11534 = vst [vmem:[#allocation76_spill] sm:$0xff] %v10621_v59  ;;  %v4887_v59 = vrot.slane %v10547_v47, 2 }
 0x334   : > { %11531 = vst [vmem:[#allocation73_spill] sm:$0xff] %v10613_v7  ;;  %11533 = vst [vmem:[#allocation75_spill] sm:$0xff] %v10618_v4  ;;  %v10625_v24 = vpop.f32.mrf.mxu0  ;;  %v4834_v6 = vsel %vm4823_vm4, %v4831_v5, %v4833_v13 }
 0x335   : > { %v10623_v61 = vpop.f32.mrf.mxu1  ;;  %11536 = vst [vmem:[#allocation78_spill] sm:$0xff] %v10625_v24  ;;  %v4889_v52 = vrot.slane %v4834_v6, 2  ;;  %v4888_v5 = vsel %vm4868_vm5, %v4883_v8, %v4887_v59  ;;  %v8799_v24 = vld [vmem:[#allocation12 + $0x108] sm:$0xff]  }
 0x336   : > { %11535 = vst [vmem:[#allocation77_spill] sm:$0xff] %v10623_v61  ;;  %v10628_v33 = vpop.f32.mrf.mxu0  ;;  %v8966_v61 = vld [vmem:[#allocation2 + $0x1c] sm:$0xf] }
 0x337   : > { %v7749_v50 = vpop.f32.mrf.mxu1  ;;  %11537 = vst [vmem:[#allocation79_spill] sm:$0xff] %v10628_v33  ;;  %v4890_v46 = vsel %vm4868_vm5, %v4885_v1, %v4889_v52  ;;  %v4893_v1 = vrot.slane %v4833_v13, 2 }
 0x338   : > { %v10633_v30 = vpop.f32.mrf.mxu0  ;;  %5067 = vmatprep.mubr.bf16.mxu1 %v4890_v46  ;;  %v8798_v46 = vld [vmem:[#allocation12 + $0x148] sm:$0xff]  }
 0x339   : > { %v7750_v7 = vpop.f32.mrf.mxu1  ;;  %11539 = vst [vmem:[#allocation81_spill] sm:$0xff] %v10633_v30  ;;  %5068 = vmatmul.mubr.bf16.gmra.mxu1 %v4888_v5  ;;  %v8796_v30 = vld [vmem:[#allocation2 + $0x30] ss:$0 sps:$4 sm:$0x33]   ;;  %v4894_v56 = vsel %vm4868_vm5, %v4889_v52, %v4893_v1  ;;  %v8803_v1 = vld [vmem:[#allocation12 + $0x100] sm:$0xff]  }
 0x33a   : > { %v10631_v54 = vadd.f32 %v7750_v7, %v7749_v50  ;;  %v10639_v49 = vpop.f32.mrf.mxu0  ;;  %v8792_v7 = vld [vmem:[#allocation12 + $0x150] sm:$0xff]   ;;  %v4891_v38 = vrot.slane %v8796_v30, 2  ;;  %5075 = vmatprep.mubr.bf16.mxu1 %v4894_v56 }
 0x33b   : > { %v10636_v9 = vpop.f32.mrf.mxu1  ;;  %v8794_v50 = vld [vmem:[#allocation12 + $0x110] sm:$0xff]   ;;  %8105 = vmatprep.subr.bf16.mxu1 %v8792_v7 }
 0x33c   : > { %11538 = vst [vmem:[#allocation80_spill] sm:$0xff] %v10631_v54  ;;  %11540 = vst [vmem:[#allocation82_spill] sm:$0xff] %v10636_v9  ;;  %v10643_v33 = vpop.f32.mrf.mxu0  ;;  %8106 = vmatpush3.bf16.msra.mxu1 %v8794_v50  ;;  %v4892_v54 = vsel %vm4868_vm5, %v4887_v59, %v4891_v38  ;;  %v8802_v50 = vld [vmem:[#allocation12 + $0x140] sm:$0xff]   ;;  %v5303_v38 = vrot.slane %v10037_v3, 1 }
 0x33d   : > { %v10641_v6 = vpop.f32.mrf.mxu1  ;;  %8107 = vmatprep.subr.bf16.mxu1 %v8798_v46 }
 0x33e   : > { %11541 = vst [vmem:[#allocation83_spill] sm:$0xff] %v10641_v6  ;;  %v10649_v8 = vpop.f32.mrf.mxu0  ;;  %v5261_v6 = vld [vmem:[#allocation2 + $0x18] sm:$0xc] }
 0x33f   : > { %v10645_v47 = vpop.f32.mrf.mxu1  ;;  %v7294_v4 = vcombine.low %v5261_v6, %v8966_v61 }
 0x340   : > { %v10657_v30 = vpop.f32.mrf.mxu0  ;;  %8108 = vmatpush3.bf16.msra.mxu1 %v8799_v24 }
 0x341   : > { %v10647_v9 = vpop.f32.mrf.mxu1  ;;  %5076 = vmatmul.mubr.bf16.gmra.mxu1 %v4892_v54  ;;  %v5265_v7 = vrot.slane %v7294_v4, 1  ;;  %8109 = vmatprep.subr.bf16.mxu1 %v8802_v50 }
 0x342   : > { %v10666_v6 = vpop.f32.mrf.mxu0 }
 0x343   : > { %v10652_v5 = vpop.f32.mrf.mxu1  ;;  %v5266_v56 = vsel %vm1357_vm3, %v5265_v7, %v10006_v39  ;;  %v5305_v7 = vrot.slane %v10044_v23, 1 }
 0x344   : > { %v5302_v59 = vrot.slane %v5266_v56, 1  ;;  %8110 = vmatpush3.bf16.msra.mxu1 %v8803_v1  ;;  %v10674_v46 = vpop.f32.mrf.mxu0  ;;  %v8811_v56 = vld [vmem:[#allocation12 + $0x278] sm:$0xff]  }
 0x345   : > { %v10655_v13 = vpop.f32.mrf.mxu1  ;;  %8199 = vmatprep.subr.bf16.mxu1 %v8811_v56 }
 0x346   : > { %v5304_v4 = vsel %vm1357_vm3, %v5302_v59, %v5303_v38  ;;  %v10681_v1 = vpop.f32.mrf.mxu0  ;;  %v5306_v59 = vsel %vm1357_vm3, %v5303_v38, %v5305_v7  ;;  %v8819_v38 = vld [vmem:[#allocation12 + $0x268] sm:$0xff]  }
 0x347   : > { %v10659_v52 = vpop.f32.mrf.mxu1  ;;  %5449 = vmatprep.mubr.bf16.mxu1 %v5304_v4 }
 0x348   : > { %v10689_v4 = vpop.f32.mrf.mxu0 }
 0x349   : > { %v10664_v61 = vpop.f32.mrf.mxu1  ;;  %5450 = vmatmul.mubr.bf16.vlgmr.msra.gmra.mxu1 %v10010_v34 }
 0x34a   : > { %5457 = vmatprep.mubr.bf16.mxu1 %v5306_v59  ;;  %8200 = vmatpush3.bf16.msra.mxu1 %v8812_v22  ;;  %v10696_v27 = vpop.f32.mrf.mxu0  ;;  %v5308_v22 = vsel %vm1357_vm3, %v5305_v7, %v5307_v20  ;;  %v8824_v7 = vld [vmem:[#allocation12 + $0x220] sm:$0xff]  }
 0x34b   : > { %v10669_v54 = vpop.f32.mrf.mxu1  ;;  %8201 = vmatprep.subr.bf16.mxu1 %v8815_v16  ;;  %v8823_v16 = vld [vmem:[#allocation12 + $0x260] sm:$0xff]  }
 0x34c   : > { %v10704_v28 = vpop.f32.mrf.mxu0 }
 0x34d   : > { %v10671_v24 = vpop.f32.mrf.mxu1 }
 0x34e   : > { %8202 = vmatpush3.bf16.msra.mxu1 %v8816_v58 }
 0x34f   : > { %v10676_v39 = vpop.f32.mrf.mxu1  ;;  %8203 = vmatprep.subr.bf16.mxu1 %v8819_v38 }
 0x351   : > { %v10679_v50 = vpop.f32.mrf.mxu1  ;;  %5458 = vmatmul.mubr.bf16.gmra.mxu1 %v10037_v3  ;;  %v8820_v3 = vld [vmem:[#allocation12 + $0x228] sm:$0xff]  }
 0x352   : > { %5465 = vmatprep.mubr.bf16.mxu1 %v5308_v22  ;;  %8204 = vmatpush3.bf16.msra.mxu1 %v8820_v3  ;;  %v8967_v22 = vld [vmem:[#allocation2 + $0x48] ss:$0 sps:$4 sm:$0x33]  }
 0x353   : > { %v10684_v35 = vpop.f32.mrf.mxu1  ;;  %8205 = vmatprep.subr.bf16.mxu1 %v8823_v16  ;;  %v5267_v3 = vrot.slane %v8967_v22, 1  ;;  %v8827_v16 = vld [vmem:[#allocation12 + $0x258] sm:$0xff]  }
 0x355   : > { %v10686_v34 = vpop.f32.mrf.mxu1 }
 0x356   : > { %8206 = vmatpush3.bf16.msra.mxu1 %v8824_v7  ;;  %v8828_v7 = vld [vmem:[#allocation12 + $0x218] sm:$0xff]  }
 0x357   : > { %v10691_v48 = vpop.f32.mrf.mxu1  ;;  %8207 = vmatprep.subr.bf16.mxu1 %v8827_v16 }
 0x358   : > { %11542 = vst [vmem:[#allocation84_spill] sm:$0xff] %v10691_v48 }
 0x359   : > { %v10694_v36 = vpop.f32.mrf.mxu1  ;;  %5466 = vmatmul.mubr.bf16.gmra.mxu1 %v10044_v23 }
 0x35a   : > { %11543 = vst [vmem:[#allocation85_spill] sm:$0xff] %v10694_v36  ;;  %v5309_v36 = vrot.slane %v10066_v12, 1  ;;  %8208 = vmatpush3.bf16.msra.mxu1 %v8828_v7  ;;  %v5313_v7 = vrot.slane %v5267_v3, 1 }
 0x35b   : > { %v10699_v56 = vpop.f32.mrf.mxu1 }
 0x35c   : > { %11544 = vst [vmem:[#allocation86_spill] sm:$0xff] %v10699_v56  ;;  %v10711_v56 = vpop.f32.mrf.mxu0  ;;  %v5310_v58 = vsel %vm1357_vm3, %v5307_v20, %v5309_v36  ;;  %v7773_v20 = vadd.f32 %v10503_v21, %v10497_v18  ;;  %v7724_v18 = vadd.f32 %v10524_v63, %v10516_v29  ;;  %v7776_v21 = vadd.f32 %v10510_v55, %v10506_v41  ;;  %v4687_v55 = vld [vmem:[#allocation2] sm:$0xf] }
 0x35d   : > { %v10701_v59 = vpop.f32.mrf.mxu1  ;;  %5473 = vmatprep.mubr.bf16.mxu1 %v5310_v58  ;;  %v7779_v29 = vadd.f32 %v10528_v25, %v10518_v17 }
 0x35e   : > { %11545 = vst [vmem:[#allocation87_spill] sm:$0xff] %v10701_v59  ;;  %v3289_v41 = vadd.f32 %v7776_v21, %v7724_v18  ;;  %v7730_v18 = vadd.f32 %v10557_v11, %v10549_v62  ;;  %v7834_v11 = vadd.f32 %v10671_v24, %v10669_v54 }
 0x35f   : > { %v10706_v48 = vpop.f32.mrf.mxu1 }
 0x360   : > { %11546 = vst [vmem:[#allocation88_spill] sm:$0xff] %v10706_v48  ;;  %v10719_v48 = vpop.f32.mrf.mxu0 }
 0x361   : > { %v10709_v60 = vpop.f32.mrf.mxu1  ;;  %5474 = vmatmul.mubr.bf16.gmra.mxu1 %v10058_v31  ;;  %v7825_v31 = vadd.f32 %v10647_v9, %v10645_v47  ;;  %v7828_v47 = vadd.f32 %v10655_v13, %v10652_v5 }
 0x362   : > { %11547 = vst [vmem:[#allocation89_spill] sm:$0xff] %v10709_v60  ;;  %v5268_v60 = vsel %vm1357_vm3, %v10051_v57, %v5267_v3  ;;  %v3286_v57 = vadd.f32 %v7773_v20, %v10508_v15  ;;  %v8831_v15 = vld [vmem:[#allocation12 + $0x250] sm:$0xff]   ;;  %v3294_v3 = vadd.f32 %v7779_v29, %v10543_v42  ;;  %v10772_v42 = vld [vmem:[%s11417_s7] ss:$0 sm:$0xff]  ;;  %v7886_v29 = vadd.f32 %v10689_v4, %v10681_v1 }
 0x363   : > { %v10714_v38 = vpop.f32.mrf.mxu1  ;;  %v8832_v20 = vld [vmem:[#allocation12 + $0x210] sm:$0xff]   ;;  %8209 = vmatprep.subr.bf16.mxu1 %v8831_v15  ;;  %v3621_v13 = vadd.f32 %v7828_v47, %v3289_v41  ;;  %v10783_v47 = vld [vmem:[#allocation2 + $0x34] sm:$0xf]  ;;  %v5807_v15 = vld [vmem:[#allocation2 + $0x30] sm:$0xc] }
 0x364   : > { %11548 = vst [vmem:[#allocation90_spill] sm:$0xff] %v10714_v38  ;;  %v5311_v38 = vrot.slane %v5268_v60, 1  ;;  %v3620_v9 = vadd.f32 %v7825_v31, %v3286_v57  ;;  %v7880_v31 = vadd.f32 %v10657_v30, %v10649_v8  ;;  %8210 = vmatpush3.bf16.msra.mxu1 %v8832_v20  ;;  %v8836_v57 = vld [vmem:[#allocation12 + $0x208] sm:$0xff]   ;;  %v7782_v8 = vadd.f32 %v10545_v40, %v10538_v51 }
 0x365   : > { %v10716_v23 = vpop.f32.mrf.mxu1  ;;  %v5816_v40 = vrot.slane %v10532_v14, 6  ;;  %v7335_v54 = vcombine.low %v5807_v15, %v10783_v47 }
 0x366   : > { %11549 = vst [vmem:[#allocation91_spill] sm:$0xff] %v10716_v23  ;;  %v10731_v23 = vpop.f32.mrf.mxu0  ;;  %v5312_v22 = vsel %vm1357_vm3, %v5309_v36, %v5311_v38  ;;  %v7877_v36 = vadd.f32 %v10643_v33, %v10639_v49  ;;  %v7831_v33 = vadd.f32 %v10664_v61, %v10659_v52  ;;  %v5314_v25 = vsel %vm1357_vm3, %v5311_v38, %v5313_v7 }
 0x367   : > { %v10721_v59 = vpop.f32.mrf.mxu1  ;;  %5481 = vmatprep.mubr.bf16.mxu1 %v5312_v22  ;;  %v10765_v52 = vcombine.low %v4687_v55, %v10526_v45  ;;  %v7883_v38 = vadd.f32 %v10674_v46, %v10666_v6  ;;  %v7785_v45 = vadd.f32 %v10559_v44, %v10552_v2  ;;  %v4019_v62 = vadd.f32 %v7880_v31, %v3621_v13  ;;  %v10788_v44 = vld [vmem:[#allocation2 + $0x38] sm:$0xff]  }
 0x368   : > { %11550 = vst [vmem:[#allocation92_spill] sm:$0xff] %v10721_v59  ;;  %v10748_v16 = vpop.f32.mrf.mxu0  ;;  %v4018_v5 = vadd.f32 %v7877_v36, %v3620_v9  ;;  %v3622_v21 = vadd.f32 %v7831_v33, %v3294_v3  ;;  %v8838_v36 = vld [vmem:[#allocation12 + $0x240] sm:$0xff]   ;;  %v5854_v1 = vrot.slane %v7335_v54, 2  ;;  %v5855_v4 = vrot.slane %v10788_v44, 2 }
 0x369   : > { %v10727_v58 = vpop.f32.mrf.mxu1  ;;  %5482 = vmatmul.mubr.bf16.gmra.mxu1 %v10066_v12  ;;  %v8835_v12 = vld [vmem:[#allocation12 + $0x248] sm:$0xff]   ;;  %v5815_v51 = vrot.slane %v10765_v52, 6 }
 0x36a   : > { %v10756_v22 = vpop.f32.mrf.mxu0  ;;  %8211 = vmatprep.subr.bf16.mxu1 %v8835_v12  ;;  %5489 = vmatprep.mubr.bf16.mxu1 %v5314_v25  ;;  %v4020_v7 = vadd.f32 %v7883_v38, %v3622_v21  ;;  %v7837_v12 = vadd.f32 %v10679_v50, %v10676_v39  ;;  %v3302_v25 = vadd.f32 %v7785_v45, %v10575_v37  ;;  %v5818_v37 = vrot.slane %v10563_v26, 6 }
 0x36b   : > { %v10734_v59 = vpop.f32.mrf.mxu1  ;;  %8212 = vmatpush3.bf16.msra.mxu1 %v8836_v57  ;;  %v5817_v2 = vsel %vm4823_vm4, %v5815_v51, %v5816_v40  ;;  %v5857_v41 = vrot.slane %v5815_v51, 2  ;;  %v7788_v57 = vadd.f32 %v10577_v32, %v10567_v19  ;;  %v5856_v39 = vsel %vm4868_vm5, %v5854_v1, %v5855_v4 }
 0x36c   : > { %v10781_v6 = vpop.f32.mrf.mxu0  ;;  %8213 = vmatprep.subr.bf16.mxu1 %v8838_v36  ;;  %v5858_v55 = vrot.slane %v5817_v2, 2  ;;  %v7736_v50 = vadd.f32 %v10585_v43, %v10581_v0  ;;  %v7889_v21 = vadd.f32 %v10704_v28, %v10696_v27  ;;  %v7840_v19 = vadd.f32 %v10686_v34, %v10684_v35  ;;  %v11551_v0 = vld [vmem:[#allocation64_spill] sm:$0xff] }
 0x36d   : > { %v10741_v60 = vpop.f32.mrf.mxu1  ;;  %v7791_v43 = vadd.f32 %v11551_v0, %v10583_v53  ;;  %v7892_v35 = vadd.f32 %v10719_v48, %v10711_v56  ;;  %v11552_v34 = vld [vmem:[#allocation84_spill] sm:$0xff]  ;;  %v11557_v48 = vld [vmem:[#allocation65_spill] sm:$0xff]  ;;  %v11558_v56 = vld [vmem:[#allocation67_spill] sm:$0xff] }
 0x36e   : > { %v3305_v28 = vadd.f32 %v7788_v57, %v7736_v50  ;;  %v7794_v1 = vadd.f32 %v11558_v56, %v11557_v48  ;;  %v11562_v0 = vld [vmem:[#allocation69_spill] sm:$0xff] }
 0x36f   : > { %v7927_v63 = vpop.f32.mrf.mxu1  ;;  %v11571_v56 = vld [vmem:[#allocation73_spill] sm:$0xff] }
 0x371   : > { %v7928_v49 = vpop.f32.mrf.mxu1  ;;  %5490 = vmatmul.mubr.bf16.gmra.mxu1 %v10090_v10  ;;  %v3297_v10 = vadd.f32 %v7782_v8, %v7730_v18 }
 0x372   : > { %v7929_v17 = vadd.f32 %v7928_v49, %v7927_v63  ;;  %v8840_v63 = vld [vmem:[#allocation12 + $0x200] sm:$0xff]   ;;  %v10795_v49 = vpop.f32.mrf.mxu0 }
 0x373   : > { %v7930_v30 = vpop.f32.mrf.mxu1  ;;  %v3623_v33 = vadd.f32 %v7834_v11, %v3297_v10  ;;  %8214 = vmatpush3.bf16.msra.mxu1 %v8840_v63  ;;  %v5819_v11 = vsel %vm4823_vm4, %v5816_v40, %v5818_v37  ;;  %v11553_v10 = vld [vmem:[#allocation85_spill] sm:$0xff]  ;;  %v3625_v63 = vadd.f32 %v7840_v19, %v3305_v28 }
 0x374   : > { %v4363_v61 = vadd.f32 %v7929_v17, %v4018_v5  ;;  %v5859_v17 = vsel %vm4868_vm5, %v5857_v41, %v5858_v55  ;;  %v10810_v32 = vpop.f32.mrf.mxu0  ;;  %v5862_v36 = vrot.slane %v5819_v11, 2 }
 0x375   : > { %v7931_v9 = vpop.f32.mrf.mxu1  ;;  %6016 = vmatprep.mubr.bf16.mxu1 %v5859_v17 }
 0x376   : > { %v7932_v46 = vadd.f32 %v7931_v9, %v7930_v30  ;;  %v4382_v24 = vadd.f32 %v10772_v42, %v4363_v61  ;;  %v3624_v61 = vadd.f32 %v7837_v12, %v3302_v25  ;;  %v4021_v9 = vadd.f32 %v7886_v29, %v3623_v33  ;;  %v10823_v40 = vpop.f32.mrf.mxu0  ;;  %v11556_v12 = vld [vmem:[#allocation70_spill] sm:$0xff] }
 0x377   : > { %v7933_v14 = vpop.f32.mrf.mxu1  ;;  %v7843_v29 = vadd.f32 %v11553_v10, %v11552_v34  ;;  %v11565_v34 = vld [vmem:[#allocation88_spill] sm:$0xff]  ;;  %v11566_v10 = vld [vmem:[#allocation89_spill] sm:$0xff] }
 0x378   : > { %v4364_v20 = vadd.f32 %v7932_v46, %v4019_v62  ;;  %v4394_v18 = vmax.f32 %v4382_v24, 0.0  ;;  %v10815_v46 = vld [vmem:[#allocation2 + $0x40] sm:$0xff]   ;;  %v4022_v15 = vadd.f32 %v7889_v21, %v3624_v61  ;;  %v5863_v24 = vsel %vm4868_vm5, %v5858_v55, %v5862_v36 }
 0x379   : > { %v7934_v31 = vpop.f32.mrf.mxu1  ;;  %6017 = vmatmul.mubr.bf16.vlgmr.msra.gmra.mxu1 %v5856_v39  ;;  %v5860_v53 = vrot.slane %v10815_v46, 2  ;;  %v11559_v55 = vld [vmem:[#allocation86_spill] sm:$0xff]  ;;  %v11560_v39 = vld [vmem:[#allocation87_spill] sm:$0xff] }
 0x37a   : > { %v4383_v5 = vadd.f32 %v10772_v42, %v4364_v20  ;;  %v7935_v13 = vadd.f32 %v7934_v31, %v7933_v14  ;;  %v11554_v20 = vld [vmem:[#allocation66_spill] sm:$0xff]  ;;  %6024 = vmatprep.mubr.bf16.mxu1 %v5863_v24  ;;  %v7846_v50 = vadd.f32 %v11560_v39, %v11559_v55 }
 0x37b   : > { %v7936_v3 = vpop.f32.mrf.mxu1  ;;  %v3310_v41 = vadd.f32 %v7791_v43, %v11554_v20  ;;  %v11563_v43 = vld [vmem:[#allocation71_spill] sm:$0xff] }
 0x37c   : > { %v4395_v8 = vmax.f32 %v4383_v5, 0.0  ;;  %v4365_v30 = vadd.f32 %v7935_v13, %v4020_v7  ;;  %v11555_v7 = vld [vmem:[#allocation68_spill] sm:$0xff]  ;;  %v5861_v5 = vsel %vm4868_vm5, %v5855_v4, %v5860_v53  ;;  %v11561_v4 = vld [vmem:[#allocation59_spill] sm:$0xff] }
 0x37d   : > { %v7937_v38 = vpop.f32.mrf.mxu1  ;;  %v7742_v31 = vadd.f32 %v11556_v12, %v11555_v7  ;;  %v3626_v57 = vadd.f32 %v7843_v29, %v3310_v41  ;;  %v7849_v29 = vadd.f32 %v11566_v10, %v11565_v34  ;;  %v11567_v20 = vld [vmem:[#allocation75_spill] sm:$0xff]  ;;  %v11568_v41 = vld [vmem:[#allocation77_spill] sm:$0xff]  ;;  %v8764_v10 = vld [vmem:[#allocation14 + $0x18] sm:$0xff]  }
 0x37e   : > { %v7938_v51 = vadd.f32 %v7937_v38, %v7936_v3  ;;  %v4406_v45 = vpack.c.bf16 %v4395_v8, %v4394_v18  ;;  %v4384_v27 = vadd.f32 %v10772_v42, %v4365_v30  ;;  %v7895_v3 = vadd.f32 %v10748_v16, %v10731_v23  ;;  %v7903_v30 = vpop.f32.mrf.mxu0  ;;  %v8753_v38 = vld [vmem:[#allocation14 + $0x30] sm:$0xff]  }
 0x37f   : > { %v7939_v62 = vpop.f32.mrf.mxu1  ;;  %v4023_v8 = vadd.f32 %v7892_v35, %v3625_v63  ;;  %v7797_v23 = vadd.f32 %v11563_v43, %v11562_v0  ;;  %v11564_v35 = vld [vmem:[#allocation58_spill] sm:$0xff]  ;;  %v7748_v7 = vadd.f32 %v11568_v41, %v11567_v20 }
 0x380   : > { %v4366_v26 = vadd.f32 %v7938_v51, %v4021_v9  ;;  %8309 = vmatprep.mubr.bf16.mxu0 %v4406_v45  ;;  %v4396_v13 = vmax.f32 %v4384_v27, 0.0  ;;  %v3313_v9 = vadd.f32 %v7794_v1, %v7742_v31  ;;  %v5820_v51 = vsel %vm4823_vm4, %v5818_v37, %v11561_v4  ;;  %v10839_v45 = vld [vmem:[#allocation2 + $0x48] sm:$0xff]  }
 0x381   : > { %v7940_v14 = vpop.f32.mrf.mxu1  ;;  %6025 = vmatmul.mubr.bf16.gmra.mxu1 %v5861_v5  ;;  %v5866_v11 = vrot.slane %v5820_v51, 2  ;;  %v4024_v28 = vadd.f32 %v7895_v3, %v3626_v57  ;;  %v5864_v37 = vrot.slane %v10839_v45, 2  ;;  %v3318_v1 = vadd.f32 %v7797_v23, %v11571_v56  ;;  %v10864_v51 = vld [vmem:[#allocation2 + $0x50] sm:$0xff]  }
 0x382   : > { %v4385_v2 = vadd.f32 %v10772_v42, %v4366_v26  ;;  %v7941_v54 = vadd.f32 %v7940_v14, %v7939_v62  ;;  %v3627_v27 = vadd.f32 %v7846_v50, %v3313_v9  ;;  %v7898_v26 = vadd.f32 %v10781_v6, %v10756_v22  ;;  %v7905_v14 = vpop.f32.mrf.mxu0  ;;  %v11569_v22 = vld [vmem:[#allocation72_spill] sm:$0xff]  ;;  %v11570_v6 = vld [vmem:[#allocation74_spill] sm:$0xff] }
 0x383   : > { %v7942_v33 = vpop.f32.mrf.mxu1  ;;  %v5867_v24 = vsel %vm4868_vm5, %v5862_v36, %v5866_v11  ;;  %v7800_v12 = vadd.f32 %v11570_v6, %v11569_v22  ;;  %v5865_v48 = vsel %vm4868_vm5, %v5860_v53, %v5864_v37  ;;  %v11573_v36 = vld [vmem:[#allocation91_spill] sm:$0xff]  ;;  %v3628_v39 = vadd.f32 %v7849_v29, %v3318_v1  ;;  %v8759_v53 = vld [vmem:[#allocation14 + $0x20] sm:$0xff]   ;;  %v11575_v9 = vld [vmem:[#allocation78_spill] sm:$0xff] }
 0x384   : > { %v4397_v17 = vmax.f32 %v4385_v2, 0.0  ;;  %v4367_v25 = vadd.f32 %v7941_v54, %v4022_v15  ;;  %v8756_v54 = vld [vmem:[#allocation14 + $0x28] sm:$0xff]   ;;  %6032 = vmatprep.mubr.bf16.mxu1 %v5867_v24  ;;  %v4025_v55 = vadd.f32 %v7898_v26, %v3627_v27  ;;  %v7906_v50 = vpop.f32.mrf.mxu0  ;;  %v7904_v23 = vadd.f32 %v7903_v30, %v10823_v40  ;;  %v11578_v29 = vld [vmem:[#allocation80_spill] sm:$0xff] }
 0x385   : > { %v7943_v18 = vpop.f32.mrf.mxu1  ;;  %v5868_v27 = vrot.slane %v10864_v51, 2  ;;  %v11581_v24 = vld [vmem:[#allocation82_spill] sm:$0xff]  ;;  %v7858_v56 = vadd.f32 %v10741_v60, %v10734_v59 }
 0x386   : > { %v4407_v61 = vpack.c.bf16 %v4397_v17, %v4396_v13  ;;  %v7944_v21 = vadd.f32 %v7943_v18, %v7942_v33  ;;  %v4386_v16 = vadd.f32 %v10772_v42, %v4367_v25  ;;  %v7901_v17 = vadd.f32 %v10810_v32, %v10795_v49  ;;  %v11572_v25 = vld [vmem:[#allocation90_spill] sm:$0xff] }
 0x387   : > { %v7945_v19 = vpop.f32.mrf.mxu1  ;;  %v7852_v57 = vadd.f32 %v11573_v36, %v11572_v25  ;;  %v10883_v25 = vld [vmem:[#allocation2 + $0x58] sm:$0xff]  }
 0x388   : > { %v4368_v62 = vadd.f32 %v7944_v21, %v4023_v8  ;;  %8310 = vmatmul.mubr.bf16.vlgmr.msra.gmra.mxu0 %v4407_v61  ;;  %v4398_v33 = vmax.f32 %v4386_v16, 0.0  ;;  %v3321_v61 = vadd.f32 %v7800_v12, %v7748_v7  ;;  %v11574_v21 = vld [vmem:[#allocation76_spill] sm:$0xff]  ;;  %v4026_v26 = vadd.f32 %v7901_v17, %v3628_v39 }
 0x389   : > { %v7946_v15 = vpop.f32.mrf.mxu1  ;;  %8322 = vmatpush3.bf16.msra.mxu0 %v11564_v35  ;;  %6033 = vmatmul.mubr.bf16.gmra.mxu1 %v5865_v48  ;;  %v11577_v16 = vld [vmem:[#allocation92_spill] sm:$0xff]  ;;  %v5871_v59 = vrot.slane %v10883_v25, 2 }
 0x38a   : > { %v4387_v63 = vadd.f32 %v10772_v42, %v4368_v62  ;;  %v7947_v2 = vadd.f32 %v7946_v15, %v7945_v19  ;;  %8323 = vmatprep.subr.bf16.mxu0 %v8753_v38  ;;  %v7803_v19 = vadd.f32 %v11575_v9, %v11574_v21  ;;  %v3629_v43 = vadd.f32 %v7852_v57, %v3321_v61  ;;  %v7908_v15 = vpop.f32.mrf.mxu0 }
 0x38b   : > { %v7948_v31 = vpop.f32.mrf.mxu1  ;;  %v7855_v62 = vadd.f32 %v10727_v58, %v11577_v16  ;;  %v5869_v58 = vsel %vm4868_vm5, %v5864_v37, %v5868_v27  ;;  %v8767_v37 = vld [vmem:[#allocation14 + $0x10] sm:$0xff]   ;;  %v5872_v61 = vsel %vm4868_vm5, %v5868_v27, %v5871_v59 }
 0x38c   : > { %v4399_v5 = vmax.f32 %v4387_v63, 0.0  ;;  %v4369_v13 = vadd.f32 %v7947_v2, %v4024_v28  ;;  %v11579_v63 = vld [vmem:[#allocation79_spill] sm:$0xff]  ;;  %v11580_v2 = vld [vmem:[#allocation81_spill] sm:$0xff]  ;;  %v4027_v6 = vadd.f32 %v7904_v23, %v3629_v43  ;;  %v7909_v1 = vpop.f32.mrf.mxu0  ;;  %v11584_v23 = vld [vmem:[#allocation50_spill] sm:$0xff] }
 0x38d   : > { %v7949_v3 = vpop.f32.mrf.mxu1  ;;  %8324 = vmatpush3.bf16.msra.mxu0 %v8753_v38  ;;  %v11576_v38 = vld [vmem:[#allocation60_spill] sm:$0xff]  ;;  %v7806_v40 = vadd.f32 %v11580_v2, %v11579_v63  ;;  %v8968_v43 = vld [vmem:[%s11415_s5] ss:$0 sm:$0xff]  ;;  %v11587_v63 = vld [vmem:[#allocation62_spill] sm:$0xff] }
 0x38e   : > { %v7950_v18 = vadd.f32 %v7949_v3, %v7948_v31  ;;  %v4408_v8 = vpack.c.bf16 %v4399_v5, %v4398_v33  ;;  %8325 = vmatprep.subr.bf16.mxu0 %v8756_v54  ;;  %v4388_v49 = vadd.f32 %v10772_v42, %v4369_v13  ;;  %v5870_v0 = vsel %vm4868_vm5, %v5866_v11, %v11576_v38  ;;  %v11583_v13 = vld [vmem:[#allocation63_spill] sm:$0xff] }
 0x38f   : > { %v7951_v4 = vpop.f32.mrf.mxu1  ;;  %6040 = vmatprep.mubr.bf16.mxu1 %v5870_v0  ;;  %v3326_v11 = vadd.f32 %v7803_v19, %v11578_v29  ;;  %v7907_v31 = vadd.f32 %v7906_v50, %v7905_v14  ;;  %v7910_v3 = vadd.f32 %v7909_v1, %v7908_v15  ;;  %v8773_v0 = vld [vmem:[#allocation14] sm:$0xff]   ;;  %v2536_v16 = vadd.f32 %v8968_v43, %v11584_v23  ;;  %v11590_v1 = vld [vmem:[#allocation55_spill] sm:$0xff]  ;;  %v8801_v23 = vld [vmem:[#allocation12 + $0x8] sm:$0xff]  }
 0x390   : > { %v4370_v32 = vadd.f32 %v7950_v18, %v4025_v55  ;;  %8313 = vmatprep.mubr.bf16.mxu0 %v4408_v8  ;;  %v4400_v41 = vmax.f32 %v4388_v49, 0.0  ;;  %v8770_v8 = vld [vmem:[#allocation14 + $0x8] sm:$0xff]  }
 0x391   : > { %v7952_v28 = vpop.f32.mrf.mxu1  ;;  %8326 = vmatpush3.bf16.msra.mxu0 %v8756_v54  ;;  %v11582_v54 = vld [vmem:[#allocation83_spill] sm:$0xff]  ;;  %v3630_v12 = vadd.f32 %v7855_v62, %v3326_v11  ;;  %6041 = vmatmul.mubr.bf16.gmra.mxu1 %v5869_v58  ;;  %v8850_v62 = vld [vmem:[#allocation2 + $0x60] ss:$0 sps:$4 sm:$0x33]   ;;  %v8777_v11 = vld [vmem:[#allocation12 + $0x78] sm:$0xff]  }
 0x392   : > { %v4389_v35 = vadd.f32 %v10772_v42, %v4370_v32  ;;  %v7953_v34 = vadd.f32 %v7952_v28, %v7951_v4  ;;  %8327 = vmatprep.subr.bf16.mxu0 %v8759_v53  ;;  %v7754_v20 = vadd.f32 %v11582_v54, %v11581_v24  ;;  %6048 = vmatprep.mubr.bf16.mxu1 %v11583_v13 }
 0x393   : > { %v7954_v30 = vpop.f32.mrf.mxu1  ;;  %v4028_v60 = vadd.f32 %v7907_v31, %v3630_v12 }
 0x394   : > { %v4401_v7 = vmax.f32 %v4389_v35, 0.0  ;;  %v4371_v22 = vadd.f32 %v7953_v34, %v4026_v26  ;;  %v3329_v36 = vadd.f32 %v7806_v40, %v7754_v20  ;;  %v11585_v26 = vld [vmem:[#allocation61_spill] sm:$0xff]  ;;  %v2580_v40 = vmax.f32 %v2536_v16, 0.0 }
 0x395   : > { %v7955_v48 = vpop.f32.mrf.mxu1  ;;  %8328 = vmatpush3.bf16.msra.mxu0 %v8759_v53  ;;  %v5875_v15 = vrot.slane %v11585_v26, 2  ;;  %v11586_v35 = vld [vmem:[#allocation49_spill] sm:$0xff] }
 0x396   : > { %v7956_v33 = vadd.f32 %v7955_v48, %v7954_v30  ;;  %v4409_v5 = vpack.c.bf16 %v4401_v7, %v4400_v41  ;;  %8329 = vmatprep.subr.bf16.mxu0 %v8764_v10  ;;  %v4390_v57 = vadd.f32 %v10772_v42, %v4371_v22  ;;  %v3631_v39 = vadd.f32 %v7858_v56, %v3329_v36  ;;  %v11588_v41 = vld [vmem:[#allocation52_spill] sm:$0xff]  ;;  %v11589_v22 = vld [vmem:[#allocation53_spill] sm:$0xff]  ;;  %v8780_v56 = vld [vmem:[#allocation12 + $0x70] sm:$0xff]  }
 0x397   : > { %v7957_v17 = vpop.f32.mrf.mxu1  ;;  %v2533_v34 = vadd.f32 %v8968_v43, %v11586_v35  ;;  %v5876_v2 = vsel %vm4868_vm5, %v11587_v63, %v5875_v15  ;;  %v2549_v7 = vadd.f32 %v8968_v43, %v11588_v41  ;;  %v8778_v48 = vld [vmem:[#allocation12 + $0x38] sm:$0xff]   ;;  %v8782_v36 = vld [vmem:[#allocation12 + $0x30] sm:$0xff]   ;;  %v8804_v16 = vld [vmem:[#allocation12 + $0x40] sm:$0xff]  }
 0x398   : > { %v4372_v14 = vadd.f32 %v7956_v33, %v4027_v6  ;;  %8314 = vmatmul.mubr.bf16.gmra.mxu0 %v4409_v5  ;;  %v4402_v21 = vmax.f32 %v4390_v57, 0.0  ;;  %v4029_v49 = vadd.f32 %v7910_v3, %v3631_v39  ;;  %v2565_v33 = vadd.f32 %v8968_v43, %v11590_v1  ;;  %v11591_v5 = vld [vmem:[#allocation57_spill] sm:$0xff]  ;;  %v8784_v57 = vld [vmem:[#allocation12 + $0x68] sm:$0xff]   ;;  %v8810_v15 = vld [vmem:[#allocation12 + $0x1b8] sm:$0xff]  }
 0x399   : > { %v7958_v55 = vpop.f32.mrf.mxu1  ;;  %8330 = vmatpush3.bf16.msra.mxu0 %v8764_v10  ;;  %6049 = vmatmul.mubr.bf16.gmra.mxu1 %v5872_v61  ;;  %v5873_v10 = vrot.slane %v8850_v62, 2  ;;  %v2579_v54 = vmax.f32 %v2533_v34, 0.0  ;;  %v2583_v12 = vmax.f32 %v2549_v7, 0.0  ;;  %v8969_v39 = vld [vmem:[#allocation2 + $0x4] sm:$0xf]  ;;  %v8791_v61 = vld [vmem:[#allocation12 + $0x58] sm:$0xff]  }
 0x39a   : > { %v4391_v50 = vadd.f32 %v10772_v42, %v4372_v14  ;;  %v7959_v18 = vadd.f32 %v7958_v55, %v7957_v17  ;;  %8331 = vmatprep.subr.bf16.mxu0 %v8767_v37  ;;  %6056 = vmatprep.mubr.bf16.mxu1 %v5876_v2  ;;  %v11592_v17 = vld [vmem:[#allocation51_spill] sm:$0xff]  ;;  %v2587_v14 = vmax.f32 %v2565_v33, 0.0  ;;  %v4699_v55 = vld [vmem:[#allocation2] sm:$0xe]  ;;  %v8806_v62 = vld [vmem:[#allocation12] sm:$0xff]  }
 0x39b   : > { %v7960_v53 = vpop.f32.mrf.mxu1  ;;  %v5874_v30 = vsel %vm4868_vm5, %v5871_v59, %v5873_v10  ;;  %v2591_v6 = vpack.c.bf16 %v2580_v40, %v2579_v54  ;;  %v8785_v59 = vld [vmem:[#allocation12 + $0x28] sm:$0xff]   ;;  %v8813_v35 = vld [vmem:[#allocation12 + $0x1f0] sm:$0xff]   ;;  %v8825_v54 = vld [vmem:[#allocation12 + $0x1d8] sm:$0xff]  }
 0x39c   : > { %v4403_v9 = vmax.f32 %v4391_v50, 0.0  ;;  %v4373_v19 = vadd.f32 %v7959_v18, %v4028_v60  ;;  %v8789_v60 = vld [vmem:[#allocation12 + $0x60] sm:$0xff]   ;;  %v7255_v50 = vcombine.low %v4699_v55, %v8969_v39  ;;  %v8814_v10 = vld [vmem:[#allocation12 + $0x1b0] sm:$0xff]   ;;  %v8818_v2 = vld [vmem:[#allocation12 + $0x1a8] sm:$0xff]  }
 0x39d   : > { %v7961_v4 = vpop.f32.mrf.mxu1  ;;  %8332 = vmatpush3.bf16.msra.mxu0 %v8767_v37  ;;  %v2568_v37 = vadd.f32 %v8968_v43, %v11591_v5  ;;  %v8826_v41 = vld [vmem:[#allocation12 + $0x198] sm:$0xff]   ;;  %v8833_v1 = vld [vmem:[#allocation12 + $0x1c8] sm:$0xff]  }
 0x39e   : > { %v7962_v32 = vadd.f32 %v7961_v4, %v7960_v53  ;;  %v4410_v38 = vpack.c.bf16 %v4403_v9, %v4402_v21  ;;  %8333 = vmatprep.subr.bf16.mxu0 %v8770_v8  ;;  %v4392_v28 = vadd.f32 %v10772_v42, %v4373_v19  ;;  %v8790_v53 = vld [vmem:[#allocation12 + $0x20] sm:$0xff]   ;;  %v4743_v21 = vrot.slane %v7255_v50, 1  ;;  %v8970_v9 = vld [vmem:[#allocation2 + $0x8] sm:$0xff]   ;;  %v8793_v4 = vld [vmem:[#allocation12 + $0x18] sm:$0xff]  }
 0x39f   : > { %v2588_v3 = vmax.f32 %v2568_v37, 0.0  ;;  %v4744_v19 = vrot.slane %v8970_v9, 1  ;;  %v5522_v50 = vld [vmem:[#allocation2 + $0x30] sm:$0xe] }
 0x3a0   : > { %v4374_v27 = vadd.f32 %v7962_v32, %v4029_v49  ;;  %8317 = vmatprep.mubr.bf16.mxu0 %v4410_v38  ;;  %v4404_v58 = vmax.f32 %v4392_v28, 0.0  ;;  %v8795_v49 = vld [vmem:[#allocation12 + $0x50] sm:$0xff]   ;;  %v11594_v38 = vld [vmem:[#allocation56_spill] sm:$0xff] }
 0x3a1   : > { %8334 = vmatpush3.bf16.msra.mxu0 %v8770_v8  ;;  %6057 = vmatmul.mubr.bf16.gmra.mxu1 %v5874_v30  ;;  %v2595_v18 = vpack.c.bf16 %v2588_v3, %v2587_v14  ;;  %v11593_v8 = vld [vmem:[#allocation54_spill] sm:$0xff]  ;;  %v4745_v32 = vsel %vm1357_vm3, %v4743_v21, %v4744_v19  ;;  %v8809_v28 = vld [vmem:[#allocation12 + $0x1f8] sm:$0xff]   ;;  %v8821_v30 = vld [vmem:[#allocation12 + $0x1e0] sm:$0xff]  }
 0x3a2   : > { %v4393_v29 = vadd.f32 %v10772_v42, %v4374_v27  ;;  %8335 = vmatprep.subr.bf16.mxu0 %v8773_v0  ;;  %v2552_v42 = vadd.f32 %v8968_v43, %v11589_v22  ;;  %v8800_v43 = vld [vmem:[#allocation12 + $0x48] sm:$0xff]   ;;  %v8971_v27 = vld [vmem:[#allocation2 + $0x10] sm:$0xff]  }
 0x3a3   : > { %v4746_v26 = vrot.slane %v8971_v27, 1  ;;  %v8829_v22 = vld [vmem:[#allocation12 + $0x1d0] sm:$0xff]  }
 0x3a4   : > { %v4405_v24 = vmax.f32 %v4393_v29, 0.0  ;;  %v2584_v31 = vmax.f32 %v2552_v42, 0.0  ;;  %v8817_v29 = vld [vmem:[#allocation12 + $0x1e8] sm:$0xff]  }
 0x3a5   : > { %8336 = vmatpush3.bf16.msra.mxu0 %v8773_v0  ;;  %v8797_v0 = vld [vmem:[#allocation12 + $0x10] sm:$0xff]   ;;  %v4747_v34 = vsel %vm1357_vm3, %v4744_v19, %v4746_v26 }
 0x3a6   : > { %v4411_v20 = vpack.c.bf16 %v4405_v24, %v4404_v58  ;;  %8043 = vmatprep.subr.bf16.mxu0 %v8777_v11  ;;  %v2593_v13 = vpack.c.bf16 %v2584_v31, %v2583_v12  ;;  %v8972_v11 = vld [vmem:[#allocation2 + $0x18] sm:$0xff]   ;;  %v8973_v24 = vld [vmem:[#allocation2 + $0x20] sm:$0xff]   ;;  %v8830_v31 = vld [vmem:[#allocation12 + $0x190] sm:$0xff]  }
 0x3a7   : > { %v4748_v63 = vrot.slane %v8972_v11, 1  ;;  %v8822_v58 = vld [vmem:[#allocation12 + $0x1a0] sm:$0xff]  }
 0x3a8   : > { %8318 = vmatmul.mubr.bf16.gmra.mxu0 %v4411_v20 }
 0x3a9   : > { %8337 = vmatprep.mubr.bf16.mxu0 %v2591_v6  ;;  %v4749_v40 = vsel %vm1357_vm3, %v4746_v26, %v4748_v63 }
 0x3b0   : > { %8338 = vmatmul.mubr.bf16.vlgmr.msra.gmra.mxu0 %v11592_v17 }
 0x3b1   : > { %8044 = vmatpush3.bf16.msra.mxu0 %v8778_v48  ;;  %8341 = vmatprep.mubr.bf16.mxu0 %v2593_v13  ;;  %v8974_v48 = vld [vmem:[#allocation2 + $0x28] sm:$0xff]  }
 0x3b2   : > { %8045 = vmatprep.subr.bf16.mxu0 %v8780_v56  ;;  %v4752_v56 = vrot.slane %v8974_v48, 1  ;;  %v8834_v13 = vld [vmem:[#allocation12 + $0x188] sm:$0xff]  }
 0x3b5   : > { %8046 = vmatpush3.bf16.msra.mxu0 %v8782_v36  ;;  %v8837_v36 = vld [vmem:[#allocation2 + $0x30] ss:$0 sps:$4 sm:$0x11]  }
 0x3b6   : > { %8047 = vmatprep.subr.bf16.mxu0 %v8784_v57  ;;  %v8839_v57 = vld [vmem:[#allocation12 + $0x1c0] sm:$0xff]  }
 0x3b8   : > { %8342 = vmatmul.mubr.bf16.gmra.mxu0 %v11593_v8 }
 0x3b9   : > { %8048 = vmatpush3.bf16.msra.mxu0 %v8785_v59  ;;  %8345 = vmatprep.mubr.bf16.mxu0 %v2595_v18  ;;  %v8841_v59 = vld [vmem:[#allocation12 + $0x180] sm:$0xff]  }
 0x3ba   : > { %8049 = vmatprep.subr.bf16.mxu0 %v8789_v60  ;;  %v4754_v60 = vrot.slane %v8837_v36, 1  ;;  %v8856_v36 = vld [vmem:[#allocation14 + $0x98] sm:$0xff]  }
 0x3bd   : > { %8050 = vmatpush3.bf16.msra.mxu0 %v8790_v53  ;;  %v4755_v53 = vsel %vm1357_vm3, %v4752_v56, %v4754_v60 }
 0x3be   : > { %8051 = vmatprep.subr.bf16.mxu0 %v8791_v61  ;;  %v7317_v61 = vcombine.low %v5522_v50, %v10783_v47 }
 0x3c0   : > { %8346 = vmatmul.mubr.bf16.gmra.mxu0 %v11594_v38 }
 0x3c1   : > { %8052 = vmatpush3.bf16.msra.mxu0 %v8793_v4  ;;  %5212 = vmatprep.mubr.bf16.mxu0 %v4745_v32  ;;  %v5566_v4 = vrot.slane %v7317_v61, 1 }
 0x3c2   : > { %8053 = vmatprep.subr.bf16.mxu0 %v8795_v49  ;;  %v5567_v49 = vrot.slane %v10788_v44, 1 }
 0x3c5   : > { %8054 = vmatpush3.bf16.msra.mxu0 %v8797_v0 }
 0x3c6   : > { %8055 = vmatprep.subr.bf16.mxu0 %v8800_v43  ;;  %v5568_v43 = vsel %vm1357_vm3, %v5566_v4, %v5567_v49 }
 0x3c9   : > { %8056 = vmatpush3.bf16.msra.mxu0 %v8801_v23 }
 0x3ca   : > { %8057 = vmatprep.subr.bf16.mxu0 %v8804_v16 }
 0x3cc   : > { %v8007_v20 = vpop.f32.mrf.mxu1 }
 0x3cd   : > { %8058 = vmatpush3.bf16.msra.mxu0 %v8806_v62 }
 0x3ce   : > { %8147 = vmatprep.subr.bf16.mxu0 %v8809_v28  ;;  %v8008_v42 = vpop.f32.mrf.mxu1  ;;  %v5510_v28 = vld [vmem:[#allocation2 + $0x30] sm:$0xf] }
 0x3cf   : > { %v10912_v6 = vadd.f32 %v8008_v42, %v8007_v20  ;;  %v5573_v20 = vrot.slane %v10864_v51, 1  ;;  %v5575_v42 = vrot.slane %v10883_v25, 1 }
 0x3d0   : > { %5213 = vmatmul.mubr.bf16.vlgmr.msra.gmra.mxu0 %v10765_v52  ;;  %v4750_v52 = vrot.slane %v8973_v24, 1  ;;  %v8010_v12 = vpop.f32.mrf.mxu1 }
 0x3d1   : > { %8148 = vmatpush3.bf16.msra.mxu0 %v8810_v15  ;;  %5220 = vmatprep.mubr.bf16.mxu0 %v4747_v34 }
 0x3d2   : > { %8149 = vmatprep.subr.bf16.mxu0 %v8813_v35  ;;  %v4751_v7 = vsel %vm1357_vm3, %v4748_v63, %v4750_v52  ;;  %v8011_v33 = vpop.f32.mrf.mxu1  ;;  %v4753_v17 = vsel %vm1357_vm3, %v4750_v52, %v4752_v56  ;;  %v7311_v35 = vcombine.low %v5510_v28, %v10783_v47  ;;  %v8852_v56 = vld [vmem:[#allocation14 + $0xb8] sm:$0xff]  }
 0x3d3   : > { %v10914_v5 = vadd.f32 %v8011_v33, %v8010_v12  ;;  %v5576_v12 = vsel %vm1357_vm3, %v5573_v20, %v5575_v42 }
 0x3d5   : > { %8150 = vmatpush3.bf16.msra.mxu0 %v8814_v10 }
 0x3d6   : > { %8151 = vmatprep.subr.bf16.mxu0 %v8817_v29  ;;  %v8013_v37 = vpop.f32.mrf.mxu1 }
 0x3d8   : > { %5221 = vmatmul.mubr.bf16.gmra.mxu0 %v8970_v9  ;;  %v8014_v14 = vpop.f32.mrf.mxu1 }
 0x3d9   : > { %8152 = vmatpush3.bf16.msra.mxu0 %v8818_v2  ;;  %5228 = vmatprep.mubr.bf16.mxu0 %v4749_v40  ;;  %v10917_v3 = vadd.f32 %v8014_v14, %v8013_v37  ;;  %v5571_v2 = vrot.slane %v10839_v45, 1  ;;  %v8854_v37 = vld [vmem:[#allocation14 + $0xa8] sm:$0xff]  }
 0x3da   : > { %8153 = vmatprep.subr.bf16.mxu0 %v8821_v30  ;;  %v8016_v55 = vpop.f32.mrf.mxu1 }
 0x3dc   : > { %v8017_v39 = vpop.f32.mrf.mxu1 }
 0x3dd   : > { %8154 = vmatpush3.bf16.msra.mxu0 %v8822_v58  ;;  %v10919_v18 = vadd.f32 %v8017_v39, %v8016_v55  ;;  %v8857_v55 = vld [vmem:[#allocation14 + $0x90] sm:$0xff]   ;;  %v8858_v39 = vld [vmem:[#allocation14 + $0x88] sm:$0xff]  }
 0x3de   : > { %8155 = vmatprep.subr.bf16.mxu0 %v8825_v54 }
 0x3e0   : > { %5229 = vmatmul.mubr.bf16.gmra.mxu0 %v8971_v27  ;;  %v5569_v27 = vrot.slane %v10815_v46, 1 }
 0x3e1   : > { %5236 = vmatprep.mubr.bf16.mxu0 %v4751_v7  ;;  %8156 = vmatpush3.bf16.msra.mxu0 %v8826_v41 }
 0x3e2   : > { %8157 = vmatprep.subr.bf16.mxu0 %v8829_v22  ;;  %v5570_v10 = vsel %vm1357_vm3, %v5567_v49, %v5569_v27  ;;  %v5574_v22 = vsel %vm1357_vm3, %v5571_v2, %v5573_v20 }
 0x3e5   : > { %8158 = vmatpush3.bf16.msra.mxu0 %v8830_v31  ;;  %v8851_v31 = vld [vmem:[#allocation2 + $0x60] ss:$0 sps:$4 sm:$0x11]  }
 0x3e6   : > { %8159 = vmatprep.subr.bf16.mxu0 %v8833_v1 }
 0x3e7   : > { %v8019_v8 = vpop.f32.mrf.mxu1 }
 0x3e8   : > { %5237 = vmatmul.mubr.bf16.gmra.mxu0 %v8972_v11 }
 0x3e9   : > { %5244 = vmatprep.mubr.bf16.mxu0 %v4753_v17  ;;  %8160 = vmatpush3.bf16.msra.mxu0 %v8834_v13  ;;  %v8020_v21 = vpop.f32.mrf.mxu1 }
 0x3ea   : > { %8161 = vmatprep.subr.bf16.mxu0 %v8839_v57  ;;  %v10923_v9 = vadd.f32 %v8020_v21, %v8019_v8 }
 0x3eb   : > { %v8022_v19 = vpop.f32.mrf.mxu1 }
 0x3ed   : > { %8162 = vmatpush3.bf16.msra.mxu0 %v8841_v59  ;;  %v8023_v32 = vpop.f32.mrf.mxu1 }
 0x3ee   : > { %v10926_v38 = vadd.f32 %v8023_v32, %v8022_v19  ;;  %8349 = vmatprep.subr.bf16.mxu0 %v8852_v56 }
 0x3ef   : > { %v8025_v0 = vpop.f32.mrf.mxu1 }
 0x3f0   : > { %5245 = vmatmul.mubr.bf16.gmra.mxu0 %v8973_v24  ;;  %v5572_v24 = vsel %vm1357_vm3, %v5569_v27, %v5571_v2 }
 0x3f1   : > { %5252 = vmatprep.mubr.bf16.mxu0 %v4755_v53  ;;  %v8026_v23 = vpop.f32.mrf.mxu1  ;;  %v8859_v53 = vld [vmem:[#allocation14 + $0x80] sm:$0xff]  }
 0x3f2   : > { %v10929_v16 = vadd.f32 %v8026_v23, %v8025_v0 }
 0x3f3   : > { %v8028_v62 = vpop.f32.mrf.mxu1 }
 0x3f5   : > { %v8029_v26 = vpop.f32.mrf.mxu1 }
 0x3f6   : > { %v10932_v15 = vadd.f32 %v8029_v26, %v8028_v62 }
 0x3f8   : > { %5253 = vmatmul.mubr.bf16.gmra.mxu0 %v8974_v48 }
 0x3f9   : > { %5746 = vmatprep.mubr.bf16.mxu0 %v5568_v43  ;;  %v8031_v34 = vpop.f32.mrf.mxu1 }
 0x3fb   : > { %v8032_v29 = vpop.f32.mrf.mxu1 }
 0x3fc   : > { %v10936_v11 = vadd.f32 %v8032_v29, %v8031_v34 }
 0x3fd   : > { %v8034_v63 = vpop.f32.mrf.mxu1 }
 0x3fe   : > { %11595 = vst [vmem:[#allocation64_spill] sm:$0xff] %v10936_v11 }
 0x3ff   : > { %v8035_v40 = vpop.f32.mrf.mxu1 }
 0x400   : > { %5747 = vmatmul.mubr.bf16.vlgmr.msra.gmra.mxu0 %v7311_v35  ;;  %v10939_v30 = vadd.f32 %v8035_v40, %v8034_v63 }
 0x401   : > { %5754 = vmatprep.mubr.bf16.mxu0 %v5570_v10  ;;  %v8037_v58 = vpop.f32.mrf.mxu1  ;;  %8350 = vmatpush3.bf16.msra.mxu0 %v8852_v56 }
 0x402   : > { %11596 = vst [vmem:[#allocation84_spill] sm:$0xff] %v10939_v30 }
 0x403   : > { %v8038_v52 = vpop.f32.mrf.mxu1 }
 0x404   : > { %v10943_v47 = vadd.f32 %v8038_v52, %v8037_v58 }
 0x405   : > { %v8040_v54 = vpop.f32.mrf.mxu1 }
 0x406   : > { %11597 = vst [vmem:[#allocation85_spill] sm:$0xff] %v10943_v47 }
 0x407   : > { %v8041_v41 = vpop.f32.mrf.mxu1 }
 0x408   : > { %5755 = vmatmul.mubr.bf16.gmra.mxu0 %v10788_v44  ;;  %v10946_v7 = vadd.f32 %v8041_v41, %v8040_v54  ;;  %v5577_v44 = vrot.slane %v8851_v31, 1 }
 0x409   : > { %5762 = vmatprep.mubr.bf16.mxu0 %v5572_v24  ;;  %v10956_v1 = vpop.f32.mrf.mxu1 }
 0x40a   : > { %11598 = vst [vmem:[#allocation66_spill] sm:$0xff] %v10946_v7  ;;  %v5578_v48 = vsel %vm1357_vm3, %v5575_v42, %v5577_v44 }
 0x40b   : > { %v10958_v33 = vpop.f32.mrf.mxu1 }
 0x410   : > { %5763 = vmatmul.mubr.bf16.gmra.mxu0 %v10815_v46  ;;  %v8853_v46 = vld [vmem:[#allocation14 + $0xb0] sm:$0xff]  }
 0x411   : > { %5770 = vmatprep.mubr.bf16.mxu0 %v5574_v22  ;;  %8351 = vmatprep.subr.bf16.mxu0 %v8853_v46 }
 0x412   : > { %8352 = vmatpush3.bf16.msra.mxu0 %v8853_v46 }
 0x413   : > { %8353 = vmatprep.subr.bf16.mxu0 %v8854_v37 }
 0x416   : > { %8354 = vmatpush3.bf16.msra.mxu0 %v8854_v37 }
 0x418   : > { %5771 = vmatmul.mubr.bf16.gmra.mxu0 %v10839_v45  ;;  %v10960_v45 = vpop.f32.mrf.mxu1 }
 0x419   : > { %5778 = vmatprep.mubr.bf16.mxu0 %v5576_v12 }
 0x41a   : > { %v10962_v13 = vpop.f32.mrf.mxu1 }
 0x41c   : > { %v10964_v17 = vpop.f32.mrf.mxu1 }
 0x420   : > { %5779 = vmatmul.mubr.bf16.gmra.mxu0 %v10864_v51  ;;  %v8855_v51 = vld [vmem:[#allocation14 + $0xa0] sm:$0xff]  }
 0x421   : > { %5786 = vmatprep.mubr.bf16.mxu0 %v5578_v48  ;;  %8355 = vmatprep.subr.bf16.mxu0 %v8855_v51 }
 0x422   : > { %8356 = vmatpush3.bf16.msra.mxu0 %v8855_v51 }
 0x423   : > { %8357 = vmatprep.subr.bf16.mxu0 %v8856_v36 }
 0x426   : > { %8358 = vmatpush3.bf16.msra.mxu0 %v8856_v36 }
 0x427   : > { %8359 = vmatprep.subr.bf16.mxu0 %v8857_v55 }
 0x428   : > { %5787 = vmatmul.mubr.bf16.gmra.mxu0 %v10883_v25  ;;  %v10966_v25 = vpop.f32.mrf.mxu1 }
 0x42a   : > { %v10968_v57 = vpop.f32.mrf.mxu1  ;;  %8360 = vmatpush3.bf16.msra.mxu0 %v8857_v55 }
 0x42b   : > { %8361 = vmatprep.subr.bf16.mxu0 %v8858_v39 }
 0x42c   : > { %v10970_v59 = vpop.f32.mrf.mxu1 }
 0x42e   : > { %v10972_v50 = vpop.f32.mrf.mxu1  ;;  %8362 = vmatpush3.bf16.msra.mxu0 %v8858_v39 }
 0x42f   : > { %8363 = vmatprep.subr.bf16.mxu0 %v8859_v53 }
 0x430   : > { %v10974_v61 = vpop.f32.mrf.mxu1 }
 0x432   : > { %8364 = vmatpush3.bf16.msra.mxu0 %v8859_v53  ;;  %v10976_v4 = vpop.f32.mrf.mxu1 }
 0x434   : > { %v10978_v32 = vpop.f32.mrf.mxu1 }
 0x436   : > { %v10980_v43 = vpop.f32.mrf.mxu1 }
 0x438   : > { %v10982_v62 = vpop.f32.mrf.mxu1 }
 0x43a   : > { %v10984_v26 = vpop.f32.mrf.mxu1 }
 0x43b   : > { %11599 = vst [vmem:[#allocation68_spill] sm:$0xff] %v10984_v26 }
 0x43c   : > { %v10986_v10 = vpop.f32.mrf.mxu1 }
 0x43d   : > { %11600 = vst [vmem:[#allocation70_spill] sm:$0xff] %v10986_v10 }
 0x43e   : > { %v10990_v40 = vpop.f32.mrf.mxu1 }
 0x43f   : > { %11602 = vst [vmem:[#allocation67_spill] sm:$0xff] %v10990_v40 }
 0x440   : > { %v10996_v20 = vpop.f32.mrf.mxu1 }
 0x441   : > { %11605 = vst [vmem:[#allocation59_spill] sm:$0xff] %v10996_v20 }
 0x442   : > { %v11002_v31 = vpop.f32.mrf.mxu1 }
 0x443   : > { %11608 = vst [vmem:[#allocation58_spill] sm:$0xff] %v11002_v31 }
 0x444   : > { %v11008_v37 = vpop.f32.mrf.mxu1 }
 0x445   : > { %11611 = vst [vmem:[#allocation75_spill] sm:$0xff] %v11008_v37 }
 0x448   : > { %v8311_v14 = vpop.f32.mrf.mxu0 }
 0x44a   : > { %v4511_v60 = vpop.f32.mrf.mxu0 }
 0x44c   : > { %v8312_v8 = vpop.f32.mrf.mxu0 }
 0x44e   : > { %v4514_v21 = vpop.f32.mrf.mxu0 }
 0x458   : > { %v8315_v19 = vpop.f32.mrf.mxu0 }
 0x45a   : > { %v4527_v49 = vpop.f32.mrf.mxu0 }
 0x45c   : > { %v8316_v0 = vpop.f32.mrf.mxu0 }
 0x45e   : > { %v4530_v23 = vpop.f32.mrf.mxu0 }
 0x468   : > { %v8319_v28 = vpop.f32.mrf.mxu0 }
 0x46a   : > { %v4543_v27 = vpop.f32.mrf.mxu0 }
 0x46c   : > { %v8320_v35 = vpop.f32.mrf.mxu0 }
 0x46e   : > { %v4546_v34 = vpop.f32.mrf.mxu0 }
 0x470   : > { %v8339_v29 = vpop.f32.mrf.mxu0 }
 0x471   : > { %v10988_v63 = vadd.f32 %v8339_v29, %v8311_v14 }
 0x472   : > { %v4640_v2 = vpop.f32.mrf.mxu0 }
 0x473   : > { %11601 = vst [vmem:[#allocation65_spill] sm:$0xff] %v10988_v63  ;;  %v10992_v58 = vadd.f32 %v4640_v2, %v4511_v60  ;;  %v11014_v60 = vpop.f32.mrf.mxu1 }
 0x474   : > { %v8340_v24 = vpop.f32.mrf.mxu0  ;;  %11614 = vst [vmem:[#allocation74_spill] sm:$0xff] %v11014_v60 }
 0x475   : > { %11603 = vst [vmem:[#allocation86_spill] sm:$0xff] %v10992_v58  ;;  %v10994_v52 = vadd.f32 %v8340_v24, %v8312_v8 }
 0x476   : > { %v4643_v54 = vpop.f32.mrf.mxu0 }
 0x477   : > { %11604 = vst [vmem:[#allocation87_spill] sm:$0xff] %v10994_v52  ;;  %v10998_v41 = vadd.f32 %v4643_v54, %v4514_v21 }
 0x478   : > { %v8343_v22 = vpop.f32.mrf.mxu0 }
 0x479   : > { %11606 = vst [vmem:[#allocation69_spill] sm:$0xff] %v10998_v41  ;;  %v11000_v42 = vadd.f32 %v8343_v22, %v8315_v19  ;;  %v11020_v19 = vpop.f32.mrf.mxu1 }
 0x47a   : > { %v4656_v12 = vpop.f32.mrf.mxu0  ;;  %11617 = vst [vmem:[#allocation91_spill] sm:$0xff] %v11020_v19 }
 0x47b   : > { %11607 = vst [vmem:[#allocation71_spill] sm:$0xff] %v11000_v42  ;;  %v11004_v44 = vadd.f32 %v4656_v12, %v4527_v49 }
 0x47c   : > { %v8344_v48 = vpop.f32.mrf.mxu0 }
 0x47d   : > { %11609 = vst [vmem:[#allocation88_spill] sm:$0xff] %v11004_v44  ;;  %v11006_v56 = vadd.f32 %v8344_v48, %v8316_v0  ;;  %v11024_v0 = vpop.f32.mrf.mxu1 }
 0x47e   : > { %v4659_v46 = vpop.f32.mrf.mxu0  ;;  %11619 = vst [vmem:[#allocation78_spill] sm:$0xff] %v11024_v0 }
 0x47f   : > { %11610 = vst [vmem:[#allocation89_spill] sm:$0xff] %v11006_v56  ;;  %v11010_v51 = vadd.f32 %v4659_v46, %v4530_v23  ;;  %v11026_v23 = vpop.f32.mrf.mxu1 }
 0x480   : > { %v8347_v36 = vpop.f32.mrf.mxu0  ;;  %11620 = vst [vmem:[#allocation60_spill] sm:$0xff] %v11026_v23 }
 0x481   : > { %11612 = vst [vmem:[#allocation77_spill] sm:$0xff] %v11010_v51  ;;  %v11012_v14 = vadd.f32 %v8347_v36, %v8319_v28  ;;  %v8215_v2 = vpop.f32.mrf.mxu1 }
 0x482   : > { %v4672_v55 = vpop.f32.mrf.mxu0 }
 0x483   : > { %11613 = vst [vmem:[#allocation72_spill] sm:$0xff] %v11012_v14  ;;  %v11016_v39 = vadd.f32 %v4672_v55, %v4543_v27  ;;  %v8216_v22 = vpop.f32.mrf.mxu1 }
 0x484   : > { %v8348_v8 = vpop.f32.mrf.mxu0  ;;  %v8217_v26 = vadd.f32 %v8216_v22, %v8215_v2 }
 0x485   : > { %11615 = vst [vmem:[#allocation73_spill] sm:$0xff] %v11016_v39  ;;  %v11018_v53 = vadd.f32 %v8348_v8, %v8320_v35  ;;  %v8218_v48 = vpop.f32.mrf.mxu1 }
 0x486   : > { %v4675_v21 = vpop.f32.mrf.mxu0 }
 0x487   : > { %11616 = vst [vmem:[#allocation90_spill] sm:$0xff] %v11018_v53  ;;  %v11022_v49 = vadd.f32 %v4675_v21, %v4546_v34  ;;  %v8219_v36 = vpop.f32.mrf.mxu1 }
 0x489   : > { %11618 = vst [vmem:[#allocation76_spill] sm:$0xff] %v11022_v49  ;;  %v8221_v34 = vpop.f32.mrf.mxu1 }
 0x48b   : > { %v8222_v53 = vpop.f32.mrf.mxu1 }
 0x48d   : > { %v11032_v51 = vpop.f32.mrf.mxu1 }
 0x48f   : > { %v11038_v42 = vpop.f32.mrf.mxu1 }
 0x490   : > { %v8059_v29 = vpop.f32.mrf.mxu0 }
 0x491   : > { %v11044_v58 = vpop.f32.mrf.mxu1 }
 0x492   : > { %v8060_v28 = vpop.f32.mrf.mxu0 }
 0x493   : > { %v11050_v0 = vpop.f32.mrf.mxu1  ;;  %v8061_v47 = vadd.f32 %v8060_v28, %v8059_v29 }
 0x494   : > { %v8062_v24 = vpop.f32.mrf.mxu0 }
 0x495   : > { %v11056_v60 = vpop.f32.mrf.mxu1  ;;  %v5215_v20 = vadd.f32 %v8061_v47, %v10912_v6 }
 0x496   : > { %v8063_v54 = vpop.f32.mrf.mxu0 }
 0x497   : > { %v11062_v30 = vpop.f32.mrf.mxu1  ;;  %v8064_v40 = vadd.f32 %v8063_v54, %v8062_v24 }
 0x498   : > { %v8065_v27 = vpop.f32.mrf.mxu0 }
 0x49a   : > { %v8066_v12 = vpop.f32.mrf.mxu0 }
 0x49b   : > { %v8067_v10 = vadd.f32 %v8066_v12, %v8065_v27 }
 0x49c   : > { %v8068_v35 = vpop.f32.mrf.mxu0 }
 0x49e   : > { %v8069_v46 = vpop.f32.mrf.mxu0 }
 0x49f   : > { %v8070_v6 = vadd.f32 %v8069_v46, %v8068_v35 }
 0x4a0   : > { %v8071_v55 = vpop.f32.mrf.mxu0 }
 0x4a2   : > { %v8072_v8 = vpop.f32.mrf.mxu0 }
 0x4a4   : > { %v8074_v21 = vpop.f32.mrf.mxu0 }
 0x4a6   : > { %v8075_v49 = vpop.f32.mrf.mxu0 }
 0x4a8   : > { %v11028_v39 = vpop.f32.mrf.mxu0 }
 0x4aa   : > { %v11030_v14 = vpop.f32.mrf.mxu0 }
 0x4ac   : > { %v11034_v56 = vpop.f32.mrf.mxu0 }
 0x4ae   : > { %v11036_v44 = vpop.f32.mrf.mxu0 }
 0x4b0   : > { %v11040_v41 = vpop.f32.mrf.mxu0 }
 0x4b1   : > { %11621 = vst [vmem:[#allocation92_spill] sm:$0xff] %v11040_v41 }
 0x4b2   : > { %v11042_v52 = vpop.f32.mrf.mxu0 }
 0x4b3   : > { %11622 = vst [vmem:[#allocation80_spill] sm:$0xff] %v11042_v52 }
 0x4b4   : > { %v11046_v63 = vpop.f32.mrf.mxu0 }
 0x4b5   : > { %11623 = vst [vmem:[#allocation79_spill] sm:$0xff] %v11046_v63 }
 0x4b6   : > { %v11048_v23 = vpop.f32.mrf.mxu0 }
 0x4b7   : > { %11624 = vst [vmem:[#allocation81_spill] sm:$0xff] %v11048_v23  ;;  %v8113_v23 = vadd.f32 %v10958_v33, %v10956_v1  ;;  %v5223_v1 = vadd.f32 %v8067_v10, %v10917_v3 }
 0x4b8   : > { %v11052_v7 = vpop.f32.mrf.mxu0 }
 0x4b9   : > { %11625 = vst [vmem:[#allocation82_spill] sm:$0xff] %v11052_v7  ;;  %v11067_v7 = vpop.f32.mrf.mxu1  ;;  %v5498_v29 = vadd.f32 %v8113_v23, %v5215_v20 }
 0x4ba   : > { %v11054_v19 = vpop.f32.mrf.mxu0  ;;  %11629 = vst [vmem:[#allocation61_spill] sm:$0xff] %v11067_v7 }
 0x4bb   : > { %11626 = vst [vmem:[#allocation83_spill] sm:$0xff] %v11054_v19  ;;  %v5218_v19 = vadd.f32 %v8064_v40, %v10914_v5  ;;  %v11072_v24 = vpop.f32.mrf.mxu1  ;;  %v11078_v5 = vld [vmem:[%s11419_s9] ss:$0 sm:$0xff]  ;;  %v8073_v40 = vadd.f32 %v8072_v8, %v8071_v55 }
 0x4bc   : > { %v11058_v37 = vpop.f32.mrf.mxu0 }
 0x4bd   : > { %11627 = vst [vmem:[#allocation63_spill] sm:$0xff] %v11058_v37  ;;  %v11083_v23 = vpop.f32.mrf.mxu1 }
 0x4be   : > { %v11060_v31 = vpop.f32.mrf.mxu0 }
 0x4bf   : > { %11628 = vst [vmem:[#allocation50_spill] sm:$0xff] %v11060_v31  ;;  %v8116_v31 = vadd.f32 %v10962_v13, %v10960_v45  ;;  %v8220_v45 = vadd.f32 %v8219_v36, %v8218_v48  ;;  %v11090_v27 = vpop.f32.mrf.mxu1 }
 0x4c0   : > { %v8163_v63 = vpop.f32.mrf.mxu0 }
 0x4c1   : > { %v5499_v54 = vadd.f32 %v8116_v31, %v5218_v19  ;;  %v8122_v31 = vadd.f32 %v10970_v59, %v10968_v57  ;;  %v8223_v19 = vadd.f32 %v8222_v53, %v8221_v34  ;;  %v8125_v57 = vadd.f32 %v10974_v61, %v10972_v50  ;;  %v11099_v8 = vpop.f32.mrf.mxu1 }
 0x4c2   : > { %v8164_v11 = vpop.f32.mrf.mxu0  ;;  %v8226_v59 = vadd.f32 %v11038_v42, %v11032_v51  ;;  %v8128_v50 = vadd.f32 %v10978_v32, %v10976_v4  ;;  %v8131_v32 = vadd.f32 %v10982_v62, %v10980_v43  ;;  %v11633_v43 = vld [vmem:[#allocation70_spill] sm:$0xff] }
 0x4c3   : > { %v8165_v28 = vadd.f32 %v8164_v11, %v8163_v63  ;;  %v8119_v11 = vadd.f32 %v10966_v25, %v10964_v17  ;;  %v5226_v63 = vadd.f32 %v8070_v6, %v10919_v18  ;;  %v8076_v18 = vadd.f32 %v8075_v49, %v8074_v21 }
 0x4c4   : > { %v8166_v37 = vpop.f32.mrf.mxu0  ;;  %v8079_v49 = vadd.f32 %v11030_v14, %v11028_v39  ;;  %v8082_v39 = vadd.f32 %v11036_v44, %v11034_v56  ;;  %v11631_v44 = vld [vmem:[#allocation80_spill] sm:$0xff] }
 0x4c5   : > { %v5795_v52 = vadd.f32 %v8165_v28, %v5498_v29  ;;  %v5501_v25 = vadd.f32 %v8122_v31, %v5226_v63  ;;  %v11630_v63 = vld [vmem:[#allocation92_spill] sm:$0xff] }
 0x4c6   : > { %v8167_v47 = vpop.f32.mrf.mxu0  ;;  %v5239_v14 = vadd.f32 %v8079_v49, %v10929_v16  ;;  %v5242_v16 = vadd.f32 %v8082_v39, %v10932_v15  ;;  %v8085_v56 = vadd.f32 %v11631_v44, %v11630_v63  ;;  %v11632_v31 = vld [vmem:[#allocation68_spill] sm:$0xff] }
 0x4c7   : > { %v6065_v33 = vadd.f32 %v8217_v26, %v5795_v52  ;;  %v8168_v7 = vadd.f32 %v8167_v47, %v8166_v37  ;;  %v5500_v26 = vadd.f32 %v8119_v11, %v5223_v1  ;;  %v8240_v1 = vpop.f32.mrf.mxu1  ;;  %v8134_v62 = vadd.f32 %v11633_v43, %v11632_v31 }
 0x4c8   : > { %v8169_v41 = vpop.f32.mrf.mxu0 }
 0x4c9   : > { %v5796_v13 = vadd.f32 %v8168_v7, %v5499_v54  ;;  %v6084_v52 = vadd.f32 %v11078_v5, %v6065_v33  ;;  %v5231_v7 = vadd.f32 %v8073_v40, %v10923_v9  ;;  %v5234_v9 = vadd.f32 %v8076_v18, %v10926_v38  ;;  %v11637_v18 = vld [vmem:[#allocation81_spill] sm:$0xff] }
 0x4ca   : > { %v8170_v20 = vpop.f32.mrf.mxu0  ;;  %v8229_v38 = vadd.f32 %v11050_v0, %v11044_v58  ;;  %v8232_v58 = vadd.f32 %v11062_v30, %v11056_v60 }
 0x4cb   : > { %v6066_v3 = vadd.f32 %v8220_v45, %v5796_v13  ;;  %v8171_v10 = vadd.f32 %v8170_v20, %v8169_v41  ;;  %v6096_v41 = vmax.f32 %v6084_v52, 0.0  ;;  %v5502_v29 = vadd.f32 %v8125_v57, %v5231_v7  ;;  %v8242_v20 = vpop.f32.mrf.mxu1  ;;  %v11636_v7 = vld [vmem:[#allocation79_spill] sm:$0xff] }
 0x4cc   : > { %v8172_v37 = vpop.f32.mrf.mxu0  ;;  %v5503_v6 = vadd.f32 %v8128_v50, %v5234_v9 }
 0x4cd   : > { %v5797_v2 = vadd.f32 %v8171_v10, %v5500_v26  ;;  %v6085_v17 = vadd.f32 %v11078_v5, %v6066_v3  ;;  %v5504_v26 = vadd.f32 %v8131_v32, %v5239_v14  ;;  %v11646_v32 = vld [vmem:[#allocation63_spill] sm:$0xff] }
 0x4ce   : > { %v8173_v22 = vpop.f32.mrf.mxu0 }
 0x4cf   : > { %v6067_v12 = vadd.f32 %v8223_v19, %v5797_v2  ;;  %v8174_v48 = vadd.f32 %v8173_v22, %v8172_v37  ;;  %v6097_v35 = vmax.f32 %v6085_v17, 0.0  ;;  %v11634_v19 = vld [vmem:[#allocation61_spill] sm:$0xff]  ;;  %v11635_v2 = vld [vmem:[#allocation64_spill] sm:$0xff]  ;;  %v5505_v22 = vadd.f32 %v8134_v62, %v5242_v16 }
 0x4d0   : > { %v8175_v46 = vpop.f32.mrf.mxu0  ;;  %v8235_v30 = vadd.f32 %v11072_v24, %v11634_v19  ;;  %v5247_v17 = vadd.f32 %v8085_v56, %v11635_v2  ;;  %v8238_v24 = vadd.f32 %v11090_v27, %v11083_v23  ;;  %v8241_v27 = vadd.f32 %v8240_v1, %v11099_v8  ;;  %v11650_v1 = vld [vmem:[#allocation66_spill] sm:$0xff] }
 0x4d1   : > { %v5798_v53 = vadd.f32 %v8174_v48, %v5501_v25  ;;  %v6108_v36 = vpack.c.bf16 %v6097_v35, %v6096_v41  ;;  %v6086_v34 = vadd.f32 %v11078_v5, %v6067_v12  ;;  %v8088_v25 = vadd.f32 %v11637_v18, %v11636_v7  ;;  %v8243_v48 = vpop.f32.mrf.mxu1  ;;  %v11651_v7 = vld [vmem:[#allocation78_spill] sm:$0xff]  ;;  %v11652_v18 = vld [vmem:[#allocation60_spill] sm:$0xff] }
 0x4d2   : > { %v8176_v55 = vpop.f32.mrf.mxu0  ;;  %v8244_v43 = vadd.f32 %v8243_v48, %v8242_v20 }
 0x4d3   : > { %v6068_v21 = vadd.f32 %v8226_v59, %v5798_v53  ;;  %v8177_v28 = vadd.f32 %v8176_v55, %v8175_v46  ;;  %8365 = vmatprep.mubr.bf16.mxu0 %v6108_v36  ;;  %v6098_v33 = vmax.f32 %v6086_v34, 0.0  ;;  %v11638_v53 = vld [vmem:[#allocation67_spill] sm:$0xff]  ;;  %v11640_v34 = vld [vmem:[#allocation84_spill] sm:$0xff] }
 0x4d4   : > { %v8178_v61 = vpop.f32.mrf.mxu0  ;;  %v11639_v36 = vld [vmem:[#allocation59_spill] sm:$0xff] }
 0x4d5   : > { %v6087_v42 = vadd.f32 %v11078_v5, %v6068_v21  ;;  %v5799_v51 = vadd.f32 %v8177_v28, %v5502_v29  ;;  %v8137_v9 = vadd.f32 %v11639_v36, %v11638_v53  ;;  %v5250_v21 = vadd.f32 %v8088_v25, %v11640_v34  ;;  %v11641_v29 = vld [vmem:[#allocation82_spill] sm:$0xff]  ;;  %v11642_v28 = vld [vmem:[#allocation83_spill] sm:$0xff] }
 0x4d6   : > { %v8179_v47 = vpop.f32.mrf.mxu0  ;;  %v8091_v50 = vadd.f32 %v11642_v28, %v11641_v29  ;;  %v8146_v25 = vadd.f32 %v11652_v18, %v11651_v7 }
 0x4d7   : > { %v6099_v54 = vmax.f32 %v6087_v42, 0.0  ;;  %v6069_v11 = vadd.f32 %v8229_v38, %v5799_v51  ;;  %v8180_v45 = vadd.f32 %v8179_v47, %v8178_v61  ;;  %v8245_v42 = vpop.f32.mrf.mxu1  ;;  %v5506_v14 = vadd.f32 %v8137_v9, %v5247_v17  ;;  %v11644_v47 = vld [vmem:[#allocation75_spill] sm:$0xff] }
 0x4d8   : > { %v8181_v4 = vpop.f32.mrf.mxu0 }
 0x4d9   : > { %v6109_v13 = vpack.c.bf16 %v6099_v54, %v6098_v33  ;;  %v5800_v0 = vadd.f32 %v8180_v45, %v5503_v6  ;;  %v6088_v52 = vadd.f32 %v11078_v5, %v6069_v11  ;;  %v11643_v6 = vld [vmem:[#allocation58_spill] sm:$0xff]  ;;  %v11645_v45 = vld [vmem:[#allocation85_spill] sm:$0xff]  ;;  %v8246_v63 = vpop.f32.mrf.mxu1 }
 0x4da   : > { %v8182_v40 = vpop.f32.mrf.mxu0  ;;  %v8140_v33 = vadd.f32 %v11644_v47, %v11643_v6  ;;  %v11654_v6 = vld [vmem:[#allocation86_spill] sm:$0xff] }
 0x4db   : > { %v6070_v3 = vadd.f32 %v8232_v58, %v5800_v0  ;;  %v8183_v10 = vadd.f32 %v8182_v40, %v8181_v4  ;;  %8366 = vmatmul.mubr.bf16.vlgmr.msra.gmra.mxu0 %v6109_v13  ;;  %v6100_v46 = vmax.f32 %v6088_v52, 0.0  ;;  %v5255_v4 = vadd.f32 %v8091_v50, %v11645_v45  ;;  %v11647_v13 = vld [vmem:[#allocation50_spill] sm:$0xff]  ;;  %v11649_v52 = vld [vmem:[#allocation91_spill] sm:$0xff]  ;;  %v8248_v19 = vpop.f32.mrf.mxu1 }
 0x4dc   : > { %v8184_v37 = vpop.f32.mrf.mxu0  ;;  %v8094_v58 = vadd.f32 %v11647_v13, %v11646_v32  ;;  %v5507_v0 = vadd.f32 %v8140_v33, %v5250_v21  ;;  %v11656_v13 = vld [vmem:[#allocation69_spill] sm:$0xff] }
 0x4dd   : > { %v5801_v60 = vadd.f32 %v8183_v10, %v5504_v26  ;;  %v6089_v15 = vadd.f32 %v11078_v5, %v6070_v3  ;;  %v11648_v10 = vld [vmem:[#allocation74_spill] sm:$0xff]  ;;  %v8249_v48 = vpop.f32.mrf.mxu1 }
 0x4de   : > { %v8185_v12 = vpop.f32.mrf.mxu0  ;;  %v8143_v31 = vadd.f32 %v11649_v52, %v11648_v10  ;;  %v8250_v9 = vadd.f32 %v8249_v48, %v8248_v19  ;;  %v11659_v19 = vld [vmem:[#allocation89_spill] sm:$0xff] }
 0x4df   : > { %v6071_v41 = vadd.f32 %v8235_v30, %v5801_v60  ;;  %v8186_v35 = vadd.f32 %v8185_v12, %v8184_v37  ;;  %v6101_v57 = vmax.f32 %v6089_v15, 0.0  ;;  %v5258_v37 = vadd.f32 %v8094_v58, %v11650_v1 }
 0x4e0   : > { %v8187_v59 = vpop.f32.mrf.mxu0  ;;  %v5508_v15 = vadd.f32 %v8143_v31, %v5255_v4  ;;  %v8247_v12 = vadd.f32 %v8246_v63, %v8245_v42  ;;  %v11153_v42 = vld [vmem:[%s11421_s11] ss:$0 sm:$0xff] }
 0x4e1   : > { %v5802_v49 = vadd.f32 %v8186_v35, %v5505_v22  ;;  %v6110_v55 = vpack.c.bf16 %v6101_v57, %v6100_v46  ;;  %v6090_v38 = vadd.f32 %v11078_v5, %v6071_v41  ;;  %v5509_v35 = vadd.f32 %v8146_v25, %v5258_v37 }
 0x4e2   : > { %v8188_v61 = vpop.f32.mrf.mxu0 }
 0x4e3   : > { %v6072_v51 = vadd.f32 %v8238_v24, %v5802_v49  ;;  %v8189_v39 = vadd.f32 %v8188_v61, %v8187_v59  ;;  %8369 = vmatprep.mubr.bf16.mxu0 %v6110_v55  ;;  %v6102_v44 = vmax.f32 %v6090_v38, 0.0  ;;  %v11653_v38 = vld [vmem:[#allocation65_spill] sm:$0xff] }
 0x4e4   : > { %v8190_v54 = vpop.f32.mrf.mxu0 }
 0x4e5   : > { %v6091_v23 = vadd.f32 %v11078_v5, %v6072_v51  ;;  %v5803_v11 = vadd.f32 %v8189_v39, %v5506_v14 }
 0x4e6   : > { %v8191_v16 = vpop.f32.mrf.mxu0 }
 0x4e7   : > { %v6103_v56 = vmax.f32 %v6091_v23, 0.0  ;;  %v6073_v40 = vadd.f32 %v8241_v27, %v5803_v11  ;;  %v8192_v3 = vadd.f32 %v8191_v16, %v8190_v54  ;;  %v11655_v23 = vld [vmem:[#allocation87_spill] sm:$0xff] }
 0x4e8   : > { %v8193_v26 = vpop.f32.mrf.mxu0 }
 0x4e9   : > { %v5804_v62 = vadd.f32 %v8192_v3, %v5507_v0  ;;  %v6111_v8 = vpack.c.bf16 %v6103_v56, %v6102_v44  ;;  %v6092_v17 = vadd.f32 %v11078_v5, %v6073_v40 }
 0x4ea   : > { %v8194_v30 = vpop.f32.mrf.mxu0 }
 0x4eb   : > { %v6074_v60 = vadd.f32 %v8244_v43, %v5804_v62  ;;  %v8195_v2 = vadd.f32 %v8194_v30, %v8193_v26  ;;  %8370 = vmatmul.mubr.bf16.gmra.mxu0 %v6111_v8  ;;  %v6104_v53 = vmax.f32 %v6092_v17, 0.0  ;;  %v11657_v26 = vld [vmem:[#allocation71_spill] sm:$0xff]  ;;  %v11658_v43 = vld [vmem:[#allocation88_spill] sm:$0xff] }
 0x4ec   : > { %v8196_v22 = vpop.f32.mrf.mxu0 }
 0x4ed   : > { %v5805_v41 = vadd.f32 %v8195_v2, %v5508_v15  ;;  %v6093_v20 = vadd.f32 %v11078_v5, %v6074_v60 }
 0x4ee   : > { %v8197_v46 = vpop.f32.mrf.mxu0 }
 0x4ef   : > { %v6075_v57 = vadd.f32 %v8247_v12, %v5805_v41  ;;  %v8198_v59 = vadd.f32 %v8197_v46, %v8196_v22  ;;  %v6105_v36 = vmax.f32 %v6093_v20, 0.0  ;;  %v11660_v22 = vld [vmem:[#allocation77_spill] sm:$0xff] }
 0x4f1   : > { %v5806_v24 = vadd.f32 %v8198_v59, %v5509_v35  ;;  %v6112_v49 = vpack.c.bf16 %v6105_v36, %v6104_v53  ;;  %v6094_v55 = vadd.f32 %v11078_v5, %v6075_v57 }
 0x4f3   : > { %v6076_v34 = vadd.f32 %v8250_v9, %v5806_v24  ;;  %8373 = vmatprep.mubr.bf16.mxu0 %v6112_v49  ;;  %v6106_v29 = vmax.f32 %v6094_v55, 0.0  ;;  %v11661_v55 = vld [vmem:[#allocation72_spill] sm:$0xff] }
 0x4f5   : > { %v6095_v21 = vadd.f32 %v11078_v5, %v6076_v34 }
 0x4f7   : > { %v6107_v28 = vmax.f32 %v6095_v21, 0.0 }
 0x4f9   : > { %v6113_v50 = vpack.c.bf16 %v6107_v28, %v6106_v29  ;;  %v11662_v28 = vld [vmem:[#allocation73_spill] sm:$0xff] }
 0x4fb   : > { %8374 = vmatmul.mubr.bf16.gmra.mxu0 %v6113_v50 }
 0x59b   : > { %v8367_v61 = vpop.f32.mrf.mxu0 }
 0x59c   : > { %v6262_v51 = vadd.f32 %v8367_v61, %v11653_v38 }
 0x59d   : > { %v6213_v14 = vpop.f32.mrf.mxu0 }
 0x59e   : > { %v6281_v39 = vadd.f32 %v11153_v42, %v6262_v51  ;;  %v6260_v47 = vadd.f32 %v6213_v14, %v11654_v6  ;;  %v11663_v14 = vld [vmem:[#allocation90_spill] sm:$0xff] }
 0x59f   : > { %v8368_v33 = vpop.f32.mrf.mxu0 }
 0x5a0   : > { %v6293_v54 = vsub.f32 0.0, %v6281_v39  ;;  %v6279_v5 = vadd.f32 %v11153_v42, %v6260_v47  ;;  %v6263_v27 = vadd.f32 %v8368_v33, %v11655_v23  ;;  %v8975_v33 = vld [vmem:[#allocation2 + $0x18] sm:$0xe] }
 0x5a1   : > { %v6216_v11 = vpop.f32.mrf.mxu0 }
 0x5a2   : > { %v6307_v45 = vmul.f32 1.442695, %v6293_v54  ;;  %v6291_v4 = vsub.f32 0.0, %v6279_v5  ;;  %v6282_v32 = vadd.f32 %v11153_v42, %v6263_v27  ;;  %v6261_v58 = vadd.f32 %v6216_v11, %v11656_v13  ;;  %v11664_v5 = vld [vmem:[#allocation37_spill] sm:$0xff] }
 0x5a3   : > { %v2362_v54 = vunpack.c.l.bf16 %v8975_v33  ;;  %v6438_v23 = vrot.slane %v11664_v5, 6  ;;  %v8976_v27 = vld [vmem:[#allocation2 + $0x20] sm:$0xff]  }
 0x5a4   : > { %8865 = vpow2.f32 %v6307_v45  ;;  %v6303_v0 = vmul.f32 1.442695, %v6291_v4  ;;  %v6294_v16 = vsub.f32 0.0, %v6282_v32  ;;  %v6280_v63 = vadd.f32 %v11153_v42, %v6261_v58  ;;  %v8977_v45 = vld [vmem:[#allocation2 + $0x1c] sm:$0xf] }
 0x5a5   : > { %v2365_v11 = vunpack.c.h.bf16 %v8976_v27  ;;  %v2363_v4 = vunpack.c.l.bf16 %v8977_v45 }
 0x5a6   : > { %8867 = vpow2.f32 %v6303_v0  ;;  %v6309_v44 = vmul.f32 1.442695, %v6294_v16  ;;  %v6292_v56 = vsub.f32 0.0, %v6280_v63  ;;  %v11665_v16 = vld [vmem:[#allocation76_spill] sm:$0xff] }
 0x5a8   : > { %8869 = vpow2.f32 %v6309_v44  ;;  %v6305_v40 = vmul.f32 1.442695, %v6292_v56 }
 0x5aa   : > { %8871 = vpow2.f32 %v6305_v40  ;;  %v11666_v40 = vld [vmem:[#allocation39_spill] sm:$0xff] }
 0x5ab   : > { %v8371_v3 = vpop.f32.mrf.mxu0 }
 0x5ac   : > { %v6266_v10 = vadd.f32 %v8371_v3, %v11657_v26  ;;  %v6441_v3 = vrot.slane %v11666_v40, 6  ;;  %v11667_v26 = vld [vmem:[#allocation40_spill] sm:$0xff] }
 0x5ad   : > { %v6229_v52 = vpop.f32.mrf.mxu0 }
 0x5ae   : > { %v6285_v31 = vadd.f32 %v11153_v42, %v6266_v10  ;;  %v6264_v62 = vadd.f32 %v6229_v52, %v11658_v43  ;;  %v6443_v10 = vrot.slane %v11667_v26, 6  ;;  %v2364_v52 = vunpack.c.l.bf16 %v8976_v27 }
 0x5af   : > { %v8372_v8 = vpop.f32.mrf.mxu0 }
 0x5b0   : > { %v6297_v1 = vsub.f32 0.0, %v6285_v31  ;;  %v6283_v37 = vadd.f32 %v11153_v42, %v6264_v62  ;;  %v6267_v30 = vadd.f32 %v8372_v8, %v11659_v19 }
 0x5b1   : > { %v8866_v60 = vpop.eup %8865  ;;  %v6232_v15 = vpop.f32.mrf.mxu0 }
 0x5b2   : > { %v6329_v2 = vadd.f32 1.0, %v8866_v60  ;;  %v6315_v17 = vmul.f32 1.442695, %v6297_v1  ;;  %v6295_v7 = vsub.f32 0.0, %v6283_v37  ;;  %v6286_v18 = vadd.f32 %v11153_v42, %v6267_v30 }
 0x5b3   : > { %v8868_v25 = vpop.eup %8867  ;;  %v6265_v12 = vadd.f32 %v6232_v15, %v11660_v22  ;;  %v11668_v22 = vld [vmem:[#allocation38_spill] sm:$0xff] }
 0x5b4   : > { %8873 = vrcp.f32 %v6329_v2  ;;  %v6327_v41 = vadd.f32 1.0, %v8868_v25  ;;  %v6311_v20 = vmul.f32 1.442695, %v6295_v7  ;;  %v6298_v48 = vsub.f32 0.0, %v6286_v18 }
 0x5b5   : > { %v8870_v35 = vpop.eup %8869  ;;  %8875 = vpow2.f32 %v6315_v17  ;;  %v6284_v46 = vadd.f32 %v11153_v42, %v6265_v12  ;;  %v6439_v12 = vrot.slane %v11668_v22, 6 }
 0x5b6   : > { %8877 = vrcp.f32 %v6327_v41  ;;  %v6330_v57 = vadd.f32 1.0, %v8870_v35  ;;  %v6317_v59 = vmul.f32 1.442695, %v6298_v48 }
 0x5b7   : > { %v8872_v53 = vpop.eup %8871  ;;  %8879 = vpow2.f32 %v6311_v20  ;;  %v6296_v36 = vsub.f32 0.0, %v6284_v46 }
 0x5b8   : > { %8881 = vrcp.f32 %v6330_v57  ;;  %v6328_v9 = vadd.f32 1.0, %v8872_v53  ;;  %v6444_v53 = vsel %vm4823_vm4, %v6441_v3, %v6443_v10 }
 0x5b9   : > { %8883 = vpow2.f32 %v6317_v59  ;;  %v6313_v24 = vmul.f32 1.442695, %v6296_v36  ;;  %v11192_v59 = vld [vmem:[%s11422_s12] ss:$0 sm:$0xff] }
 0x5ba   : > { %8885 = vrcp.f32 %v6328_v9 }
 0x5bb   : > { %8887 = vpow2.f32 %v6313_v24  ;;  %v8375_v49 = vpop.f32.mrf.mxu0 }
 0x5bc   : > { %v6270_v34 = vadd.f32 %v8375_v49, %v11661_v55 }
 0x5bd   : > { %v6245_v21 = vpop.f32.mrf.mxu0 }
 0x5be   : > { %v6289_v29 = vadd.f32 %v11153_v42, %v6270_v34  ;;  %v6268_v50 = vadd.f32 %v6245_v21, %v11662_v28  ;;  %v6440_v28 = vsel %vm4823_vm4, %v6438_v23, %v6439_v12 }
 0x5bf   : > { %v8376_v61 = vpop.f32.mrf.mxu0 }
 0x5c0   : > { %v6301_v38 = vsub.f32 0.0, %v6289_v29  ;;  %v6287_v51 = vadd.f32 %v11153_v42, %v6268_v50  ;;  %v6271_v39 = vadd.f32 %v8376_v61, %v11663_v14  ;;  %v6442_v50 = vsel %vm4823_vm4, %v6439_v12, %v6441_v3 }
 0x5c1   : > { %v8874_v6 = vpop.eup %8873  ;;  %v6248_v47 = vpop.f32.mrf.mxu0 }
 0x5c2   : > { %v8876_v32 = vpop.eup %8875  ;;  %v6323_v13 = vmul.f32 1.442695, %v6301_v38  ;;  %v6299_v58 = vsub.f32 0.0, %v6287_v51  ;;  %v6290_v0 = vadd.f32 %v11153_v42, %v6271_v39  ;;  %v6269_v63 = vadd.f32 %v6248_v47, %v11665_v16 }
 0x5c3   : > { %v8878_v44 = vpop.eup %8877  ;;  %v6333_v56 = vadd.f32 1.0, %v8876_v32  ;;  %v6367_v30 = vrot.slane %v8874_v6, 6 }
 0x5c4   : > { %v8880_v31 = vpop.eup %8879  ;;  %8889 = vpow2.f32 %v6323_v13  ;;  %v6319_v43 = vmul.f32 1.442695, %v6299_v58  ;;  %v6302_v62 = vsub.f32 0.0, %v6290_v0  ;;  %v6288_v8 = vadd.f32 %v11153_v42, %v6269_v63 }
 0x5c5   : > { %v11182_v1 = vpop.eup %8881  ;;  %8891 = vrcp.f32 %v6333_v56  ;;  %v6331_v37 = vadd.f32 1.0, %v8880_v31  ;;  %v6364_v19 = vrot.slane %v8878_v44, 6  ;;  %v8978_v56 = vld [vmem:[#allocation2 + $0x28] sm:$0xff]  }
 0x5c6   : > { %v8884_v60 = vpop.eup %8883  ;;  %8893 = vpow2.f32 %v6319_v43  ;;  %v6325_v15 = vmul.f32 1.442695, %v6302_v62  ;;  %v6300_v2 = vsub.f32 0.0, %v6288_v8  ;;  %v6369_v17 = vrot.slane %v11182_v1, 6  ;;  %v11669_v43 = vld [vmem:[#allocation41_spill] sm:$0xff]  ;;  %v8979_v8 = vld [vmem:[#allocation2 + $0x30] sm:$0xff]  }
 0x5c7   : > { %v8886_v7 = vpop.eup %8885  ;;  %8895 = vrcp.f32 %v6331_v37  ;;  %v6334_v18 = vadd.f32 1.0, %v8884_v60  ;;  %v6400_v25 = vmul.f32 %v6364_v19, %v2362_v54  ;;  %v2366_v3 = vunpack.c.l.bf16 %v8978_v56  ;;  %v11670_v60 = vld [vmem:[#allocation43_spill] sm:$0xff] }
 0x5c8   : > { %v8888_v41 = vpop.eup %8887  ;;  %v6365_v42 = vrot.slane %v8886_v7, 6  ;;  %8897 = vpow2.f32 %v6325_v15  ;;  %v6321_v20 = vmul.f32 1.442695, %v6300_v2  ;;  %v6370_v48 = vsel %vm4823_vm4, %v6367_v30, %v6369_v17 }
 0x5c9   : > { %8899 = vrcp.f32 %v6334_v18  ;;  %v6332_v35 = vadd.f32 1.0, %v8888_v41  ;;  %v6413_v46 = vadd.f32 %v6400_v25, %v2362_v54  ;;  %v6403_v57 = vmul.f32 %v6370_v48, %v2365_v11  ;;  %v11671_v41 = vld [vmem:[#allocation44_spill] sm:$0xff] }
 0x5ca   : > { %8901 = vpow2.f32 %v6321_v20  ;;  %v6366_v36 = vsel %vm4823_vm4, %v6364_v19, %v6365_v42  ;;  %v6368_v9 = vsel %vm4823_vm4, %v6365_v42, %v6367_v30  ;;  %v6445_v62 = vrot.slane %v11669_v43, 6 }
 0x5cb   : > { %8903 = vrcp.f32 %v6332_v35  ;;  %v6474_v24 = vadd.f32 %v6438_v23, %v6413_v46  ;;  %v11199_v49 = vadd.f32 %v6403_v57, %v2365_v11  ;;  %v6401_v55 = vmul.f32 %v6366_v36, %v2363_v4 }
 0x5cc   : > { %v6402_v34 = vmul.f32 %v6368_v9, %v2364_v52  ;;  %v6736_v14 = vrot.slane %v6413_v46, 2  ;;  %v2369_v37 = vunpack.c.h.bf16 %v8979_v8  ;;  %v6449_v15 = vrot.slane %v11670_v60, 6  ;;  %v11672_v9 = vld [vmem:[#allocation42_spill] sm:$0xff] }
 0x5cd   : > { %v6494_v21 = vmul.f32 %v11192_v59, %v6474_v24  ;;  %v6477_v29 = vadd.f32 %v6444_v53, %v11199_v49  ;;  %v6414_v61 = vadd.f32 %v6401_v55, %v2363_v4  ;;  %v6741_v11 = vrot.slane %v11199_v49, 2 }
 0x5ce   : > { %v6415_v38 = vadd.f32 %v6402_v34, %v2364_v52  ;;  %v2368_v2 = vunpack.c.l.bf16 %v8979_v8  ;;  %v6451_v42 = vrot.slane %v11671_v41, 6  ;;  %v2367_v46 = vunpack.c.h.bf16 %v8978_v56  ;;  %v8980_v56 = vld [vmem:[#allocation2 + $0x38] sm:$0xff]   ;;  %v8981_v8 = vld [vmem:[#allocation2 + $0x48] sm:$0x1] }
 0x5cf   : > { %v6508_v51 = vsel %vm6507_vm6, %v6494_v21, 0.0  ;;  %v6497_v39 = vmul.f32 %v11192_v59, %v6477_v29  ;;  %v6475_v6 = vadd.f32 %v6440_v28, %v6414_v61  ;;  %v6737_v47 = vrot.slane %v6414_v61, 2 }
 0x5d0   : > { %6509 = vadd.xlane.f32.xlu0 %v6508_v51  ;;  %v6476_v33 = vadd.f32 %v6442_v50, %v6415_v38  ;;  %v6739_v54 = vrot.slane %v6415_v38, 2  ;;  %v6446_v53 = vsel %vm4823_vm4, %v6443_v10, %v6445_v62  ;;  %v6447_v24 = vrot.slane %v11672_v9, 6 }
 0x5d1   : > { %v8890_v27 = vpop.eup %8889  ;;  %6515 = vadd.xlane.f32.xlu1 %v6497_v39  ;;  %v6495_v23 = vmul.f32 %v11192_v59, %v6475_v6  ;;  %v11209_v4 = vsel %vm4868_vm5, %v6736_v14, %v6737_v47 }
 0x5d2   : > { %v8892_v45 = vpop.eup %8891  ;;  %v6337_v32 = vadd.f32 1.0, %v8890_v27  ;;  %v6496_v58 = vmul.f32 %v11192_v59, %v6476_v33  ;;  %v11213_v0 = vsel %vm4868_vm5, %v6737_v47, %v6739_v54  ;;  %v11216_v16 = vsel %vm4868_vm5, %v6739_v54, %v6741_v11 }
 0x5d3   : > { %v8894_v13 = vpop.eup %8893  ;;  %v6375_v18 = vrot.slane %v8892_v45, 6  ;;  %v6450_v10 = vsel %vm4823_vm4, %v6447_v24, %v6449_v15  ;;  %v6448_v39 = vsel %vm4823_vm4, %v6445_v62, %v6447_v24 }
 0x5d4   : > { %v8896_v63 = vpop.eup %8895  ;;  %v6335_v44 = vadd.f32 1.0, %v8894_v13  ;;  %6511 = vadd.xlane.f32.xlu0 %v6495_v23  ;;  %8905 = vrcp.f32 %v6337_v32 }
 0x5d5   : > { %v8898_v52 = vpop.eup %8897  ;;  %v6371_v31 = vrot.slane %v8896_v63, 6  ;;  %6513 = vadd.xlane.f32.xlu1 %v6496_v58 }
 0x5d6   : > { %v11219_v19 = vpop.eup %8899  ;;  %8907 = vrcp.f32 %v6335_v44  ;;  %v6338_v30 = vadd.f32 1.0, %v8898_v52 }
 0x5d7   : > { %v8902_v7 = vpop.eup %8901  ;;  %v6377_v25 = vrot.slane %v11219_v19, 6  ;;  %v6372_v12 = vsel %vm4823_vm4, %v6369_v17, %v6371_v31  ;;  %v6452_v17 = vsel %vm4823_vm4, %v6449_v15, %v6451_v42 }
 0x5d8   : > { %v8904_v20 = vpop.eup %8903  ;;  %8909 = vrcp.f32 %v6338_v30  ;;  %v6336_v48 = vadd.f32 1.0, %v8902_v7  ;;  %v6404_v35 = vmul.f32 %v6372_v12, %v2366_v3 }
 0x5d9   : > { %v6373_v57 = vrot.slane %v8904_v20, 6  ;;  %v6378_v36 = vsel %vm4823_vm4, %v6375_v18, %v6377_v25 }
 0x5da   : > { %8911 = vrcp.f32 %v6336_v48  ;;  %v6417_v1 = vadd.f32 %v6404_v35, %v2366_v3  ;;  %v6407_v49 = vmul.f32 %v6378_v36, %v2369_v37  ;;  %v11673_v3 = vld [vmem:[#allocation45_spill] sm:$0xff] }
 0x5db   : > { %v6376_v55 = vsel %vm4823_vm4, %v6373_v57, %v6375_v18  ;;  %v6374_v34 = vsel %vm4823_vm4, %v6371_v31, %v6373_v57  ;;  %v6453_v52 = vrot.slane %v11673_v3, 6  ;;  %v8982_v18 = vld [vmem:[#allocation2 + $0x40] sm:$0xff]  }
 0x5dc   : > { %v6478_v21 = vadd.f32 %v6446_v53, %v6417_v1  ;;  %v6743_v29 = vrot.slane %v6417_v1, 2  ;;  %v11235_v28 = vadd.f32 %v6407_v49, %v2369_v37  ;;  %v6406_v50 = vmul.f32 %v6376_v55, %v2368_v2  ;;  %v11676_v55 = vld [vmem:[#allocation46_spill] sm:$0xff] }
 0x5dd   : > { %v6405_v61 = vmul.f32 %v6374_v34, %v2367_v46  ;;  %v2374_v37 = vunpack.c.l.bf16 %v8981_v8  ;;  %v2373_v12 = vunpack.c.h.bf16 %v8982_v18  ;;  %v6454_v24 = vsel %vm4823_vm4, %v6451_v42, %v6453_v52 }
 0x5de   : > { %v6498_v38 = vmul.f32 %v11192_v59, %v6478_v21  ;;  %v6481_v51 = vadd.f32 %v6452_v17, %v11235_v28  ;;  %v6419_v14 = vadd.f32 %v6406_v50, %v2368_v2  ;;  %v11242_v47 = vsel %vm4868_vm5, %v6741_v11, %v6743_v29  ;;  %v11674_v2 = vld [vmem:[#allocation47_spill] sm:$0xff] }
 0x5df   : > { %v6418_v6 = vadd.f32 %v6405_v61, %v2367_v46  ;;  %v6749_v54 = vrot.slane %v11235_v28, 2  ;;  %v2370_v11 = vunpack.c.l.bf16 %v8980_v56  ;;  %v6457_v7 = vrot.slane %v11674_v2, 6  ;;  %v11675_v46 = vld [vmem:[#allocation48_spill] sm:$0xff] }
 0x5e0   : > { %6517 = vadd.xlane.f32.xlu0 %v6498_v38  ;;  %v6501_v33 = vmul.f32 %v11192_v59, %v6481_v51  ;;  %v6480_v27 = vadd.f32 %v6450_v10, %v6419_v14  ;;  %v6747_v45 = vrot.slane %v6419_v14, 2  ;;  %v6459_v57 = vrot.slane %v11675_v46, 6 }
 0x5e1   : > { %v6479_v32 = vadd.f32 %v6448_v39, %v6418_v6  ;;  %v6745_v23 = vrot.slane %v6418_v6, 2  ;;  %v8906_v13 = vpop.eup %8905  ;;  %v2371_v1 = vunpack.c.h.bf16 %v8980_v56  ;;  %v2372_v49 = vunpack.c.l.bf16 %v8982_v18 }
 0x5e2   : > { %6523 = vadd.xlane.f32.xlu1 %v6501_v33  ;;  %v6500_v58 = vmul.f32 %v11192_v59, %v6480_v27  ;;  %v11248_v63 = vsel %vm4868_vm5, %v6747_v45, %v6749_v54  ;;  %v6383_v20 = vrot.slane %v8906_v13, 6  ;;  %v6455_v34 = vrot.slane %v11676_v55, 6 }
 0x5e3   : > { %v8908_v44 = vpop.eup %8907  ;;  %v11252_v31 = vsel %vm4868_vm5, %v6743_v29, %v6745_v23  ;;  %v11255_v62 = vsel %vm4868_vm5, %v6745_v23, %v6747_v45  ;;  %v6499_v30 = vmul.f32 %v11192_v59, %v6479_v32  ;;  %v6460_v61 = vsel %vm4823_vm4, %v6457_v7, %v6459_v57 }
 0x5e4   : > { %v6379_v19 = vrot.slane %v8908_v44, 6  ;;  %6521 = vadd.xlane.f32.xlu0 %v6500_v58  ;;  %v6456_v6 = vsel %vm4823_vm4, %v6453_v52, %v6455_v34  ;;  %v6458_v33 = vsel %vm4823_vm4, %v6455_v34, %v6457_v7 }
 0x5e5   : > { %v8910_v15 = vpop.eup %8909 }
 0x5e6   : > { %v6385_v48 = vrot.slane %v8910_v15, 6  ;;  %6519 = vadd.xlane.f32.xlu1 %v6499_v30  ;;  %v6380_v35 = vsel %vm4823_vm4, %v6377_v25, %v6379_v19 }
 0x5e7   : > { %v8912_v53 = vpop.eup %8911  ;;  %v6408_v36 = vmul.f32 %v6380_v35, %v2370_v11 }
 0x5e8   : > { %v6381_v17 = vrot.slane %v8912_v53, 6  ;;  %v6386_v21 = vsel %vm4823_vm4, %v6383_v20, %v6385_v48  ;;  %v6412_v29 = vmul.f32 %v6385_v48, %v2374_v37  ;;  %v11290_v53 = vld [vmem:[#allocation5] ss:$0 sm:$0xff] }
 0x5e9   : > { %v6421_v28 = vadd.f32 %v6408_v36, %v2370_v11  ;;  %v6411_v50 = vmul.f32 %v6386_v21, %v2373_v12 }
 0x5ea   : > { %v6382_v10 = vsel %vm4823_vm4, %v6379_v19, %v6381_v17  ;;  %v6384_v25 = vsel %vm4823_vm4, %v6381_v17, %v6383_v20  ;;  %v6425_v38 = vadd.f32 %v6412_v29, %v2374_v37 }
 0x5eb   : > { %v6482_v51 = vadd.f32 %v6454_v24, %v6421_v28  ;;  %v6751_v14 = vrot.slane %v6421_v28, 2  ;;  %v6409_v42 = vmul.f32 %v6382_v10, %v2371_v1  ;;  %v6410_v39 = vmul.f32 %v6384_v25, %v2372_v49 }
 0x5ec   : > { %v6424_v27 = vadd.f32 %v6411_v50, %v2373_v12  ;;  %v6759_v45 = vrot.slane %v6425_v38, 2  ;;  %v6486_v56 = vadd.f32 %v6459_v57, %v6425_v38  ;;  %v9276_v57 = vmov 0  }
 0x5ed   : > { %v6502_v32 = vmul.f32 %v11192_v59, %v6482_v51  ;;  %v6422_v23 = vadd.f32 %v6409_v42, %v2371_v1  ;;  %v6423_v13 = vadd.f32 %v6410_v39, %v2372_v49  ;;  %v11271_v58 = vsel %vm4868_vm5, %v6749_v54, %v6751_v14  ;;  %8615 = vset.pattern.permute.xlu1 %v9276_v57 }
 0x5ee   : > { %v6757_v44 = vrot.slane %v6424_v27, 2  ;;  %v6485_v30 = vadd.f32 %v6460_v61, %v6424_v27  ;;  %v6506_v12 = vmul.f32 %v11192_v59, %v6486_v56  ;;  %8616 = vset.pattern.permute.xlu0 %v9276_v57 }
 0x5ef   : > { %6525 = vadd.xlane.f32.xlu0 %v6502_v32  ;;  %v6483_v11 = vadd.f32 %v6456_v6, %v6422_v23  ;;  %v6753_v8 = vrot.slane %v6422_v23, 2  ;;  %v6484_v37 = vadd.f32 %v6458_v33, %v6423_v13  ;;  %v6755_v19 = vrot.slane %v6423_v13, 2 }
 0x5f0   : > { %v11274_v52 = vsel %vm4868_vm5, %v6757_v44, %v6759_v45  ;;  %v6505_v48 = vmul.f32 %v11192_v59, %v6485_v30  ;;  %v6533_v35 = vsel %vm4823_vm4, %v6506_v12, 0.0 }
 0x5f1   : > { %v6503_v15 = vmul.f32 %v11192_v59, %v6483_v11  ;;  %v6504_v7 = vmul.f32 %v11192_v59, %v6484_v37  ;;  %v11279_v18 = vsel %vm4868_vm5, %v6751_v14, %v6753_v8  ;;  %v11282_v54 = vsel %vm4868_vm5, %v6753_v8, %v6755_v19 }
 0x5f2   : > { %v11286_v20 = vsel %vm4868_vm5, %v6755_v19, %v6757_v44 }
 0x5f3   : > { %6527 = vadd.xlane.f32.xlu1 %v6503_v15  ;;  %6529 = vadd.xlane.f32.xlu0 %v6504_v7 }
 0x5f7   : > { %6531 = vadd.xlane.f32.xlu1 %v6505_v48  ;;  %6534 = vadd.xlane.f32.xlu0 %v6533_v35 }
 0x659   : > { %v6510_v36 = vpop.xlane.xlu0 %6509 }
 0x65a   : > { %v6543_v24 = vadd.f32 %v11290_v53, %v6510_v36  ;;  %v6516_v1 = vpop.xlane.xlu1 %6515 }
 0x65b   : > { %v6546_v49 = vadd.f32 %v11290_v53, %v6516_v1 }
 0x65c   : > { %v6556_v17 = vsub.f32 0.0, %v6543_v24 }
 0x65d   : > { %v6559_v34 = vsub.f32 0.0, %v6546_v49  ;;  %v6512_v21 = vpop.xlane.xlu0 %6511 }
 0x65e   : > { %v6569_v29 = vmul.f32 1.442695, %v6556_v17  ;;  %v6544_v59 = vadd.f32 %v11290_v53, %v6512_v21  ;;  %v6514_v28 = vpop.xlane.xlu1 %6513 }
 0x65f   : > { %v6575_v50 = vmul.f32 1.442695, %v6559_v34  ;;  %v6545_v10 = vadd.f32 %v11290_v53, %v6514_v28 }
 0x660   : > { %8913 = vpow2.f32 %v6569_v29  ;;  %v6557_v25 = vsub.f32 0.0, %v6544_v59 }
 0x661   : > { %8915 = vpow2.f32 %v6575_v50  ;;  %v6558_v61 = vsub.f32 0.0, %v6545_v10 }
 0x662   : > { %v6571_v38 = vmul.f32 1.442695, %v6557_v25 }
 0x663   : > { %v6573_v51 = vmul.f32 1.442695, %v6558_v61 }
 0x664   : > { %8917 = vpow2.f32 %v6571_v38 }
 0x665   : > { %8919 = vpow2.f32 %v6573_v51 }
 0x669   : > { %v6518_v14 = vpop.xlane.xlu0 %6517 }
 0x66a   : > { %v6547_v42 = vadd.f32 %v11290_v53, %v6518_v14 }
 0x66b   : > { %v6524_v39 = vpop.xlane.xlu1 %6523 }
 0x66c   : > { %v6560_v6 = vsub.f32 0.0, %v6547_v42  ;;  %v6550_v33 = vadd.f32 %v11290_v53, %v6524_v39 }
 0x66d   : > { %v8914_v27 = vpop.eup %8913  ;;  %v6522_v45 = vpop.xlane.xlu0 %6521 }
 0x66e   : > { %v8916_v32 = vpop.eup %8915  ;;  %v6595_v23 = vadd.f32 1.0, %v8914_v27  ;;  %v6577_v13 = vmul.f32 1.442695, %v6560_v6  ;;  %v6563_v44 = vsub.f32 0.0, %v6550_v33  ;;  %v6549_v56 = vadd.f32 %v11290_v53, %v6522_v45 }
 0x66f   : > { %v6598_v11 = vadd.f32 1.0, %v8916_v32  ;;  %v6520_v8 = vpop.xlane.xlu1 %6519 }
 0x670   : > { %8921 = vrcp.f32 %v6595_v23  ;;  %v6583_v37 = vmul.f32 1.442695, %v6563_v44  ;;  %v6548_v19 = vadd.f32 %v11290_v53, %v6520_v8  ;;  %v6562_v12 = vsub.f32 0.0, %v6549_v56 }
 0x671   : > { %v8918_v30 = vpop.eup %8917  ;;  %8923 = vrcp.f32 %v6598_v11 }
 0x672   : > { %v8920_v15 = vpop.eup %8919  ;;  %v6596_v7 = vadd.f32 1.0, %v8918_v30  ;;  %8925 = vpow2.f32 %v6577_v13  ;;  %v6561_v48 = vsub.f32 0.0, %v6548_v19  ;;  %v6581_v36 = vmul.f32 1.442695, %v6562_v12 }
 0x673   : > { %8927 = vpow2.f32 %v6583_v37  ;;  %v6597_v35 = vadd.f32 1.0, %v8920_v15 }
 0x674   : > { %8929 = vrcp.f32 %v6596_v7  ;;  %v6579_v57 = vmul.f32 1.442695, %v6561_v48 }
 0x676   : > { %8931 = vpow2.f32 %v6579_v57 }
 0x677   : > { %8933 = vrcp.f32 %v6597_v35 }
 0x678   : > { %v6526_v24 = vpop.xlane.xlu0 %6525  ;;  %8935 = vpow2.f32 %v6581_v36 }
 0x679   : > { %v6551_v1 = vadd.f32 %v11290_v53, %v6526_v24 }
 0x67b   : > { %v6564_v49 = vsub.f32 0.0, %v6551_v1 }
 0x67c   : > { %v6528_v17 = vpop.xlane.xlu1 %6527  ;;  %v6530_v34 = vpop.xlane.xlu0 %6529 }
 0x67d   : > { %v8922_v21 = vpop.eup %8921  ;;  %v6585_v29 = vmul.f32 1.442695, %v6564_v49  ;;  %v6552_v59 = vadd.f32 %v11290_v53, %v6528_v17  ;;  %v6553_v28 = vadd.f32 %v11290_v53, %v6530_v34 }
 0x67e   : > { %v8924_v50 = vpop.eup %8923  ;;  %6623 = vperm.xlu1 %8615, %v8922_v21  }
 0x67f   : > { %v8926_v10 = vpop.eup %8925  ;;  %8937 = vpow2.f32 %v6585_v29  ;;  %v6565_v25 = vsub.f32 0.0, %v6552_v59  ;;  %v6566_v61 = vsub.f32 0.0, %v6553_v28 }
 0x680   : > { %v8928_v38 = vpop.eup %8927  ;;  %v6599_v51 = vadd.f32 1.0, %v8926_v10  ;;  %v6532_v14 = vpop.xlane.xlu1 %6531 }
 0x681   : > { %v6535_v42 = vpop.xlane.xlu0 %6534  ;;  %v8930_v39 = vpop.eup %8929  ;;  %v6587_v6 = vmul.f32 1.442695, %v6565_v25  ;;  %v6589_v33 = vmul.f32 1.442695, %v6566_v61  ;;  %v6554_v27 = vadd.f32 %v11290_v53, %v6532_v14  ;;  %v6602_v45 = vadd.f32 1.0, %v8928_v38 }
 0x682   : > { %8939 = vrcp.f32 %v6599_v51  ;;  %v6555_v32 = vadd.f32 %v11290_v53, %v6535_v42  ;;  %6635 = vperm.xlu1 %8615, %v8924_v50   ;;  %6627 = vperm.xlu0 %8616, %v8930_v39  }
 0x683   : > { %v6567_v23 = vsub.f32 0.0, %v6554_v27  ;;  %v8932_v13 = vpop.eup %8931  ;;  %8941 = vpow2.f32 %v6587_v6 }
 0x684   : > { %v6568_v44 = vsub.f32 0.0, %v6555_v32  ;;  %v8934_v56 = vpop.eup %8933  ;;  %8943 = vpow2.f32 %v6589_v33  ;;  %v6600_v8 = vadd.f32 1.0, %v8932_v13 }
 0x685   : > { %v6591_v11 = vmul.f32 1.442695, %v6567_v23  ;;  %8945 = vrcp.f32 %v6602_v45  ;;  %v8936_v19 = vpop.eup %8935 }
 0x686   : > { %v6593_v37 = vmul.f32 1.442695, %v6568_v44  ;;  %6631 = vperm.xlu1 %8615, %v8934_v56   ;;  %v6601_v30 = vadd.f32 1.0, %v8936_v19 }
 0x687   : > { %8947 = vpow2.f32 %v6591_v11 }
 0x688   : > { %8949 = vpow2.f32 %v6593_v37 }
 0x689   : > { %8951 = vrcp.f32 %v6600_v8 }
 0x68a   : > { %8953 = vrcp.f32 %v6601_v30 }
 0x68c   : > { %v8938_v15 = vpop.eup %8937 }
 0x68d   : > { %v6603_v53 = vadd.f32 1.0, %v8938_v15 }
 0x68f   : > { %v8940_v7 = vpop.eup %8939  ;;  %8955 = vrcp.f32 %v6603_v53 }
 0x690   : > { %6639 = vperm.xlu1 %8615, %v8940_v7   ;;  %v8942_v12 = vpop.eup %8941 }
 0x691   : > { %v8944_v48 = vpop.eup %8943  ;;  %v6604_v35 = vadd.f32 1.0, %v8942_v12 }
 0x692   : > { %v8946_v57 = vpop.eup %8945  ;;  %v6605_v36 = vadd.f32 1.0, %v8944_v48 }
 0x693   : > { %8957 = vrcp.f32 %v6604_v35 }
 0x694   : > { %6651 = vperm.xlu1 %8615, %v8946_v57   ;;  %v8948_v24 = vpop.eup %8947  ;;  %8959 = vrcp.f32 %v6605_v36 }
 0x695   : > { %v8950_v1 = vpop.eup %8949  ;;  %v6606_v49 = vadd.f32 1.0, %v8948_v24 }
 0x696   : > { %v8952_v17 = vpop.eup %8951  ;;  %v6607_v34 = vadd.f32 1.0, %v8950_v1 }
 0x697   : > { %8961 = vrcp.f32 %v6606_v49  ;;  %v8954_v21 = vpop.eup %8953 }
 0x698   : > { %6643 = vperm.xlu1 %8615, %v8952_v17   ;;  %8963 = vrcp.f32 %v6607_v34 }
 0x69c   : > { %6647 = vperm.xlu1 %8615, %v8954_v21   ;;  %v8956_v29 = vpop.eup %8955 }
 0x6a0   : > { %6655 = vperm.xlu1 %8615, %v8956_v29   ;;  %v8958_v59 = vpop.eup %8957 }
 0x6a1   : > { %v8960_v28 = vpop.eup %8959 }
 0x6a2   : > { %6663 = vperm.xlu0 %8616, %v8960_v28  }
 0x6a4   : > { %6659 = vperm.xlu1 %8615, %v8958_v59   ;;  %v8962_v50 = vpop.eup %8961 }
 0x6a5   : > { %v8964_v10 = vpop.eup %8963 }
 0x6a6   : > { %6671 = vperm.xlu0 %8616, %v8964_v10  }
 0x6a8   : > { %6667 = vperm.xlu1 %8615, %v8962_v50  }
 0x6f9   : > { %v6624_v25 = vpop.permute.xlu1 %6623 }
 0x6fa   : > { %v6674_v51 = vrot.slane %v6624_v25, 2 }
 0x6fd   : > { %v6636_v61 = vpop.permute.xlu1 %6635  ;;  %v6628_v38 = vpop.permute.xlu0 %6627 }
 0x6fe   : > { %v6675_v14 = vrot.slane %v6628_v38, 2  ;;  %v6679_v13 = vrot.slane %v6636_v61, 2 }
 0x700   : > { %v6676_v42 = vsel %vm4868_vm5, %v6674_v51, %v6675_v14 }
 0x701   : > { %v6632_v39 = vpop.permute.xlu1 %6631  ;;  %v6711_v33 = vmul.f32 %v6676_v42, %v11664_v5 }
 0x702   : > { %v6677_v6 = vrot.slane %v6632_v39, 2 }
 0x703   : > { %v6773_v32 = vadd.f32 %v11209_v4, %v6711_v33 }
 0x704   : > { %v6678_v27 = vsel %vm4868_vm5, %v6675_v14, %v6677_v6  ;;  %v6680_v56 = vsel %vm4868_vm5, %v6677_v6, %v6679_v13 }
 0x705   : > { %v6712_v45 = vmul.f32 %v6678_v27, %v11668_v22  ;;  %v6713_v37 = vmul.f32 %v6680_v56, %v11666_v40 }
 0x707   : > { %v6774_v23 = vadd.f32 %v11213_v0, %v6712_v45  ;;  %v6775_v22 = vadd.f32 %v11216_v16, %v6713_v37 }
 0x709   : > { %v7397_v44 = vpack.c.bf16 %v6774_v23, %v6773_v32 }
 0x70b   : > { %7398 = vst [vmem:[%s9554_s27] sm:$0xff] %v7397_v44   ;;  %v6640_v11 = vpop.permute.xlu1 %6639 }
 0x70c   : > { %v6681_v8 = vrot.slane %v6640_v11, 2 }
 0x70e   : > { %v6682_v5 = vsel %vm4868_vm5, %v6679_v13, %v6681_v8 }
 0x70f   : > { %v6714_v19 = vmul.f32 %v6682_v5, %v11667_v26  ;;  %v6652_v30 = vpop.permute.xlu1 %6651 }
 0x710   : > { %v6687_v48 = vrot.slane %v6652_v30, 2 }
 0x711   : > { %v6776_v4 = vadd.f32 %v11242_v47, %v6714_v19 }
 0x713   : > { %v7402_v0 = vpack.c.bf16 %v6776_v4, %v6775_v22  ;;  %v6644_v15 = vpop.permute.xlu1 %6643 }
 0x714   : > { %v6683_v53 = vrot.slane %v6644_v15, 2 }
 0x715   : > { %7424 = vst [vmem:[%s9554_s27 + $0x8] sm:$0xff] %v7402_v0  }
 0x716   : > { %v6684_v7 = vsel %vm4868_vm5, %v6681_v8, %v6683_v53 }
 0x717   : > { %v6648_v12 = vpop.permute.xlu1 %6647  ;;  %v6715_v40 = vmul.f32 %v6684_v7, %v11669_v43 }
 0x718   : > { %v6685_v35 = vrot.slane %v6648_v12, 2 }
 0x719   : > { %v6777_v24 = vadd.f32 %v11252_v31, %v6715_v40 }
 0x71a   : > { %v6686_v57 = vsel %vm4868_vm5, %v6683_v53, %v6685_v35  ;;  %v6688_v26 = vsel %vm4868_vm5, %v6685_v35, %v6687_v48 }
 0x71b   : > { %v6716_v16 = vmul.f32 %v6686_v57, %v11672_v9  ;;  %v6656_v47 = vpop.permute.xlu1 %6655  ;;  %v6717_v1 = vmul.f32 %v6688_v26, %v11670_v60 }
 0x71c   : > { %v6689_v36 = vrot.slane %v6656_v47, 2 }
 0x71d   : > { %v6778_v49 = vadd.f32 %v11255_v62, %v6716_v16  ;;  %v6664_v34 = vpop.permute.xlu0 %6663  ;;  %v6779_v28 = vadd.f32 %v11248_v63, %v6717_v1 }
 0x71e   : > { %v6690_v17 = vsel %vm4868_vm5, %v6687_v48, %v6689_v36  ;;  %v6693_v59 = vrot.slane %v6664_v34, 2 }
 0x71f   : > { %v7407_v43 = vpack.c.bf16 %v6778_v49, %v6777_v24  ;;  %v6718_v21 = vmul.f32 %v6690_v17, %v11671_v41  ;;  %v6660_v29 = vpop.permute.xlu1 %6659 }
 0x720   : > { %v6691_v9 = vrot.slane %v6660_v29, 2 }
 0x721   : > { %7425 = vst [vmem:[%s9554_s27 + $0x10] sm:$0xff] %v7407_v43   ;;  %v6780_v31 = vadd.f32 %v11271_v58, %v6718_v21  ;;  %v6672_v50 = vpop.permute.xlu0 %6671 }
 0x722   : > { %v6692_v60 = vsel %vm4868_vm5, %v6689_v36, %v6691_v9  ;;  %v6694_v62 = vsel %vm4868_vm5, %v6691_v9, %v6693_v59  ;;  %v6697_v38 = vrot.slane %v6672_v50, 2 }
 0x723   : > { %v7412_v10 = vpack.c.bf16 %v6780_v31, %v6779_v28  ;;  %v6719_v41 = vmul.f32 %v6692_v60, %v11673_v3  ;;  %v6720_v25 = vmul.f32 %v6694_v62, %v11676_v55  ;;  %v6668_v61 = vpop.permute.xlu1 %6667 }
 0x724   : > { %v6695_v51 = vrot.slane %v6668_v61, 2 }
 0x725   : > { %7426 = vst [vmem:[%s9554_s27 + $0x18] sm:$0xff] %v7412_v10   ;;  %v6781_v63 = vadd.f32 %v11279_v18, %v6719_v41  ;;  %v6782_v58 = vadd.f32 %v11282_v54, %v6720_v25 }
 0x726   : > { %v6696_v14 = vsel %vm4868_vm5, %v6693_v59, %v6695_v51  ;;  %v6698_v42 = vsel %vm4868_vm5, %v6695_v51, %v6697_v38 }
 0x727   : > { %v7417_v3 = vpack.c.bf16 %v6782_v58, %v6781_v63  ;;  %v6721_v39 = vmul.f32 %v6696_v14, %v11674_v2  ;;  %v6722_v55 = vmul.f32 %v6698_v42, %v11675_v46 }
 0x729   : > { %7427 = vst [vmem:[%s9554_s27 + $0x20] sm:$0xff] %v7417_v3   ;;  %v6783_v6 = vadd.f32 %v11286_v20, %v6721_v39  ;;  %v6784_v18 = vadd.f32 %v11274_v52, %v6722_v55 }
 0x72b   : > { %v7422_v2 = vpack.c.bf16 %v6784_v18, %v6783_v6 }
 0x72d   : > { %7428 = vst [vmem:[%s9554_s27 + $0x28] sm:$0xff] %v7422_v2  }
 0x72e   : > { %9170 = shalt.err (!%p9167_p10)
}
 0x72f   : > { %s9171_s27 = scalar_lea.hbm %s11352_s15, 768  ;;  %s9175_s21 = scalar_lea.hbm %s11677_s23, 6144 }
 0x730   : > { %p9172_p12 = scmp.ne.s32.totalorder %s11352_s15, %s9171_s27  ;;  %p9176_p2 = scmp.lt.s32.totalorder %s11352_s15, %s11677_s23 }
 0x731   : > { %p9177_p5 = scmp.lt.s32.totalorder %s9175_s21, %s9171_s27 }
 0x732   : > { %p9173_p0 = pnand %p9172_p12, %p9410_p3 }
 0x733   : > { %p9178_p6 = por %p9177_p5, %p9176_p2 }
 0x734   : > { %p9174_p1 = pneg %p9173_p0 }
 0x736   : > { %p9179_p7 = pnand %p9178_p6, %p9174_p1 }
 0x738   : > { %9182 = shalt.err (!%p9179_p7)
}
 0x739   : > { %s9278_s20 = smov 64   ;;  %s9279_s18 = smov 4  }
 0x73a   : > { %8399 = dma.vmem_to_hbm [thread:$0]  (%p9410_p3), %s11354_s17, 768, %s11352_s15, %s11359_s25, %s9278_s20, %s9278_s20, %s9279_s18  }
 0x73b PF: > { %s11679_s19 = sld [smem:[#allocation32_spill]] }
 0x73c   : > { %s11680_s24 = sld [smem:[#allocation28_spill]] }
 0x73d   : > { %s11681_s22 = sld [smem:[#allocation35_spill]] }
 0x741   : > { %p8431_p8 = scmp.ge.s32.totalorder %s11679_s19, 2 }
 0x742   : > { %s6876_s4 = sand.u32 1, %s11680_s24  }
 0x743   : > { %p11682_p9 = scmp.ne.s32.totalorder %s11681_s22, 0  ;;  %s6877_s29 = scalar_lea.sflag [#allocation8], %s6876_s4 }
 0x745   : > { %p8418_p11 = pnand %p8431_p8, %p11682_p9 }
 0x747   : > { %p8419_p13 = pneg %p8418_p11 }
 0x749   : > { %9232 = dma.done.wait (%p8419_p13), %s6877_s29, 768  }
 0x74a   : > { %9234 = vsyncadd (%p8419_p13), %s6877_s29, 4294966528  ;;  %s32_s13 = sadd.s32 1, %s11679_s19   ;;  %s11683_s26 = sld [smem:[#allocation29_spill]] }
 0x74b   : > { %p29_p4 = scmp.ge.s32.totalorder %s32_s13, 10   ;;  %s11684_s17 = sld [smem:[#allocation36_spill]] }
 0x74c   : > { %s11685_s18 = sld [smem:[#allocation30_spill]]  ;;  %s11689_s15 = smov %s9241_s16 }
 0x74d   : > { %s11686_s19 = sld [smem:[#allocation31_spill]]  ;;  %31 = sbr.rel (!%p29_p4) target bundleno = 14 (0xe), region = 147 }
 0x74e   : > { %s11687_s20 = sld [smem:[#allocation33_spill]] }
 0x74f   : > { %s11688_s21 = sld [smem:[#allocation34_spill]] }
 0x750   : > { %s11690_s16 = smov %s11683_s26 }
 0x752   :  { %6882 = vsyncpa [#allocation7], 1 }
 0x753   :  { %6884 = vsyncpa [#allocation7 + $0x1], 1 }
 0x754   :  { %6885 = vsyncpa [#allocation10], 1 }
 0x755   :  { %6886 = vsyncpa [#allocation13], 1 }
 0x756   :  { %6887 = vsyncpa [#allocation8], 1 }
 0x757   :  { %6889 = vsyncpa [#allocation8 + $0x1], 1 }
 0x758   :  { %6890 = vsyncmov [#allocation4] }
 0x75b   :  { %s6891_s28 = vpop.sfrf %6890 }
 0x75c   :  { %p7380_p3 = scmp.ne.s32.totalorder %s6891_s28, 0 }
 0x75e   :  { %6895 = shalt.err (%p7380_p3)  }
 0x75f   :  { %6897 = vsyncmov [#allocation4 + $0x1] }
 0x762   :  { %s6898_s25 = vpop.sfrf %6897 }
 0x763   :  { %p7381_p10 = scmp.ne.s32.totalorder %s6898_s25, 0 }
 0x765   :  { %6902 = shalt.err (%p7381_p10)  }

</bundles_post_ra>
